<compile_context>
chip_gen: v7x
topology: tpu7x:2x2x1
jax: 0.10.0
libtpu: 0.0.40
codegen_flags: <defaults>
</compile_context>

<pallas_src>
import jax
import jax.numpy as jnp
from jax.experimental import pallas as pl
from jax.experimental.pallas import tpu as pltpu

CELU_ALPHA = 0.075
BN_EPS = 1e-5


# ----------------------------- small helpers ---------------------------------

def _ceil_to(x, m):
    return (x + m - 1) // m * m


def _compiler_params(vmem_limit_bytes):
    return pltpu.CompilerParams(
        dimension_semantics=("parallel",),
        vmem_limit_bytes=int(vmem_limit_bytes),
    )


def _full_spec(shape):
    """Whole-array (unblocked) VMEM spec for small operands (weights, affines)."""
    nd = len(shape)
    return pl.BlockSpec(tuple(shape), lambda b, nd=nd: (0,) * nd)


def _vmem_budget():
    """~75% of per-core physical VMEM (48 MiB on v7x, 96 MiB on v5e/v6e)."""
    cap = 64 * 1024 * 1024
    try:
        info = pltpu.get_tpu_info()
        cap = int(getattr(info, "vmem_capacity_bytes", 0)) or cap
    except Exception:
        pass
    return cap * 3 // 4


def _vmem_array_bytes(shape, dtype):
    """Conservative VMEM footprint: last dim padded to 128 lanes, second-to-last
    to 8 sublanes."""
    shape = tuple(int(d) for d in shape)
    if len(shape) == 1:
        shape = (1,) + shape
    lanes = _ceil_to(shape[-1], 128)
    subl = _ceil_to(shape[-2], 8)
    outer = 1
    for d in shape[:-2]:
        outer *= d
    return outer * subl * lanes * jnp.dtype(dtype).itemsize


def _per_image_vmem(H, W, Cin, C):
    """Per-image VMEM need of the heaviest stage (2x-buffered blocks + scratch
    + large in-kernel temporaries)."""
    H2, W2 = H // 2, W // 2
    bf16, f32 = jnp.bfloat16, jnp.float32
    conv_pool = (2 * _vmem_array_bytes((H, W, Cin), bf16)        # input (2x buf)
                 + 2 * _vmem_array_bytes((H2, W2, C), bf16)      # pooled out
                 + _vmem_array_bytes((H + 2, W + 2, Cin), bf16)  # halo scratch
                 + _vmem_array_bytes((H * W, 9 * Cin), bf16)     # im2col slab
                 + 2 * _vmem_array_bytes((H * W, C), f32)        # acc + temps
                 + 2 * _vmem_array_bytes((H2, W, C), f32))       # pool buffer
    bn_conv = (4 * _vmem_array_bytes((H2, W2, C), bf16)          # in + out (2x)
               + _vmem_array_bytes((H2 + 2, W2 + 2, C), bf16)    # halo scratch
               + _vmem_array_bytes((H2 * W2, 9 * C), bf16)       # im2col slab
               + 3 * _vmem_array_bytes((H2 * W2, C), f32))       # acc + temps
    return max(conv_pool, bn_conv)


def _pick_batch_tile(N, H, W, Cin, C, vmem_budget):
    """Largest per-step batch B (divisor of N) that fits the VMEM budget,
    preferring an even grid length so both v7x TensorCores get work."""
    per = _per_image_vmem(H, W, Cin, C)
    usable = int(vmem_budget * 0.6)          # headroom: weights, regalloc, misc
    divisors = [d for d in range(1, N + 1) if N % d == 0]
    fitting = [d for d in divisors if d * per <= usable] or [1]
    even_grid = [d for d in fitting if (N // d) % 2 == 0]
    return max(even_grid) if even_grid else max(fitting)


# ----------------------------- in-kernel helpers ------------------------------

def _celu(y):
    """CELU(alpha) on an f32 slab; clamp before exp so the dead branch is safe."""
    neg = CELU_ALPHA * (jnp.exp(jnp.minimum(y, 0.0) * (1.0 / CELU_ALPHA)) - 1.0)
    return jnp.where(y > 0.0, y, neg)


def _partial_stats(flat):
    """[sum; sum-of-squares] over rows of an (M, C) f32 slab -> (1, 2, C)."""
    C = flat.shape[-1]
    s = jnp.sum(flat, axis=0, keepdims=True)
    ss = jnp.sum(flat * flat, axis=0, keepdims=True)
    return jnp.concatenate([s, ss], axis=0).reshape(1, 2, C)


def _store_padded(xpad_ref, interior, H, W):
    """Write `interior` into the centre of the (B, H+2, W+2, C) halo scratch.

    Only the thin zero border is rewritten (not a full zero-fill), and it is
    rewritten EVERY step rather than gated on program_id == 0: with
    dimension_semantics=("parallel",) each TensorCore owns its own scratch and
    only one core ever executes step 0.
    """
    B, Hp, Wp, Cc = xpad_ref.shape
    dt = xpad_ref.dtype
    zcol = jnp.zeros((B, H, 1, Cc), dt)
    xpad_ref[:, 1:H + 1, :, :] = jnp.concatenate(
        [zcol, interior.astype(dt), zcol], axis=2)
    zrow = jnp.zeros((B, 1, Wp, Cc), dt)
    xpad_ref[:, 0:1, :, :] = zrow
    xpad_ref[:, Hp - 1:Hp, :, :] = zrow


def _conv3x3(xpad_ref, w_ref, B, H, W):
    """3x3 'same' conv on the pre-padded (B, H+2, W+2, Cin) bf16 scratch.

    Cin <  128 : one K=9*Cin MXU matmul on an im2col slab built once.
    Cin >= 128 : 9 accumulating K=Cin matmuls on shifted views (no lane concat).
    Weights are packed as (9*Cin, Cout) with row (dy*3+dx)*Cin + ci.
    Returns a (B*H*W, Cout) f32 accumulator (pre-BN).
    """
    Cin = xpad_ref.shape[-1]
    Cout = w_ref.shape[-1]
    M = B * H * W
    if Cin >= 128:
        acc = jnp.zeros((M, Cout), jnp.float32)
        for dy in range(3):
            for dx in range(3):
                k = dy * 3 + dx
                tap = xpad_ref[:, dy:dy + H, dx:dx + W, :].reshape(M, Cin)
                acc = acc + jnp.dot(tap, w_ref[k * Cin:(k + 1) * Cin, :],
                                    preferred_element_type=jnp.float32)
        return acc
    taps = jnp.concatenate(
        [xpad_ref[:, dy:dy + H, dx:dx + W, :]
         for dy in range(3) for dx in range(3)], axis=-1)     # (B, H, W, 9*Cin)
    return jnp.dot(taps.reshape(M, 9 * Cin), w_ref[...],
                   preferred_element_type=jnp.float32)


# --------------------------------- kernels ------------------------------------

def _conv_pool_kernel(x_ref, w_ref, p_ref, ps_ref, xpad, pbuf):
    # x_ref: (B, H, W, Cin) bf16   p_ref: (B, H2, W2, C) bf16   ps_ref: (1, 2, C)
    B, H, W, _ = x_ref.shape
    C = w_ref.shape[-1]
    H2, W2 = H // 2, W // 2

    _store_padded(xpad, x_ref[...], H, W)
    acc = _conv3x3(xpad, w_ref, B, H, W)                     # (B*H*W, C) f32

    # 2x2 / stride-2 max pool: H-pairs via an outer-dim split of the register
    # resident accumulator (no store), W-pairs via two stride-2 sublane reads
    # of a half-size scratch.
    y5 = acc.reshape(B, H2, 2, W, C)
    pbuf[...] = jnp.maximum(y5[:, :, 0, :, :], y5[:, :, 1, :, :])
    pooled = jnp.maximum(pbuf[:, :, pl.ds(0, W2, stride=2), :],
                         pbuf[:, :, pl.ds(1, W2, stride=2), :])   # (B,H2,W2,C)

    p_ref[...] = pooled.astype(p_ref.dtype)
    ps_ref[...] = _partial_stats(pooled.reshape(B * H2 * W2, C))


def _bn_conv_kernel(x_ref, aff_ref, w_ref, y_ref, ps_ref, xpad):
    # BN-apply (precomputed scale/bias) + CELU on the pre-BN input, then 3x3
    # conv producing the next pre-BN output.
    B, H, W, C = x_ref.shape
    Cout = w_ref.shape[-1]

    scale = aff_ref[0:1, :]
    bias = aff_ref[1:2, :]
    x = x_ref[...].astype(jnp.float32).reshape(B * H * W, C)
    h = _celu(x * scale + bias)                              # f32

    _store_padded(xpad, h.reshape(B, H, W, C), H, W)
    acc = _conv3x3(xpad, w_ref, B, H, W)                     # (B*H*W, Cout) f32
    y_ref[...] = acc.reshape(B, H, W, Cout).astype(y_ref.dtype)
    ps_ref[...] = _partial_stats(acc)


def _bn_residual_kernel(y2_ref, aff2_ref, p0_ref, aff0_ref, o_ref):
    # out = CELU(BN(y2)) + CELU(BN(p0))   (residual h recomputed from p0).
    B, H, W, C = y2_ref.shape
    M = B * H * W
    a2 = _celu(y2_ref[...].astype(jnp.float32).reshape(M, C)
               * aff2_ref[0:1, :] + aff2_ref[1:2, :])
    a0 = _celu(p0_ref[...].astype(jnp.float32).reshape(M, C)
               * aff0_ref[0:1, :] + aff0_ref[1:2, :])
    o_ref[...] = (a2 + a0).reshape(B, H, W, C)


# -------------------------------- pallas wrappers ------------------------------

def _conv_pool(x, w_k, B, vmem_limit):
    N, H, W, Cin = x.shape
    C = w_k.shape[-1]
    H2, W2 = H // 2, W // 2
    G = N // B
    return pl.pallas_call(
        _conv_pool_kernel,
        grid=(G,),
        in_specs=[pl.BlockSpec((B, H, W, Cin), lambda b: (b, 0, 0, 0)),
                  _full_spec(w_k.shape)],
        out_specs=(pl.BlockSpec((B, H2, W2, C), lambda b: (b, 0, 0, 0)),
                   pl.BlockSpec((1, 2, C), lambda b: (b, 0, 0))),
        out_shape=(jax.ShapeDtypeStruct((N, H2, W2, C), jnp.bfloat16),
                   jax.ShapeDtypeStruct((G, 2, C), jnp.float32)),
        scratch_shapes=[pltpu.VMEM((B, H + 2, W + 2, Cin), jnp.bfloat16),
                        pltpu.VMEM((B, H2, W, C), jnp.float32)],
        compiler_params=_compiler_params(vmem_limit),
    )(x, w_k)


def _bn_conv(x_pre, affine, w_k, B, vmem_limit):
    N, H, W, C = x_pre.shape
    Cout = w_k.shape[-1]
    G = N // B
    return pl.pallas_call(
        _bn_conv_kernel,
        grid=(G,),
        in_specs=[pl.BlockSpec((B, H, W, C), lambda b: (b, 0, 0, 0)),
                  _full_spec(affine.shape),
                  _full_spec(w_k.shape)],
        out_specs=(pl.BlockSpec((B, H, W, Cout), lambda b: (b, 0, 0, 0)),
                   pl.BlockSpec((1, 2, Cout), lambda b: (b, 0, 0))),
        out_shape=(jax.ShapeDtypeStruct((N, H, W, Cout), jnp.bfloat16),
                   jax.ShapeDtypeStruct((G, 2, Cout), jnp.float32)),
        scratch_shapes=[pltpu.VMEM((B, H + 2, W + 2, C), jnp.bfloat16)],
        compiler_params=_compiler_params(vmem_limit),
    )(x_pre, affine, w_k)


def _bn_residual(y2, aff2, p0, aff0, B, vmem_limit):
    N, H, W, C = y2.shape
    G = N // B
    blk = pl.BlockSpec((B, H, W, C), lambda b: (b, 0, 0, 0))
    return pl.pallas_call(
        _bn_residual_kernel,
        grid=(G,),
        in_specs=[blk, _full_spec(aff2.shape), blk, _full_spec(aff0.shape)],
        out_specs=pl.BlockSpec((B, H, W, C), lambda b: (b, 0, 0, 0)),
        out_shape=jax.ShapeDtypeStruct((N, H, W, C), jnp.float32),
        compiler_params=_compiler_params(vmem_limit),
    )(y2, aff2, p0, aff0)


# -------------------------------- public wrapper -------------------------------

def _pack_conv_weight(w_hwio):
    # (3, 3, Cin, Cout) HWIO -> (9*Cin, Cout) bf16; row (dy*3+dx)*Cin + ci.
    kh, kw, cin, cout = w_hwio.shape
    return w_hwio.reshape(kh * kw * cin, cout).astype(jnp.bfloat16)


def _bn_affine(partials, gamma, beta, count):
    """Reduce per-step [sum, sumsq] partials -> (2, C) [scale; bias] f32."""
    tot = jnp.sum(partials, axis=0)                          # (2, C)
    mean = tot[0] * (1.0 / count)
    var = jnp.maximum(tot[1] * (1.0 / count) - mean * mean, 0.0)   # biased var
    scale = gamma * jax.lax.rsqrt(var + BN_EPS)
    bias = beta - mean * scale
    return jnp.stack([scale, bias], axis=0).astype(jnp.float32)


def res_layer_forward(x_nchw, params):
    """ResLayer forward.  x: (N, in_c, H, W) f32 -> (N, out_c, H/2, W/2) f32."""
    x = jnp.transpose(x_nchw, (0, 2, 3, 1)).astype(jnp.bfloat16)   # NCHW -> NHWC
    N, H, W, Cin = x.shape
    assert H % 2 == 0 and W % 2 == 0
    out_c = params["w0"].shape[-1]
    H2, W2 = H // 2, W // 2
    count = float(N * H2 * W2)                    # BN statistics population

    # Lane-dense channel padding for narrow layers (sliced back at the end).
    C = 128 if out_c < 128 else out_c
    pad_o = C - out_c

    def pad_out(w):                               # pad Cout only (first conv)
        return jnp.pad(w, ((0, 0), (0, 0), (0, 0), (0, pad_o)))

    def pad_io(w):                                # pad Cin and Cout (res convs)
        return jnp.pad(w, ((0, 0), (0, 0), (0, pad_o), (0, pad_o)))

    def pad_g(g):
        return jnp.pad(g.reshape(-1), (0, pad_o), constant_values=1.0)

    def pad_b(b):
        return jnp.pad(b.reshape(-1), (0, pad_o))

    w0 = _pack_conv_weight(pad_out(params["w0"]))
    w1 = _pack_conv_weight(pad_io(params["w1"]))
    w2 = _pack_conv_weight(pad_io(params["w2"]))
    g0, g1, g2 = pad_g(params["g0"]), pad_g(params["g1"]), pad_g(params["g2"])
    b0, b1, b2 = pad_b(params["b0"]), pad_b(params["b1"]), pad_b(params["b2"])

    budget = _vmem_budget()
    B = _pick_batch_tile(N, H, W, Cin, C, budget)

    p0, s0 = _conv_pool(x, w0, B, budget)                    # pooled pre-BN
    aff0 = _bn_affine(s0, g0, b0, count)
    y1, s1 = _bn_conv(p0, aff0, w1, B, budget)
    aff1 = _bn_affine(s1, g1, b1, count)
    y2, s2 = _bn_conv(y1, aff1, w2, B, budget)
    aff2 = _bn_affine(s2, g2, b2, count)
    out = _bn_residual(y2, aff2, p0, aff0, B, budget)        # (N, H2, W2, C) f32

    out = out[..., :out_c]
    return jnp.transpose(out, (0, 3, 1, 2))                  # NHWC -> NCHW


def init_params(key, in_c, out_c):
    # Conv weights stored HWIO (3, 3, Cin, Cout); BN gamma=1, beta=0 (defaults).
    # TODO(synk): BatchNorm running_mean/running_var buffer updates are a
    # training-time side effect that does not change this forward output.
    k0, k1, k2 = jax.random.split(key, 3)

    def conv_w(k, cin):
        return jax.random.normal(k, (3, 3, cin, out_c), jnp.float32) * 0.1

    ones = jnp.ones((out_c,), jnp.float32)
    zeros = jnp.zeros((out_c,), jnp.float32)
    return {"w0": conv_w(k0, in_c), "g0": ones, "b0": zeros,
            "w1": conv_w(k1, out_c), "g1": ones, "b1": zeros,
            "w2": conv_w(k2, out_c), "g2": ones, "b2": zeros}


# --------------------------- pure-JAX reference --------------------------------

def _res_layer_reference(x_nchw, params):
    x = jnp.transpose(x_nchw, (0, 2, 3, 1))

    def conv(h, w):
        return jax.lax.conv_general_dilated(
            h, w, window_strides=(1, 1), padding=((1, 1), (1, 1)),
            dimension_numbers=("NHWC", "HWIO", "NHWC"),
            precision=jax.lax.Precision.HIGHEST)

    def bn_celu(h, g, b):
        mean = jnp.mean(h, axis=(0, 1, 2), keepdims=True)
        var = jnp.mean((h - mean) ** 2, axis=(0, 1, 2), keepdims=True)
        y = (h - mean) * jax.lax.rsqrt(var + BN_EPS)
        y = y * g.reshape(1, 1, 1, -1) + b.reshape(1, 1, 1, -1)
        return jnp.where(y > 0, y, CELU_ALPHA * jnp.expm1(y / CELU_ALPHA))

    y0 = conv(x, params["w0"])
    p0 = jax.lax.reduce_window(y0, -jnp.inf, jax.lax.max,
                               (1, 2, 2, 1), (1, 2, 2, 1), "VALID")
    h = bn_celu(p0, params["g0"], params["b0"])
    r = bn_celu(conv(h, params["w1"]), params["g1"], params["b1"])
    r = bn_celu(conv(r, params["w2"]), params["g2"], params["b2"])
    return jnp.transpose(r + h, (0, 3, 1, 2))


if __name__ == "__main__":
    key = jax.random.PRNGKey(0)
    kx, kp = jax.random.split(key)

    N, in_c, out_c, H, W = 2, 4, 8, 16, 16
    x = jax.random.normal(kx, (N, in_c, H, W), jnp.float32)
    params = init_params(kp, in_c, out_c)

    fwd = jax.jit(res_layer_forward)
    out = fwd(x, params)
    jax.block_until_ready(out)

    assert out.shape == (N, out_c, H // 2, W // 2), out.shape
    assert out.dtype == jnp.float32
    assert bool(jnp.all(jnp.isfinite(out)))

    ref = _res_layer_reference(x, params)
    assert bool(jnp.allclose(out, ref, atol=5e-2, rtol=5e-2)), \
        float(jnp.max(jnp.abs(out - ref)))

    print("KERNEL_OK")
</pallas_src>

<mosaic_0001>
module attributes {stable_mosaic.version = 11 : i64} {
  func.func @_conv_pool_kernel(%arg0: i32, %arg1: memref<1x16x16x4xbf16, #tpu.memory_space<vmem>>, %arg2: memref<36x128xbf16, #tpu.memory_space<vmem>>, %arg3: memref<1x8x8x128xbf16, #tpu.memory_space<vmem>>, %arg4: memref<1x2x128xf32, #tpu.memory_space<vmem>>, %arg5: memref<1x18x18x4xbf16, #tpu.memory_space<vmem>>, %arg6: memref<1x8x16x128xf32, #tpu.memory_space<vmem>>) attributes {dimension_semantics = [#tpu.dimension_semantics<parallel>], iteration_bounds = array<i64: 2>, scalar_prefetch = 0 : i64, scratch_operands = 2 : i64, tpu.core_type = #tpu.core_type<tc>, window_params = [{transform_indices = @transform_0, window_bounds = array<i64: 1, 16, 16, 4>}, {pipeline_mode = #tpu.pipeline_mode<synchronous>, transform_indices = @transform_1, window_bounds = array<i64: 36, 128>}, {transform_indices = @transform_2, window_bounds = array<i64: 1, 8, 8, 128>}, {transform_indices = @transform_3, window_bounds = array<i64: 1, 2, 128>}]} {
    %c0 = arith.constant 0 : index
    %c0_0 = arith.constant 0 : index
    %c0_1 = arith.constant 0 : index
    %c0_2 = arith.constant 0 : index
    %0 = vector.load %arg1[%c0, %c0_0, %c0_1, %c0_2] : memref<1x16x16x4xbf16, #tpu.memory_space<vmem>>, vector<1x16x16x4xbf16>
    %cst = arith.constant 0.000000e+00 : bf16
    %1 = vector.broadcast %cst : bf16 to vector<1x16x1x4xbf16>
    %2 = tpu.concatenate %1, %0, %1 in 2 : vector<1x16x1x4xbf16>, vector<1x16x16x4xbf16>, vector<1x16x1x4xbf16> -> vector<1x16x18x4xbf16>
    %c0_3 = arith.constant 0 : index
    %c1 = arith.constant 1 : index
    %c0_4 = arith.constant 0 : index
    %c0_5 = arith.constant 0 : index
    %3 = vector.load %arg5[%c0_3, %c1, %c0_4, %c0_5] : memref<1x18x18x4xbf16, #tpu.memory_space<vmem>>, vector<1x16x18x4xbf16>
    tpu.vector_store %arg5[%c0_3, %c1, %c0_4, %c0_5], %2 {strides = array<i32>} : memref<1x18x18x4xbf16, #tpu.memory_space<vmem>>, vector<1x16x18x4xbf16>,
    %cst_6 = arith.constant 0.000000e+00 : bf16
    %4 = vector.broadcast %cst_6 : bf16 to vector<1x1x18x4xbf16>
    %c0_7 = arith.constant 0 : index
    %c0_8 = arith.constant 0 : index
    %c0_9 = arith.constant 0 : index
    %c0_10 = arith.constant 0 : index
    %5 = vector.load %arg5[%c0_7, %c0_8, %c0_9, %c0_10] : memref<1x18x18x4xbf16, #tpu.memory_space<vmem>>, vector<1x1x18x4xbf16>
    tpu.vector_store %arg5[%c0_7, %c0_8, %c0_9, %c0_10], %4 {strides = array<i32>} : memref<1x18x18x4xbf16, #tpu.memory_space<vmem>>, vector<1x1x18x4xbf16>,
    %c0_11 = arith.constant 0 : index
    %c17 = arith.constant 17 : index
    %c0_12 = arith.constant 0 : index
    %c0_13 = arith.constant 0 : index
    %6 = vector.load %arg5[%c0_11, %c17, %c0_12, %c0_13] : memref<1x18x18x4xbf16, #tpu.memory_space<vmem>>, vector<1x1x18x4xbf16>
    tpu.vector_store %arg5[%c0_11, %c17, %c0_12, %c0_13], %4 {strides = array<i32>} : memref<1x18x18x4xbf16, #tpu.memory_space<vmem>>, vector<1x1x18x4xbf16>,
    %c0_14 = arith.constant 0 : index
    %c0_15 = arith.constant 0 : index
    %c0_16 = arith.constant 0 : index
    %c0_17 = arith.constant 0 : index
    %7 = vector.load %arg5[%c0_14, %c0_15, %c0_16, %c0_17] : memref<1x18x18x4xbf16, #tpu.memory_space<vmem>>, vector<1x16x16x4xbf16>
    %c0_18 = arith.constant 0 : index
    %c0_19 = arith.constant 0 : index
    %c1_20 = arith.constant 1 : index
    %c0_21 = arith.constant 0 : index
    %8 = vector.load %arg5[%c0_18, %c0_19, %c1_20, %c0_21] : memref<1x18x18x4xbf16, #tpu.memory_space<vmem>>, vector<1x16x16x4xbf16>
    %c0_22 = arith.constant 0 : index
    %c0_23 = arith.constant 0 : index
    %c2 = arith.constant 2 : index
    %c0_24 = arith.constant 0 : index
    %9 = vector.load %arg5[%c0_22, %c0_23, %c2, %c0_24] : memref<1x18x18x4xbf16, #tpu.memory_space<vmem>>, vector<1x16x16x4xbf16>
    %c0_25 = arith.constant 0 : index
    %c1_26 = arith.constant 1 : index
    %c0_27 = arith.constant 0 : index
    %c0_28 = arith.constant 0 : index
    %10 = vector.load %arg5[%c0_25, %c1_26, %c0_27, %c0_28] : memref<1x18x18x4xbf16, #tpu.memory_space<vmem>>, vector<1x16x16x4xbf16>
    %c0_29 = arith.constant 0 : index
    %c1_30 = arith.constant 1 : index
    %c1_31 = arith.constant 1 : index
    %c0_32 = arith.constant 0 : index
    %11 = vector.load %arg5[%c0_29, %c1_30, %c1_31, %c0_32] : memref<1x18x18x4xbf16, #tpu.memory_space<vmem>>, vector<1x16x16x4xbf16>
    %c0_33 = arith.constant 0 : index
    %c1_34 = arith.constant 1 : index
    %c2_35 = arith.constant 2 : index
    %c0_36 = arith.constant 0 : index
    %12 = vector.load %arg5[%c0_33, %c1_34, %c2_35, %c0_36] : memref<1x18x18x4xbf16, #tpu.memory_space<vmem>>, vector<1x16x16x4xbf16>
    %c0_37 = arith.constant 0 : index
    %c2_38 = arith.constant 2 : index
    %c0_39 = arith.constant 0 : index
    %c0_40 = arith.constant 0 : index
    %13 = vector.load %arg5[%c0_37, %c2_38, %c0_39, %c0_40] : memref<1x18x18x4xbf16, #tpu.memory_space<vmem>>, vector<1x16x16x4xbf16>
    %c0_41 = arith.constant 0 : index
    %c2_42 = arith.constant 2 : index
    %c1_43 = arith.constant 1 : index
    %c0_44 = arith.constant 0 : index
    %14 = vector.load %arg5[%c0_41, %c2_42, %c1_43, %c0_44] : memref<1x18x18x4xbf16, #tpu.memory_space<vmem>>, vector<1x16x16x4xbf16>
    %c0_45 = arith.constant 0 : index
    %c2_46 = arith.constant 2 : index
    %c2_47 = arith.constant 2 : index
    %c0_48 = arith.constant 0 : index
    %15 = vector.load %arg5[%c0_45, %c2_46, %c2_47, %c0_48] : memref<1x18x18x4xbf16, #tpu.memory_space<vmem>>, vector<1x16x16x4xbf16>
    %16 = tpu.concatenate %7, %8, %9, %10, %11, %12, %13, %14, %15 in 3 : vector<1x16x16x4xbf16>, vector<1x16x16x4xbf16>, vector<1x16x16x4xbf16>, vector<1x16x16x4xbf16>, vector<1x16x16x4xbf16>, vector<1x16x16x4xbf16>, vector<1x16x16x4xbf16>, vector<1x16x16x4xbf16>, vector<1x16x16x4xbf16> -> vector<1x16x16x36xbf16>
    %17 = vector.shape_cast %16 : vector<1x16x16x36xbf16> to vector<256x36xbf16>
    %c0_49 = arith.constant 0 : index
    %c0_50 = arith.constant 0 : index
    %18 = vector.load %arg2[%c0_49, %c0_50] : memref<36x128xbf16, #tpu.memory_space<vmem>>, vector<36x128xbf16>
    %cst_51 = arith.constant dense<0.000000e+00> : vector<256x128xf32>
    %19 = tpu.matmul %17, %18, %cst_51 {dimension_numbers = #tpu.dot_dimension_numbers<[1], [0], [0], [1], [0, 0, 1, 1], [], []>} : vector<256x36xbf16>, vector<36x128xbf16>, vector<256x128xf32> -> vector<256x128xf32>
    %20 = vector.shape_cast %19 : vector<256x128xf32> to vector<1x8x2x16x128xf32>
    %21 = vector.extract_strided_slice %20 {offsets = [0, 0, 0, 0, 0], sizes = [1, 8, 1, 16, 128], strides = [1, 1, 1, 1, 1]} : vector<1x8x2x16x128xf32> to vector<1x8x1x16x128xf32>
    %22 = vector.shape_cast %21 : vector<1x8x1x16x128xf32> to vector<1x8x16x128xf32>
    %23 = vector.extract_strided_slice %20 {offsets = [0, 0, 1, 0, 0], sizes = [1, 8, 1, 16, 128], strides = [1, 1, 1, 1, 1]} : vector<1x8x2x16x128xf32> to vector<1x8x1x16x128xf32>
    %24 = vector.shape_cast %23 : vector<1x8x1x16x128xf32> to vector<1x8x16x128xf32>
    %25 = arith.maximumf %22, %24 : vector<1x8x16x128xf32>
    %c0_52 = arith.constant 0 : index
    %c0_53 = arith.constant 0 : index
    %c0_54 = arith.constant 0 : index
    %c0_55 = arith.constant 0 : index
    %26 = vector.load %arg6[%c0_52, %c0_53, %c0_54, %c0_55] : memref<1x8x16x128xf32, #tpu.memory_space<vmem>>, vector<1x8x16x128xf32>
    tpu.vector_store %arg6[%c0_52, %c0_53, %c0_54, %c0_55], %25 {strides = array<i32>} : memref<1x8x16x128xf32, #tpu.memory_space<vmem>>, vector<1x8x16x128xf32>,
    %c0_56 = arith.constant 0 : index
    %c0_57 = arith.constant 0 : index
    %c0_58 = arith.constant 0 : index
    %c0_59 = arith.constant 0 : index
    %27 = tpu.strided_load %arg6[%c0_56, %c0_57, %c0_58, %c0_59] {strides = array<i32: 1, 1, 2, 1>} : memref<1x8x16x128xf32, #tpu.memory_space<vmem>>, vector<1x8x8x128xf32>
    %c0_60 = arith.constant 0 : index
    %c0_61 = arith.constant 0 : index
    %c1_62 = arith.constant 1 : index
    %c0_63 = arith.constant 0 : index
    %28 = tpu.strided_load %arg6[%c0_60, %c0_61, %c1_62, %c0_63] {strides = array<i32: 1, 1, 2, 1>} : memref<1x8x16x128xf32, #tpu.memory_space<vmem>>, vector<1x8x8x128xf32>
    %29 = arith.maximumf %27, %28 : vector<1x8x8x128xf32>
    %30 = arith.truncf %29 : vector<1x8x8x128xf32> to vector<1x8x8x128xbf16>
    %c0_64 = arith.constant 0 : index
    %c0_65 = arith.constant 0 : index
    %c0_66 = arith.constant 0 : index
    %c0_67 = arith.constant 0 : index
    %31 = vector.load %arg3[%c0_64, %c0_65, %c0_66, %c0_67] : memref<1x8x8x128xbf16, #tpu.memory_space<vmem>>, vector<1x8x8x128xbf16>
    tpu.vector_store %arg3[%c0_64, %c0_65, %c0_66, %c0_67], %30 {strides = array<i32>} : memref<1x8x8x128xbf16, #tpu.memory_space<vmem>>, vector<1x8x8x128xbf16>,
    %32 = vector.shape_cast %29 : vector<1x8x8x128xf32> to vector<64x128xf32>
    %cst_68 = arith.constant dense<0.000000e+00> : vector<128xf32>
    %33 = vector.multi_reduction <add>, %32, %cst_68 [0] : vector<64x128xf32> to vector<128xf32>
    %34 = vector.shape_cast %33 : vector<128xf32> to vector<1x128xf32>
    %35 = arith.mulf %32, %32 : vector<64x128xf32>
    %cst_69 = arith.constant dense<0.000000e+00> : vector<128xf32>
    %36 = vector.multi_reduction <add>, %35, %cst_69 [0] : vector<64x128xf32> to vector<128xf32>
    %37 = vector.shape_cast %36 : vector<128xf32> to vector<1x128xf32>
    %38 = tpu.concatenate %34, %37 in 0 : vector<1x128xf32>, vector<1x128xf32> -> vector<2x128xf32>
    %39 = vector.shape_cast %38 : vector<2x128xf32> to vector<1x2x128xf32>
    %c0_70 = arith.constant 0 : index
    %c0_71 = arith.constant 0 : index
    %c0_72 = arith.constant 0 : index
    %40 = vector.load %arg4[%c0_70, %c0_71, %c0_72] : memref<1x2x128xf32, #tpu.memory_space<vmem>>, vector<1x2x128xf32>
    tpu.vector_store %arg4[%c0_70, %c0_71, %c0_72], %39 {strides = array<i32>} : memref<1x2x128xf32, #tpu.memory_space<vmem>>, vector<1x2x128xf32>,
    return
  }
  func.func @transform_0(%arg0: i32) -> (i32, i32, i32, i32) {
    %c0_i32 = arith.constant 0 : i32
    %c0_i32_0 = arith.constant 0 : i32
    %c0_i32_1 = arith.constant 0 : i32
    %c0_i32_2 = arith.constant 0 : i32
    return %arg0, %c0_i32, %c0_i32_0, %c0_i32_1 : i32, i32, i32, i32
  }
  func.func @transform_1(%arg0: i32) -> (i32, i32) {
    %c0_i32 = arith.constant 0 : i32
    %c0_i32_0 = arith.constant 0 : i32
    %c0_i32_1 = arith.constant 0 : i32
    return %c0_i32, %c0_i32_0 : i32, i32
  }
  func.func @transform_2(%arg0: i32) -> (i32, i32, i32, i32) {
    %c0_i32 = arith.constant 0 : i32
    %c0_i32_0 = arith.constant 0 : i32
    %c0_i32_1 = arith.constant 0 : i32
    %c0_i32_2 = arith.constant 0 : i32
    return %arg0, %c0_i32, %c0_i32_0, %c0_i32_1 : i32, i32, i32, i32
  }
  func.func @transform_3(%arg0: i32) -> (i32, i32, i32) {
    %c0_i32 = arith.constant 0 : i32
    %c0_i32_0 = arith.constant 0 : i32
    %c0_i32_1 = arith.constant 0 : i32
    return %arg0, %c0_i32, %c0_i32_0 : i32, i32, i32
  }
}

module attributes {stable_mosaic.version = 11 : i64} {
  func.func @_bn_conv_kernel(%arg0: i32, %arg1: memref<1x8x8x128xbf16, #tpu.memory_space<vmem>>, %arg2: memref<2x128xf32, #tpu.memory_space<vmem>>, %arg3: memref<1152x128xbf16, #tpu.memory_space<vmem>>, %arg4: memref<1x8x8x128xbf16, #tpu.memory_space<vmem>>, %arg5: memref<1x2x128xf32, #tpu.memory_space<vmem>>, %arg6: memref<1x10x10x128xbf16, #tpu.memory_space<vmem>>) attributes {dimension_semantics = [#tpu.dimension_semantics<parallel>], iteration_bounds = array<i64: 2>, scalar_prefetch = 0 : i64, scratch_operands = 1 : i64, tpu.core_type = #tpu.core_type<tc>, window_params = [{transform_indices = @transform_0, window_bounds = array<i64: 1, 8, 8, 128>}, {pipeline_mode = #tpu.pipeline_mode<synchronous>, transform_indices = @transform_1, window_bounds = array<i64: 2, 128>}, {pipeline_mode = #tpu.pipeline_mode<synchronous>, transform_indices = @transform_2, window_bounds = array<i64: 1152, 128>}, {transform_indices = @transform_3, window_bounds = array<i64: 1, 8, 8, 128>}, {transform_indices = @transform_4, window_bounds = array<i64: 1, 2, 128>}]} {
    %c0 = arith.constant 0 : index
    %c0_0 = arith.constant 0 : index
    %0 = vector.load %arg2[%c0, %c0_0] : memref<2x128xf32, #tpu.memory_space<vmem>>, vector<1x128xf32>
    %c1 = arith.constant 1 : index
    %c0_1 = arith.constant 0 : index
    %1 = vector.load %arg2[%c1, %c0_1] : memref<2x128xf32, #tpu.memory_space<vmem>>, vector<1x128xf32>
    %c0_2 = arith.constant 0 : index
    %c0_3 = arith.constant 0 : index
    %c0_4 = arith.constant 0 : index
    %c0_5 = arith.constant 0 : index
    %2 = vector.load %arg1[%c0_2, %c0_3, %c0_4, %c0_5] : memref<1x8x8x128xbf16, #tpu.memory_space<vmem>>, vector<1x8x8x128xbf16>
    %3 = arith.extf %2 : vector<1x8x8x128xbf16> to vector<1x8x8x128xf32>
    %4 = vector.shape_cast %3 : vector<1x8x8x128xf32> to vector<64x128xf32>
    %5 = vector.broadcast %0 : vector<1x128xf32> to vector<64x128xf32>
    %6 = arith.mulf %4, %5 : vector<64x128xf32>
    %7 = vector.broadcast %1 : vector<1x128xf32> to vector<64x128xf32>
    %8 = arith.addf %6, %7 : vector<64x128xf32>
    %cst = arith.constant 0.000000e+00 : f32
    %9 = vector.broadcast %cst : f32 to vector<64x128xf32>
    %10 = arith.minimumf %8, %9 : vector<64x128xf32>
    %cst_6 = arith.constant 13.333333 : f32
    %11 = vector.broadcast %cst_6 : f32 to vector<64x128xf32>
    %12 = arith.mulf %10, %11 : vector<64x128xf32>
    %13 = math.exp %12 : vector<64x128xf32>
    %cst_7 = arith.constant 1.000000e+00 : f32
    %14 = vector.broadcast %cst_7 : f32 to vector<64x128xf32>
    %15 = arith.subf %13, %14 : vector<64x128xf32>
    %cst_8 = arith.constant 7.500000e-02 : f32
    %16 = vector.broadcast %cst_8 : f32 to vector<64x128xf32>
    %17 = arith.mulf %16, %15 : vector<64x128xf32>
    %cst_9 = arith.constant 0.000000e+00 : f32
    %18 = vector.broadcast %cst_9 : f32 to vector<64x128xf32>
    %19 = arith.cmpf ogt, %8, %18 : vector<64x128xf32>
    %20 = arith.select %19, %8, %17 : vector<64x128xi1>, vector<64x128xf32>
    %21 = vector.shape_cast %20 : vector<64x128xf32> to vector<1x8x8x128xf32>
    %cst_10 = arith.constant 0.000000e+00 : bf16
    %22 = vector.broadcast %cst_10 : bf16 to vector<1x8x1x128xbf16>
    %23 = arith.truncf %21 : vector<1x8x8x128xf32> to vector<1x8x8x128xbf16>
    %24 = tpu.concatenate %22, %23, %22 in 2 : vector<1x8x1x128xbf16>, vector<1x8x8x128xbf16>, vector<1x8x1x128xbf16> -> vector<1x8x10x128xbf16>
    %c0_11 = arith.constant 0 : index
    %c1_12 = arith.constant 1 : index
    %c0_13 = arith.constant 0 : index
    %c0_14 = arith.constant 0 : index
    %25 = vector.load %arg6[%c0_11, %c1_12, %c0_13, %c0_14] : memref<1x10x10x128xbf16, #tpu.memory_space<vmem>>, vector<1x8x10x128xbf16>
    tpu.vector_store %arg6[%c0_11, %c1_12, %c0_13, %c0_14], %24 {strides = array<i32>} : memref<1x10x10x128xbf16, #tpu.memory_space<vmem>>, vector<1x8x10x128xbf16>,
    %cst_15 = arith.constant 0.000000e+00 : bf16
    %26 = vector.broadcast %cst_15 : bf16 to vector<1x1x10x128xbf16>
    %c0_16 = arith.constant 0 : index
    %c0_17 = arith.constant 0 : index
    %c0_18 = arith.constant 0 : index
    %c0_19 = arith.constant 0 : index
    %27 = vector.load %arg6[%c0_16, %c0_17, %c0_18, %c0_19] : memref<1x10x10x128xbf16, #tpu.memory_space<vmem>>, vector<1x1x10x128xbf16>
    tpu.vector_store %arg6[%c0_16, %c0_17, %c0_18, %c0_19], %26 {strides = array<i32>} : memref<1x10x10x128xbf16, #tpu.memory_space<vmem>>, vector<1x1x10x128xbf16>,
    %c0_20 = arith.constant 0 : index
    %c9 = arith.constant 9 : index
    %c0_21 = arith.constant 0 : index
    %c0_22 = arith.constant 0 : index
    %28 = vector.load %arg6[%c0_20, %c9, %c0_21, %c0_22] : memref<1x10x10x128xbf16, #tpu.memory_space<vmem>>, vector<1x1x10x128xbf16>
    tpu.vector_store %arg6[%c0_20, %c9, %c0_21, %c0_22], %26 {strides = array<i32>} : memref<1x10x10x128xbf16, #tpu.memory_space<vmem>>, vector<1x1x10x128xbf16>,
    %cst_23 = arith.constant 0.000000e+00 : f32
    %29 = vector.broadcast %cst_23 : f32 to vector<64x128xf32>
    %c0_24 = arith.constant 0 : index
    %c0_25 = arith.constant 0 : index
    %c0_26 = arith.constant 0 : index
    %c0_27 = arith.constant 0 : index
    %30 = vector.load %arg6[%c0_24, %c0_25, %c0_26, %c0_27] : memref<1x10x10x128xbf16, #tpu.memory_space<vmem>>, vector<1x8x8x128xbf16>
    %31 = vector.shape_cast %30 : vector<1x8x8x128xbf16> to vector<64x128xbf16>
    %c0_28 = arith.constant 0 : index
    %c0_29 = arith.constant 0 : index
    %32 = vector.load %arg3[%c0_28, %c0_29] : memref<1152x128xbf16, #tpu.memory_space<vmem>>, vector<128x128xbf16>
    %cst_30 = arith.constant dense<0.000000e+00> : vector<64x128xf32>
    %33 = tpu.matmul %31, %32, %cst_30 {dimension_numbers = #tpu.dot_dimension_numbers<[1], [0], [0], [1], [0, 0, 1, 1], [], []>} : vector<64x128xbf16>, vector<128x128xbf16>, vector<64x128xf32> -> vector<64x128xf32>
    %34 = arith.addf %29, %33 : vector<64x128xf32>
    %c0_31 = arith.constant 0 : index
    %c0_32 = arith.constant 0 : index
    %c1_33 = arith.constant 1 : index
    %c0_34 = arith.constant 0 : index
    %35 = vector.load %arg6[%c0_31, %c0_32, %c1_33, %c0_34] : memref<1x10x10x128xbf16, #tpu.memory_space<vmem>>, vector<1x8x8x128xbf16>
    %36 = vector.shape_cast %35 : vector<1x8x8x128xbf16> to vector<64x128xbf16>
    %c128 = arith.constant 128 : index
    %c0_35 = arith.constant 0 : index
    %37 = vector.load %arg3[%c128, %c0_35] : memref<1152x128xbf16, #tpu.memory_space<vmem>>, vector<128x128xbf16>
    %cst_36 = arith.constant dense<0.000000e+00> : vector<64x128xf32>
    %38 = tpu.matmul %36, %37, %cst_36 {dimension_numbers = #tpu.dot_dimension_numbers<[1], [0], [0], [1], [0, 0, 1, 1], [], []>} : vector<64x128xbf16>, vector<128x128xbf16>, vector<64x128xf32> -> vector<64x128xf32>
    %39 = arith.addf %34, %38 : vector<64x128xf32>
    %c0_37 = arith.constant 0 : index
    %c0_38 = arith.constant 0 : index
    %c2 = arith.constant 2 : index
    %c0_39 = arith.constant 0 : index
    %40 = vector.load %arg6[%c0_37, %c0_38, %c2, %c0_39] : memref<1x10x10x128xbf16, #tpu.memory_space<vmem>>, vector<1x8x8x128xbf16>
    %41 = vector.shape_cast %40 : vector<1x8x8x128xbf16> to vector<64x128xbf16>
    %c256 = arith.constant 256 : index
    %c0_40 = arith.constant 0 : index
    %42 = vector.load %arg3[%c256, %c0_40] : memref<1152x128xbf16, #tpu.memory_space<vmem>>, vector<128x128xbf16>
    %cst_41 = arith.constant dense<0.000000e+00> : vector<64x128xf32>
    %43 = tpu.matmul %41, %42, %cst_41 {dimension_numbers = #tpu.dot_dimension_numbers<[1], [0], [0], [1], [0, 0, 1, 1], [], []>} : vector<64x128xbf16>, vector<128x128xbf16>, vector<64x128xf32> -> vector<64x128xf32>
    %44 = arith.addf %39, %43 : vector<64x128xf32>
    %c0_42 = arith.constant 0 : index
    %c1_43 = arith.constant 1 : index
    %c0_44 = arith.constant 0 : index
    %c0_45 = arith.constant 0 : index
    %45 = vector.load %arg6[%c0_42, %c1_43, %c0_44, %c0_45] : memref<1x10x10x128xbf16, #tpu.memory_space<vmem>>, vector<1x8x8x128xbf16>
    %46 = vector.shape_cast %45 : vector<1x8x8x128xbf16> to vector<64x128xbf16>
    %c384 = arith.constant 384 : index
    %c0_46 = arith.constant 0 : index
    %47 = vector.load %arg3[%c384, %c0_46] : memref<1152x128xbf16, #tpu.memory_space<vmem>>, vector<128x128xbf16>
    %cst_47 = arith.constant dense<0.000000e+00> : vector<64x128xf32>
    %48 = tpu.matmul %46, %47, %cst_47 {dimension_numbers = #tpu.dot_dimension_numbers<[1], [0], [0], [1], [0, 0, 1, 1], [], []>} : vector<64x128xbf16>, vector<128x128xbf16>, vector<64x128xf32> -> vector<64x128xf32>
    %49 = arith.addf %44, %48 : vector<64x128xf32>
    %c0_48 = arith.constant 0 : index
    %c1_49 = arith.constant 1 : index
    %c1_50 = arith.constant 1 : index
    %c0_51 = arith.constant 0 : index
    %50 = vector.load %arg6[%c0_48, %c1_49, %c1_50, %c0_51] : memref<1x10x10x128xbf16, #tpu.memory_space<vmem>>, vector<1x8x8x128xbf16>
    %51 = vector.shape_cast %50 : vector<1x8x8x128xbf16> to vector<64x128xbf16>
    %c512 = arith.constant 512 : index
    %c0_52 = arith.constant 0 : index
    %52 = vector.load %arg3[%c512, %c0_52] : memref<1152x128xbf16, #tpu.memory_space<vmem>>, vector<128x128xbf16>
    %cst_53 = arith.constant dense<0.000000e+00> : vector<64x128xf32>
    %53 = tpu.matmul %51, %52, %cst_53 {dimension_numbers = #tpu.dot_dimension_numbers<[1], [0], [0], [1], [0, 0, 1, 1], [], []>} : vector<64x128xbf16>, vector<128x128xbf16>, vector<64x128xf32> -> vector<64x128xf32>
    %54 = arith.addf %49, %53 : vector<64x128xf32>
    %c0_54 = arith.constant 0 : index
    %c1_55 = arith.constant 1 : index
    %c2_56 = arith.constant 2 : index
    %c0_57 = arith.constant 0 : index
    %55 = vector.load %arg6[%c0_54, %c1_55, %c2_56, %c0_57] : memref<1x10x10x128xbf16, #tpu.memory_space<vmem>>, vector<1x8x8x128xbf16>
    %56 = vector.shape_cast %55 : vector<1x8x8x128xbf16> to vector<64x128xbf16>
    %c640 = arith.constant 640 : index
    %c0_58 = arith.constant 0 : index
    %57 = vector.load %arg3[%c640, %c0_58] : memref<1152x128xbf16, #tpu.memory_space<vmem>>, vector<128x128xbf16>
    %cst_59 = arith.constant dense<0.000000e+00> : vector<64x128xf32>
    %58 = tpu.matmul %56, %57, %cst_59 {dimension_numbers = #tpu.dot_dimension_numbers<[1], [0], [0], [1], [0, 0, 1, 1], [], []>} : vector<64x128xbf16>, vector<128x128xbf16>, vector<64x128xf32> -> vector<64x128xf32>
    %59 = arith.addf %54, %58 : vector<64x128xf32>
    %c0_60 = arith.constant 0 : index
    %c2_61 = arith.constant 2 : index
    %c0_62 = arith.constant 0 : index
    %c0_63 = arith.constant 0 : index
    %60 = vector.load %arg6[%c0_60, %c2_61, %c0_62, %c0_63] : memref<1x10x10x128xbf16, #tpu.memory_space<vmem>>, vector<1x8x8x128xbf16>
    %61 = vector.shape_cast %60 : vector<1x8x8x128xbf16> to vector<64x128xbf16>
    %c768 = arith.constant 768 : index
    %c0_64 = arith.constant 0 : index
    %62 = vector.load %arg3[%c768, %c0_64] : memref<1152x128xbf16, #tpu.memory_space<vmem>>, vector<128x128xbf16>
    %cst_65 = arith.constant dense<0.000000e+00> : vector<64x128xf32>
    %63 = tpu.matmul %61, %62, %cst_65 {dimension_numbers = #tpu.dot_dimension_numbers<[1], [0], [0], [1], [0, 0, 1, 1], [], []>} : vector<64x128xbf16>, vector<128x128xbf16>, vector<64x128xf32> -> vector<64x128xf32>
    %64 = arith.addf %59, %63 : vector<64x128xf32>
    %c0_66 = arith.constant 0 : index
    %c2_67 = arith.constant 2 : index
    %c1_68 = arith.constant 1 : index
    %c0_69 = arith.constant 0 : index
    %65 = vector.load %arg6[%c0_66, %c2_67, %c1_68, %c0_69] : memref<1x10x10x128xbf16, #tpu.memory_space<vmem>>, vector<1x8x8x128xbf16>
    %66 = vector.shape_cast %65 : vector<1x8x8x128xbf16> to vector<64x128xbf16>
    %c896 = arith.constant 896 : index
    %c0_70 = arith.constant 0 : index
    %67 = vector.load %arg3[%c896, %c0_70] : memref<1152x128xbf16, #tpu.memory_space<vmem>>, vector<128x128xbf16>
    %cst_71 = arith.constant dense<0.000000e+00> : vector<64x128xf32>
    %68 = tpu.matmul %66, %67, %cst_71 {dimension_numbers = #tpu.dot_dimension_numbers<[1], [0], [0], [1], [0, 0, 1, 1], [], []>} : vector<64x128xbf16>, vector<128x128xbf16>, vector<64x128xf32> -> vector<64x128xf32>
    %69 = arith.addf %64, %68 : vector<64x128xf32>
    %c0_72 = arith.constant 0 : index
    %c2_73 = arith.constant 2 : index
    %c2_74 = arith.constant 2 : index
    %c0_75 = arith.constant 0 : index
    %70 = vector.load %arg6[%c0_72, %c2_73, %c2_74, %c0_75] : memref<1x10x10x128xbf16, #tpu.memory_space<vmem>>, vector<1x8x8x128xbf16>
    %71 = vector.shape_cast %70 : vector<1x8x8x128xbf16> to vector<64x128xbf16>
    %c1024 = arith.constant 1024 : index
    %c0_76 = arith.constant 0 : index
    %72 = vector.load %arg3[%c1024, %c0_76] : memref<1152x128xbf16, #tpu.memory_space<vmem>>, vector<128x128xbf16>
    %cst_77 = arith.constant dense<0.000000e+00> : vector<64x128xf32>
    %73 = tpu.matmul %71, %72, %cst_77 {dimension_numbers = #tpu.dot_dimension_numbers<[1], [0], [0], [1], [0, 0, 1, 1], [], []>} : vector<64x128xbf16>, vector<128x128xbf16>, vector<64x128xf32> -> vector<64x128xf32>
    %74 = arith.addf %69, %73 : vector<64x128xf32>
    %75 = vector.shape_cast %74 : vector<64x128xf32> to vector<1x8x8x128xf32>
    %76 = arith.truncf %75 : vector<1x8x8x128xf32> to vector<1x8x8x128xbf16>
    %c0_78 = arith.constant 0 : index
    %c0_79 = arith.constant 0 : index
    %c0_80 = arith.constant 0 : index
    %c0_81 = arith.constant 0 : index
    %77 = vector.load %arg4[%c0_78, %c0_79, %c0_80, %c0_81] : memref<1x8x8x128xbf16, #tpu.memory_space<vmem>>, vector<1x8x8x128xbf16>
    tpu.vector_store %arg4[%c0_78, %c0_79, %c0_80, %c0_81], %76 {strides = array<i32>} : memref<1x8x8x128xbf16, #tpu.memory_space<vmem>>, vector<1x8x8x128xbf16>,
    %cst_82 = arith.constant dense<0.000000e+00> : vector<128xf32>
    %78 = vector.multi_reduction <add>, %74, %cst_82 [0] : vector<64x128xf32> to vector<128xf32>
    %79 = vector.shape_cast %78 : vector<128xf32> to vector<1x128xf32>
    %80 = arith.mulf %74, %74 : vector<64x128xf32>
    %cst_83 = arith.constant dense<0.000000e+00> : vector<128xf32>
    %81 = vector.multi_reduction <add>, %80, %cst_83 [0] : vector<64x128xf32> to vector<128xf32>
    %82 = vector.shape_cast %81 : vector<128xf32> to vector<1x128xf32>
    %83 = tpu.concatenate %79, %82 in 0 : vector<1x128xf32>, vector<1x128xf32> -> vector<2x128xf32>
    %84 = vector.shape_cast %83 : vector<2x128xf32> to vector<1x2x128xf32>
    %c0_84 = arith.constant 0 : index
    %c0_85 = arith.constant 0 : index
    %c0_86 = arith.constant 0 : index
    %85 = vector.load %arg5[%c0_84, %c0_85, %c0_86] : memref<1x2x128xf32, #tpu.memory_space<vmem>>, vector<1x2x128xf32>
    tpu.vector_store %arg5[%c0_84, %c0_85, %c0_86], %84 {strides = array<i32>} : memref<1x2x128xf32, #tpu.memory_space<vmem>>, vector<1x2x128xf32>,
    return
  }
  func.func @transform_0(%arg0: i32) -> (i32, i32, i32, i32) {
    %c0_i32 = arith.constant 0 : i32
    %c0_i32_0 = arith.constant 0 : i32
    %c0_i32_1 = arith.constant 0 : i32
    %c0_i32_2 = arith.constant 0 : i32
    return %arg0, %c0_i32, %c0_i32_0, %c0_i32_1 : i32, i32, i32, i32
  }
  func.func @transform_1(%arg0: i32) -> (i32, i32) {
    %c0_i32 = arith.constant 0 : i32
    %c0_i32_0 = arith.constant 0 : i32
    %c0_i32_1 = arith.constant 0 : i32
    return %c0_i32, %c0_i32_0 : i32, i32
  }
  func.func @transform_2(%arg0: i32) -> (i32, i32) {
    %c0_i32 = arith.constant 0 : i32
    %c0_i32_0 = arith.constant 0 : i32
    %c0_i32_1 = arith.constant 0 : i32
    return %c0_i32, %c0_i32_0 : i32, i32
  }
  func.func @transform_3(%arg0: i32) -> (i32, i32, i32, i32) {
    %c0_i32 = arith.constant 0 : i32
    %c0_i32_0 = arith.constant 0 : i32
    %c0_i32_1 = arith.constant 0 : i32
    %c0_i32_2 = arith.constant 0 : i32
    return %arg0, %c0_i32, %c0_i32_0, %c0_i32_1 : i32, i32, i32, i32
  }
  func.func @transform_4(%arg0: i32) -> (i32, i32, i32) {
    %c0_i32 = arith.constant 0 : i32
    %c0_i32_0 = arith.constant 0 : i32
    %c0_i32_1 = arith.constant 0 : i32
    return %arg0, %c0_i32, %c0_i32_0 : i32, i32, i32
  }
}

module attributes {stable_mosaic.version = 11 : i64} {
  func.func @_bn_residual_kernel(%arg0: i32, %arg1: memref<1x8x8x128xbf16, #tpu.memory_space<vmem>>, %arg2: memref<2x128xf32, #tpu.memory_space<vmem>>, %arg3: memref<1x8x8x128xbf16, #tpu.memory_space<vmem>>, %arg4: memref<2x128xf32, #tpu.memory_space<vmem>>, %arg5: memref<1x8x8x128xf32, #tpu.memory_space<vmem>>) attributes {dimension_semantics = [#tpu.dimension_semantics<parallel>], iteration_bounds = array<i64: 2>, scalar_prefetch = 0 : i64, scratch_operands = 0 : i64, tpu.core_type = #tpu.core_type<tc>, window_params = [{transform_indices = @transform_0, window_bounds = array<i64: 1, 8, 8, 128>}, {pipeline_mode = #tpu.pipeline_mode<synchronous>, transform_indices = @transform_1, window_bounds = array<i64: 2, 128>}, {transform_indices = @transform_2, window_bounds = array<i64: 1, 8, 8, 128>}, {pipeline_mode = #tpu.pipeline_mode<synchronous>, transform_indices = @transform_3, window_bounds = array<i64: 2, 128>}, {transform_indices = @transform_4, window_bounds = array<i64: 1, 8, 8, 128>}]} {
    %c0 = arith.constant 0 : index
    %c0_0 = arith.constant 0 : index
    %c0_1 = arith.constant 0 : index
    %c0_2 = arith.constant 0 : index
    %0 = vector.load %arg1[%c0, %c0_0, %c0_1, %c0_2] : memref<1x8x8x128xbf16, #tpu.memory_space<vmem>>, vector<1x8x8x128xbf16>
    %1 = arith.extf %0 : vector<1x8x8x128xbf16> to vector<1x8x8x128xf32>
    %2 = vector.shape_cast %1 : vector<1x8x8x128xf32> to vector<64x128xf32>
    %c0_3 = arith.constant 0 : index
    %c0_4 = arith.constant 0 : index
    %3 = vector.load %arg2[%c0_3, %c0_4] : memref<2x128xf32, #tpu.memory_space<vmem>>, vector<1x128xf32>
    %4 = vector.broadcast %3 : vector<1x128xf32> to vector<64x128xf32>
    %5 = arith.mulf %2, %4 : vector<64x128xf32>
    %c1 = arith.constant 1 : index
    %c0_5 = arith.constant 0 : index
    %6 = vector.load %arg2[%c1, %c0_5] : memref<2x128xf32, #tpu.memory_space<vmem>>, vector<1x128xf32>
    %7 = vector.broadcast %6 : vector<1x128xf32> to vector<64x128xf32>
    %8 = arith.addf %5, %7 : vector<64x128xf32>
    %cst = arith.constant 0.000000e+00 : f32
    %9 = vector.broadcast %cst : f32 to vector<64x128xf32>
    %10 = arith.minimumf %8, %9 : vector<64x128xf32>
    %cst_6 = arith.constant 13.333333 : f32
    %11 = vector.broadcast %cst_6 : f32 to vector<64x128xf32>
    %12 = arith.mulf %10, %11 : vector<64x128xf32>
    %13 = math.exp %12 : vector<64x128xf32>
    %cst_7 = arith.constant 1.000000e+00 : f32
    %14 = vector.broadcast %cst_7 : f32 to vector<64x128xf32>
    %15 = arith.subf %13, %14 : vector<64x128xf32>
    %cst_8 = arith.constant 7.500000e-02 : f32
    %16 = vector.broadcast %cst_8 : f32 to vector<64x128xf32>
    %17 = arith.mulf %16, %15 : vector<64x128xf32>
    %cst_9 = arith.constant 0.000000e+00 : f32
    %18 = vector.broadcast %cst_9 : f32 to vector<64x128xf32>
    %19 = arith.cmpf ogt, %8, %18 : vector<64x128xf32>
    %20 = arith.select %19, %8, %17 : vector<64x128xi1>, vector<64x128xf32>
    %c0_10 = arith.constant 0 : index
    %c0_11 = arith.constant 0 : index
    %c0_12 = arith.constant 0 : index
    %c0_13 = arith.constant 0 : index
    %21 = vector.load %arg3[%c0_10, %c0_11, %c0_12, %c0_13] : memref<1x8x8x128xbf16, #tpu.memory_space<vmem>>, vector<1x8x8x128xbf16>
    %22 = arith.extf %21 : vector<1x8x8x128xbf16> to vector<1x8x8x128xf32>
    %23 = vector.shape_cast %22 : vector<1x8x8x128xf32> to vector<64x128xf32>
    %c0_14 = arith.constant 0 : index
    %c0_15 = arith.constant 0 : index
    %24 = vector.load %arg4[%c0_14, %c0_15] : memref<2x128xf32, #tpu.memory_space<vmem>>, vector<1x128xf32>
    %25 = vector.broadcast %24 : vector<1x128xf32> to vector<64x128xf32>
    %26 = arith.mulf %23, %25 : vector<64x128xf32>
    %c1_16 = arith.constant 1 : index
    %c0_17 = arith.constant 0 : index
    %27 = vector.load %arg4[%c1_16, %c0_17] : memref<2x128xf32, #tpu.memory_space<vmem>>, vector<1x128xf32>
    %28 = vector.broadcast %27 : vector<1x128xf32> to vector<64x128xf32>
    %29 = arith.addf %26, %28 : vector<64x128xf32>
    %cst_18 = arith.constant 0.000000e+00 : f32
    %30 = vector.broadcast %cst_18 : f32 to vector<64x128xf32>
    %31 = arith.minimumf %29, %30 : vector<64x128xf32>
    %cst_19 = arith.constant 13.333333 : f32
    %32 = vector.broadcast %cst_19 : f32 to vector<64x128xf32>
    %33 = arith.mulf %31, %32 : vector<64x128xf32>
    %34 = math.exp %33 : vector<64x128xf32>
    %cst_20 = arith.constant 1.000000e+00 : f32
    %35 = vector.broadcast %cst_20 : f32 to vector<64x128xf32>
    %36 = arith.subf %34, %35 : vector<64x128xf32>
    %cst_21 = arith.constant 7.500000e-02 : f32
    %37 = vector.broadcast %cst_21 : f32 to vector<64x128xf32>
    %38 = arith.mulf %37, %36 : vector<64x128xf32>
    %cst_22 = arith.constant 0.000000e+00 : f32
    %39 = vector.broadcast %cst_22 : f32 to vector<64x128xf32>
    %40 = arith.cmpf ogt, %29, %39 : vector<64x128xf32>
    %41 = arith.select %40, %29, %38 : vector<64x128xi1>, vector<64x128xf32>
    %42 = arith.addf %20, %41 : vector<64x128xf32>
    %43 = vector.shape_cast %42 : vector<64x128xf32> to vector<1x8x8x128xf32>
    %c0_23 = arith.constant 0 : index
    %c0_24 = arith.constant 0 : index
    %c0_25 = arith.constant 0 : index
    %c0_26 = arith.constant 0 : index
    %44 = vector.load %arg5[%c0_23, %c0_24, %c0_25, %c0_26] : memref<1x8x8x128xf32, #tpu.memory_space<vmem>>, vector<1x8x8x128xf32>
    tpu.vector_store %arg5[%c0_23, %c0_24, %c0_25, %c0_26], %43 {strides = array<i32>} : memref<1x8x8x128xf32, #tpu.memory_space<vmem>>, vector<1x8x8x128xf32>,
    return
  }
  func.func @transform_0(%arg0: i32) -> (i32, i32, i32, i32) {
    %c0_i32 = arith.constant 0 : i32
    %c0_i32_0 = arith.constant 0 : i32
    %c0_i32_1 = arith.constant 0 : i32
    %c0_i32_2 = arith.constant 0 : i32
    return %arg0, %c0_i32, %c0_i32_0, %c0_i32_1 : i32, i32, i32, i32
  }
  func.func @transform_1(%arg0: i32) -> (i32, i32) {
    %c0_i32 = arith.constant 0 : i32
    %c0_i32_0 = arith.constant 0 : i32
    %c0_i32_1 = arith.constant 0 : i32
    return %c0_i32, %c0_i32_0 : i32, i32
  }
  func.func @transform_2(%arg0: i32) -> (i32, i32, i32, i32) {
    %c0_i32 = arith.constant 0 : i32
    %c0_i32_0 = arith.constant 0 : i32
    %c0_i32_1 = arith.constant 0 : i32
    %c0_i32_2 = arith.constant 0 : i32
    return %arg0, %c0_i32, %c0_i32_0, %c0_i32_1 : i32, i32, i32, i32
  }
  func.func @transform_3(%arg0: i32) -> (i32, i32) {
    %c0_i32 = arith.constant 0 : i32
    %c0_i32_0 = arith.constant 0 : i32
    %c0_i32_1 = arith.constant 0 : i32
    return %c0_i32, %c0_i32_0 : i32, i32
  }
  func.func @transform_4(%arg0: i32) -> (i32, i32, i32, i32) {
    %c0_i32 = arith.constant 0 : i32
    %c0_i32_0 = arith.constant 0 : i32
    %c0_i32_1 = arith.constant 0 : i32
    %c0_i32_2 = arith.constant 0 : i32
    return %arg0, %c0_i32, %c0_i32_0, %c0_i32_1 : i32, i32, i32, i32
  }
}

</mosaic_0001>

<bundles_post_ra>
// kernel: res_layer_forward.7
= control target key start
LH: loop header
LB: loop body
LE: loop exit
PB: predicated region body
PF: predicated region fallthrough
CT: control target
= control target key end

     0   :  { %s660_s15 = smov 0   ;;  %s850_s0 = inlined_call_operand.vmem [shape: bf16[2,8,8,128], index: 0, kind: input, shape index: {}]   ;;  %s851_s1 = inlined_call_operand.vmem [shape: f32[2,128], index: 1, kind: input, shape index: {}]   ;;  %s852_s2 = inlined_call_operand.vmem [shape: bf16[2,8,8,128], index: 2, kind: input, shape index: {}]   ;;  %s853_s3 = inlined_call_operand.vmem [shape: f32[2,128], index: 3, kind: input, shape index: {}]   ;;  %s854_s4 = inlined_call_operand.vmem [shape: f32[2,8,8,128], index: 4, kind: output, shape index: {}]  }
   0x1 LB: > { %s513_s16 = sadd.s32 4294967295, %s633_s15   ;;  %p517_p0 = scmp.ge.s32.totalorder %s633_s15, 1  ;;  %s633_s15 = sphi %s660_s15, %s14_s15  }
   0x2   : > { %p172_p1 = scmp.lt.s32.totalorder %s633_s15, 3 }
   0x4   : > { %p173_p2 = pnand %p517_p0, %p172_p1 }
   0x5   : > { %p203_p3 = scmp.lt.s32.totalorder (!%p173_p2), %s513_s16, 1  ;;  %v684_v0 = vld [vmem:[%s851_s1] ss:$0 sm:$0xff] (!%p173_p2)  ;;  %v698_v10 = vld [vmem:[%s851_s1 + $0x1] ss:$0 sm:$0xff] (!%p173_p2) }
   0x6   : > { %176 = sbr.rel (%p173_p2) target bundleno = 81 (0x51), region = 36  ;;  %v689_v1 = vld [vmem:[%s853_s3] ss:$0 sm:$0xff] (!%p173_p2)  ;;  %v703_v11 = vld [vmem:[%s853_s3 + $0x1] ss:$0 sm:$0xff] (!%p173_p2) }
   0xd   : > { %s856_s16 = smov (!%p203_p3, %s513_s16), 1 }
   0xe   : > { %s546_s17 = sshll.u32 %s856_s16, 5  ;;  %s548_s6 = sshll.u32 %s856_s16, 6 }
   0xf   : > { %s674_s20 = scalar_lea.vmem %s850_s0, %s546_s17  ;;  %s679_s23 = scalar_lea.vmem %s852_s2, %s546_s17 }
  0x10   : > { %v550_v2 = vld [vmem:[%s674_s20] sm:$0xff]   ;;  %v581_v4 = vld [vmem:[%s674_s20 + $0x8] sm:$0xff]   ;;  %v582_v34 = vld [vmem:[%s674_s20 + $0x10] sm:$0xff]   ;;  %s799_s9 = scalar_lea.vmem %s854_s4, %s548_s6 }
  0x11   : > { %v566_v3 = vld [vmem:[%s679_s23] sm:$0xff]   ;;  %v551_v5 = vunpack.c.l.bf16 %v550_v2  ;;  %v552_v7 = vunpack.c.h.bf16 %v550_v2  ;;  %v584_v9 = vld [vmem:[%s679_s23 + $0x8] sm:$0xff]   ;;  %v555_v12 = vunpack.c.l.bf16 %v581_v4  ;;  %v556_v14 = vunpack.c.h.bf16 %v581_v4  ;;  %v585_v39 = vld [vmem:[%s679_s23 + $0x10] sm:$0xff]  }
  0x12   : > { %v567_v6 = vunpack.c.l.bf16 %v566_v3  ;;  %v568_v8 = vunpack.c.h.bf16 %v566_v3  ;;  %v571_v13 = vunpack.c.l.bf16 %v584_v9  ;;  %v572_v15 = vunpack.c.h.bf16 %v584_v9 }
  0x13   : > { %v239_v16 = vmul.f32 %v551_v5, %v684_v0  ;;  %v240_v18 = vmul.f32 %v552_v7, %v684_v0  ;;  %v241_v20 = vmul.f32 %v555_v12, %v684_v0  ;;  %v242_v22 = vmul.f32 %v556_v14, %v684_v0  ;;  %v763_v7 = vld [vmem:[%s679_s23 + $0x18] sm:$0xff]  }
  0x14   : > { %v345_v17 = vmul.f32 %v567_v6, %v689_v1  ;;  %v346_v19 = vmul.f32 %v568_v8, %v689_v1  ;;  %v347_v21 = vmul.f32 %v571_v13, %v689_v1  ;;  %v348_v29 = vmul.f32 %v572_v15, %v689_v1  ;;  %v760_v6 = vld [vmem:[%s674_s20 + $0x18] sm:$0xff]  }
  0x15   : > { %v713_v23 = vadd.f32 %v698_v10, %v239_v16  ;;  %v719_v25 = vadd.f32 %v698_v10, %v240_v18  ;;  %v725_v27 = vadd.f32 %v698_v10, %v241_v20  ;;  %v738_v38 = vadd.f32 %v698_v10, %v242_v22 }
  0x16   : > { %v716_v24 = vadd.f32 %v703_v11, %v345_v17  ;;  %v722_v26 = vadd.f32 %v703_v11, %v346_v19  ;;  %v728_v28 = vadd.f32 %v703_v11, %v347_v21  ;;  %v743_v43 = vadd.f32 %v703_v11, %v348_v29 }
  0x17   : > { %v260_v30 = vmin.f32 %v713_v23, 0.0  ;;  %v261_v32 = vmin.f32 %v719_v25, 0.0  ;;  %v262_v37 = vmin.f32 %v725_v27, 0.0  ;;  %v559_v47 = vunpack.c.l.bf16 %v582_v34 }
  0x18   : > { %v366_v31 = vmin.f32 %v716_v24, 0.0  ;;  %v367_v33 = vmin.f32 %v722_v26, 0.0  ;;  %v368_v42 = vmin.f32 %v728_v28, 0.0  ;;  %v575_v51 = vunpack.c.l.bf16 %v585_v39 }
  0x19   : > { %v268_v35 = vmul.f32 13.333333, %v260_v30  ;;  %v269_v40 = vmul.f32 13.333333, %v261_v32  ;;  %v270_v46 = vmul.f32 13.333333, %v262_v37  ;;  %v243_v57 = vmul.f32 %v559_v47, %v684_v0 }
  0x1a   : > { %v374_v36 = vmul.f32 13.333333, %v366_v31  ;;  %v375_v41 = vmul.f32 13.333333, %v367_v33  ;;  %v376_v50 = vmul.f32 13.333333, %v368_v42  ;;  %v349_v58 = vmul.f32 %v575_v51, %v689_v1 }
  0x1b   : > { %v276_v44 = vmul.f32 1.442695, %v268_v35  ;;  %v278_v48 = vmul.f32 1.442695, %v269_v40  ;;  %v280_v52 = vmul.f32 1.442695, %v270_v46  ;;  %v560_v60 = vunpack.c.h.bf16 %v582_v34 }
  0x1c   : > { %v382_v45 = vmul.f32 1.442695, %v374_v36  ;;  %v384_v49 = vmul.f32 1.442695, %v375_v41  ;;  %v263_v53 = vmin.f32 %v738_v38, 0.0  ;;  %v369_v55 = vmin.f32 %v743_v43, 0.0 }
  0x1d   : > { %595 = vpow2.f32 %v276_v44  ;;  %v386_v54 = vmul.f32 1.442695, %v376_v50  ;;  %v576_v61 = vunpack.c.h.bf16 %v585_v39  ;;  %vm308_vm0 = vcmp.gt.f32.partialorder %v713_v23, 0.0 }
  0x1e   : > { %597 = vpow2.f32 %v382_v45  ;;  %v271_v56 = vmul.f32 13.333333, %v263_v53  ;;  %v377_v59 = vmul.f32 13.333333, %v369_v55  ;;  %v751_v63 = vadd.f32 %v698_v10, %v243_v57 }
  0x1f   : > { %599 = vpow2.f32 %v278_v48  ;;  %v754_v2 = vadd.f32 %v703_v11, %v349_v58  ;;  %vm414_vm1 = vcmp.gt.f32.partialorder %v716_v24, 0.0  ;;  %v244_v4 = vmul.f32 %v560_v60, %v684_v0 }
  0x20   : > { %601 = vpow2.f32 %v384_v49  ;;  %v282_v62 = vmul.f32 1.442695, %v271_v56  ;;  %v388_v3 = vmul.f32 1.442695, %v377_v59  ;;  %v350_v5 = vmul.f32 %v576_v61, %v689_v1 }
  0x21   : > { %603 = vpow2.f32 %v280_v52  ;;  %vm309_vm2 = vcmp.gt.f32.partialorder %v719_v25, 0.0  ;;  %v264_v8 = vmin.f32 %v751_v63, 0.0  ;;  %v370_v9 = vmin.f32 %v754_v2, 0.0 }
  0x22   : > { %605 = vpow2.f32 %v386_v54  ;;  %vm415_vm3 = vcmp.gt.f32.partialorder %v722_v26, 0.0  ;;  %v770_v12 = vadd.f32 %v698_v10, %v244_v4  ;;  %v773_v13 = vadd.f32 %v703_v11, %v350_v5 }
  0x23   : > { %607 = vpow2.f32 %v282_v62  ;;  %v272_v14 = vmul.f32 13.333333, %v264_v8  ;;  %v378_v15 = vmul.f32 13.333333, %v370_v9  ;;  %v563_v16 = vunpack.c.l.bf16 %v760_v6 }
  0x24   : > { %609 = vpow2.f32 %v388_v3  ;;  %v579_v17 = vunpack.c.l.bf16 %v763_v7  ;;  %vm310_vm4 = vcmp.gt.f32.partialorder %v725_v27, 0.0  ;;  %vm416_vm5 = vcmp.gt.f32.partialorder %v728_v28, 0.0 }
  0x25   : > { %v265_v18 = vmin.f32 %v770_v12, 0.0  ;;  %v371_v19 = vmin.f32 %v773_v13, 0.0  ;;  %vm311_vm6 = vcmp.gt.f32.partialorder %v738_v38, 0.0  ;;  %v284_v21 = vmul.f32 1.442695, %v272_v14 }
  0x26   : > { %v390_v22 = vmul.f32 1.442695, %v378_v15  ;;  %v245_v29 = vmul.f32 %v563_v16, %v684_v0  ;;  %v351_v30 = vmul.f32 %v579_v17, %v689_v1  ;;  %v564_v35 = vunpack.c.h.bf16 %v760_v6 }
  0x27   : > { %v596_v20 = vpop.eup %595  ;;  %v273_v33 = vmul.f32 13.333333, %v265_v18  ;;  %v379_v34 = vmul.f32 13.333333, %v371_v19  ;;  %611 = vpow2.f32 %v284_v21  ;;  %vm417_vm7 = vcmp.gt.f32.partialorder %v743_v43, 0.0 }
  0x28   : > { %v598_v31 = vpop.eup %597  ;;  %v526_v32 = vadd.f32 -1.0, %v596_v20  ;;  %v786_v39 = vadd.f32 %v698_v10, %v245_v29  ;;  %v789_v40 = vadd.f32 %v703_v11, %v351_v30  ;;  %613 = vpow2.f32 %v390_v22 }
  0x29   : > { %v600_v36 = vpop.eup %599  ;;  %v536_v37 = vadd.f32 -1.0, %v598_v31  ;;  %v286_v45 = vmul.f32 1.442695, %v273_v33  ;;  %v392_v49 = vmul.f32 1.442695, %v379_v34  ;;  %vm312_vm8 = vcmp.gt.f32.partialorder %v751_v63, 0.0 }
  0x2a   : > { %v602_v41 = vpop.eup %601  ;;  %v300_v42 = vmul.f32 0.075, %v526_v32  ;;  %v527_v44 = vadd.f32 -1.0, %v600_v36  ;;  %v266_v50 = vmin.f32 %v786_v39, 0.0  ;;  %vm418_vm9 = vcmp.gt.f32.partialorder %v754_v2, 0.0 }
  0x2b   : > { %v604_v46 = vpop.eup %603  ;;  %v406_v47 = vmul.f32 0.075, %v536_v37  ;;  %v537_v48 = vadd.f32 -1.0, %v602_v41  ;;  %615 = vpow2.f32 %v286_v45  ;;  %vm313_vm10 = vcmp.gt.f32.partialorder %v770_v12, 0.0 }
  0x2c   : > { %v606_v51 = vpop.eup %605  ;;  %v316_v52 = vsel %vm308_vm0, %v713_v23, %v300_v42  ;;  %v301_v53 = vmul.f32 0.075, %v527_v44  ;;  %v528_v54 = vadd.f32 -1.0, %v604_v46  ;;  %617 = vpow2.f32 %v392_v49 }
  0x2d   : > { %v608_v55 = vpop.eup %607  ;;  %v422_v56 = vsel %vm414_vm1, %v716_v24, %v406_v47  ;;  %v407_v57 = vmul.f32 0.075, %v537_v48  ;;  %v538_v58 = vadd.f32 -1.0, %v606_v51  ;;  %v274_v6 = vmul.f32 13.333333, %v266_v50 }
  0x2e   : > { %v610_v59 = vpop.eup %609  ;;  %v430_v60 = vadd.f32 %v422_v56, %v316_v52  ;;  %v317_v23 = vsel %vm309_vm2, %v719_v25, %v301_v53  ;;  %v302_v61 = vmul.f32 0.075, %v528_v54  ;;  %v529_v62 = vadd.f32 -1.0, %v608_v55 }
  0x2f   : > { %v423_v3 = vsel %vm415_vm3, %v722_v26, %v407_v57  ;;  %v408_v4 = vmul.f32 0.075, %v538_v58  ;;  %v539_v5 = vadd.f32 -1.0, %v610_v59  ;;  %v288_v15 = vmul.f32 1.442695, %v274_v6 }
  0x30   : > { %438 = vst [vmem:[%s799_s9] sm:$0xff] %v430_v60  ;;  %v431_v24 = vadd.f32 %v423_v3, %v317_v23  ;;  %v318_v8 = vsel %vm310_vm4, %v725_v27, %v302_v61  ;;  %v303_v9 = vmul.f32 0.075, %v529_v62  ;;  %v372_v26 = vmin.f32 %v789_v40, 0.0 }
  0x31   : > { %v424_v25 = vsel %vm416_vm5, %v728_v28, %v408_v4  ;;  %v409_v14 = vmul.f32 0.075, %v539_v5  ;;  %v246_v27 = vmul.f32 %v564_v35, %v684_v0  ;;  %v612_v18 = vpop.eup %611  ;;  %619 = vpow2.f32 %v288_v15 }
  0x32   : > { %439 = vst [vmem:[%s799_s9 + $0x8] sm:$0xff] %v431_v24  ;;  %v432_v16 = vadd.f32 %v424_v25, %v318_v8  ;;  %v319_v17 = vsel %vm311_vm6, %v738_v38, %v303_v9  ;;  %v380_v20 = vmul.f32 13.333333, %v372_v26  ;;  %v580_v28 = vunpack.c.h.bf16 %v763_v7  ;;  %v614_v21 = vpop.eup %613 }
  0x33   : > { %v425_v19 = vsel %vm417_vm7, %v743_v43, %v409_v14  ;;  %v530_v29 = vadd.f32 -1.0, %v612_v18  ;;  %v259_v30 = vadd.f32 %v698_v10, %v246_v27  ;;  %v540_v31 = vadd.f32 -1.0, %v614_v21 }
  0x34   : > { %440 = vst [vmem:[%s799_s9 + $0x10] sm:$0xff] %v432_v16  ;;  %v433_v22 = vadd.f32 %v425_v19, %v319_v17  ;;  %v394_v38 = vmul.f32 1.442695, %v380_v20  ;;  %v352_v0 = vmul.f32 %v580_v28, %v689_v1  ;;  %vm419_vm11 = vcmp.gt.f32.partialorder %v773_v13, 0.0 }
  0x35   : > { %v616_v32 = vpop.eup %615  ;;  %v304_v33 = vmul.f32 0.075, %v530_v29  ;;  %v267_v43 = vmin.f32 %v259_v30, 0.0  ;;  %v410_v7 = vmul.f32 0.075, %v540_v31  ;;  %vm314_vm12 = vcmp.gt.f32.partialorder %v786_v39, 0.0 }
  0x36   : > { %441 = vst [vmem:[%s799_s9 + $0x18] sm:$0xff] %v433_v22  ;;  %v618_v34 = vpop.eup %617  ;;  %v531_v35 = vadd.f32 -1.0, %v616_v32  ;;  %621 = vpow2.f32 %v394_v38  ;;  %v365_v36 = vadd.f32 %v703_v11, %v352_v0  ;;  %vm420_vm13 = vcmp.gt.f32.partialorder %v789_v40, 0.0 }
  0x37   : > { %v320_v10 = vsel %vm312_vm8, %v751_v63, %v304_v33  ;;  %v541_v37 = vadd.f32 -1.0, %v618_v34  ;;  %v275_v41 = vmul.f32 13.333333, %v267_v43  ;;  %v426_v1 = vsel %vm418_vm9, %v754_v2, %v410_v7 }
  0x38   : > { %v305_v42 = vmul.f32 0.075, %v531_v35  ;;  %v373_v44 = vmin.f32 %v365_v36, 0.0  ;;  %v434_v45 = vadd.f32 %v426_v1, %v320_v10  ;;  %vm315_vm14 = vcmp.gt.f32.partialorder %v259_v30, 0.0 }
  0x39   : > { %v411_v46 = vmul.f32 0.075, %v541_v37  ;;  %v290_v47 = vmul.f32 1.442695, %v275_v41  ;;  %vm421_vm15 = vcmp.gt.f32.partialorder %v365_v36, 0.0 }
  0x3a   : > { %v321_v48 = vsel %vm313_vm10, %v770_v12, %v305_v42  ;;  %v381_v49 = vmul.f32 13.333333, %v373_v44  ;;  %442 = vst [vmem:[%s799_s9 + $0x20] sm:$0xff] %v434_v45 }
  0x3b   : > { %v427_v11 = vsel %vm419_vm11, %v773_v13, %v411_v46  ;;  %623 = vpow2.f32 %v290_v47  ;;  %v620_v63 = vpop.eup %619 }
  0x3c   : > { %v435_v50 = vadd.f32 %v427_v11, %v321_v48  ;;  %v396_v51 = vmul.f32 1.442695, %v381_v49  ;;  %v532_v2 = vadd.f32 -1.0, %v620_v63 }
  0x3e   : > { %443 = vst [vmem:[%s799_s9 + $0x28] sm:$0xff] %v435_v50  ;;  %625 = vpow2.f32 %v396_v51  ;;  %v306_v52 = vmul.f32 0.075, %v532_v2 }
  0x40   : > { %v622_v53 = vpop.eup %621  ;;  %v322_v12 = vsel %vm314_vm12, %v786_v39, %v306_v52 }
  0x41   : > { %v542_v54 = vadd.f32 -1.0, %v622_v53 }
  0x43   : > { %v412_v55 = vmul.f32 0.075, %v542_v54 }
  0x45   : > { %v624_v13 = vpop.eup %623  ;;  %v428_v56 = vsel %vm420_vm13, %v789_v40, %v412_v55 }
  0x46   : > { %v436_v57 = vadd.f32 %v428_v56, %v322_v12  ;;  %v533_v58 = vadd.f32 -1.0, %v624_v13 }
  0x48   : > { %v626_v59 = vpop.eup %625  ;;  %444 = vst [vmem:[%s799_s9 + $0x30] sm:$0xff] %v436_v57  ;;  %v307_v60 = vmul.f32 0.075, %v533_v58 }
  0x49   : > { %v543_v23 = vadd.f32 -1.0, %v626_v59 }
  0x4a   : > { %v323_v61 = vsel %vm315_vm14, %v259_v30, %v307_v60 }
  0x4b   : > { %v413_v62 = vmul.f32 0.075, %v543_v23 }
  0x4d   : > { %v429_v3 = vsel %vm421_vm15, %v365_v36, %v413_v62 }
  0x4e   : > { %v437_v4 = vadd.f32 %v429_v3, %v323_v61 }
  0x50   : > { %445 = vst [vmem:[%s799_s9 + $0x38] sm:$0xff] %v437_v4 }
  0x51 PF: > { %s14_s15 = sadd.s32 1, %s633_s15  }
  0x52   : > { %p11_p4 = scmp.ge.s32.totalorder %s14_s15, 4  }
  0x54   :  { %13 = sbr.rel (!%p11_p4) target bundleno = 1 (0x1), region = 69 }

// kernel: res_layer_forward.5
= control target key start
LH: loop header
LB: loop body
LE: loop exit
PB: predicated region body
PF: predicated region fallthrough
CT: control target
= control target key end

     0   :  { %s3348_s15 = smov 0   ;;  %s4028_s0 = inlined_call_operand.vmem [shape: bf16[2,8,8,128], index: 0, kind: input, shape index: {}]   ;;  %s4029_s1 = inlined_call_operand.vmem [shape: f32[2,128], index: 1, kind: input, shape index: {}]   ;;  %s4030_s2 = inlined_call_operand.vmem [shape: bf16[1152,128], index: 2, kind: input, shape index: {}]   ;;  %s4031_s3 = inlined_call_operand.vmem [shape: bf16[2,8,8,128], index: 3, kind: output, shape index: {0}]   ;;  %s4032_s4 = inlined_call_operand.vmem [shape: f32[2,2,128], index: 4, kind: output, shape index: {1}]  }
   0x1 LB: > { %s2587_s16 = sadd.s32 4294967295, %s3320_s15   ;;  %p2591_p0 = scmp.ge.s32.totalorder %s3320_s15, 1  ;;  %s3320_s15 = sphi %s3348_s15, %s15_s15  }
   0x2   : > { %p165_p1 = scmp.lt.s32.totalorder %s3320_s15, 3 }
   0x4   : > { %p166_p2 = pnand %p2591_p0, %p165_p1 }
   0x5   : > { %v3214_v0 = vld [vmem:[%s4030_s2 + $0x40] sm:$0xff] (!%p166_p2)   ;;  %v3216_v2 = vld [vmem:[%s4030_s2 + $0x48] sm:$0xff] (!%p166_p2)   ;;  %p195_p3 = scmp.lt.s32.totalorder (!%p166_p2), %s2587_s16, 1  ;;  %v3218_v4 = vld [vmem:[%s4030_s2 + $0x50] sm:$0xff] (!%p166_p2)   ;;  %v3322_v6 = vmov (!%p166_p2), 0   ;;  %vm388_vm0 = vcmask (!%p166_p2), 1040384  }
   0x6   : > { %169 = sbr.rel (%p166_p2) target bundleno = 479 (0x1df), region = 32  ;;  %v3215_v1 = vld [vmem:[%s4030_s2 + $0x100] sm:$0xff] (!%p166_p2)   ;;  %2909 = vmatprep.subr.bf16.mxu1 (!%p166_p2), %v3214_v0  ;;  %v3217_v3 = vld [vmem:[%s4030_s2 + $0x108] sm:$0xff] (!%p166_p2)   ;;  %v3219_v5 = vld [vmem:[%s4030_s2 + $0x110] sm:$0xff] (!%p166_p2)   ;;  %483 = vst [vmem:[#allocation2] sm:$0xf] (!%p166_p2), %v3322_v6 }
   0x7   : > { %3005 = vmatprep.subr.bf16.mxu0 (!%p166_p2), %v3215_v1  ;;  %2910 = vmatpush3.bf16.msra.mxu1 (!%p166_p2), %v3214_v0  ;;  %484 = vst [vmem:[#allocation2 + $0x4] sm:$0x1] (!%p166_p2), %v3322_v6  ;;  %486 = vst [vmem:[#allocation2 + $0x48] sm:$0xf] (!%p166_p2), %v3322_v6  ;;  %v3220_v7 = vld [vmem:[%s4030_s2 + $0x58] sm:$0xff] (!%p166_p2)   ;;  %v3222_v9 = vld [vmem:[%s4030_s2 + $0x60] sm:$0xff] (!%p166_p2)  }
   0x8   : > { %3006 = vmatpush3.bf16.msra.mxu0 (!%p166_p2), %v3215_v1  ;;  %2911 = vmatprep.subr.bf16.mxu1 (!%p166_p2), %v3216_v2  ;;  %487 = vst [vmem:[#allocation2 + $0x4c] sm:$0x1] (!%p166_p2), %v3322_v6  ;;  %v3221_v8 = vld [vmem:[%s4030_s2 + $0x118] sm:$0xff] (!%p166_p2)   ;;  %v3223_v10 = vld [vmem:[%s4030_s2 + $0x120] sm:$0xff] (!%p166_p2)   ;;  %v3224_v11 = vld [vmem:[%s4030_s2 + $0x68] sm:$0xff] (!%p166_p2)   ;;  %vm399_vm2 = vcmask (!%p166_p2), 1044480  }
   0x9   : > { %3007 = vmatprep.subr.bf16.mxu0 (!%p166_p2), %v3217_v3  ;;  %v3402_v12 = vld [vmem:[%s4029_s1] ss:$0 sm:$0xff] (!%p166_p2)  ;;  %v3225_v14 = vld [vmem:[%s4030_s2 + $0x128] sm:$0xff] (!%p166_p2)   ;;  %v3411_v17 = vld [vmem:[%s4029_s1 + $0x1] ss:$0 sm:$0xff] (!%p166_p2)  ;;  %vm941_vm15 = vcmask (!%p166_p2), 1042432  }
   0xa   : > { %v3226_v19 = vld [vmem:[%s4030_s2 + $0x70] sm:$0xff] (!%p166_p2)   ;;  %v3228_v27 = vld [vmem:[%s4030_s2 + $0x78] sm:$0xff] (!%p166_p2)   ;;  %v3441_v36 = vld [vmem:[%s4030_s2] sm:$0xff] (!%p166_p2)   ;;  %vm389_vm1 = vsmask.f32 (!%p166_p2), 256 }
   0xb   : > { %2912 = vmatpush3.bf16.msra.mxu1 (!%p166_p2), %v3216_v2  ;;  %v3227_v21 = vld [vmem:[%s4030_s2 + $0x130] sm:$0xff] (!%p166_p2)   ;;  %v3229_v30 = vld [vmem:[%s4030_s2 + $0x138] sm:$0xff] (!%p166_p2)   ;;  %v3452_v40 = vld [vmem:[%s4030_s2 + $0x140] sm:$0xff] (!%p166_p2)   ;;  %vm400_vm3 = vsmask.f32 (!%p166_p2), 4352 }
   0xc   : > { %3008 = vmatpush3.bf16.msra.mxu0 (!%p166_p2), %v3217_v3  ;;  %2913 = vmatprep.subr.bf16.mxu1 (!%p166_p2), %v3218_v4  ;;  %vm3492_vm8 = vmand (!%p166_p2), %vm388_vm0, %vm389_vm1  ;;  %vm520_vm10 = vsmask.f32 (!%p166_p2), 3328  ;;  %vm521_vm11 = vsmask.f32 (!%p166_p2), 7440  ;;  %vm942_vm1 = vcmask (!%p166_p2), 1046532  }
   0xd   : > { %s4042_s16 = smov (!%p195_p3, %s2587_s16), 1  ;;  %3009 = vmatprep.subr.bf16.mxu0 %v3219_v5  ;;  %v3459_v50 = vld [vmem:[#allocation2] sm:$0xf]  ;;  %vm3501_vm9 = vmand %vm399_vm2, %vm400_vm3 }
   0xe   : > { %s2757_s7 = sshll.u32 %s4042_s16, 5  ;;  %v3464_v54 = vld [vmem:[#allocation2 + $0x4] sm:$0x1]  ;;  %v524_v57 = vshrl.u32 %v3459_v50, 16  ;;  %v527_v58 = vshll.u32 %v3459_v50, 16  ;;  %vm3538_vm12 = vmor %vm520_vm10, %vm521_vm11 }
   0xf   : > { %2914 = vmatpush3.bf16.msra.mxu1 %v3218_v4  ;;  %s3394_s14 = scalar_lea.vmem %s4028_s0, %s2757_s7  ;;  %v533_v4 = vshll.u32 %v3464_v54, 16  ;;  %s204_s6 = scalar_lea.vmem %s4031_s3, %s2757_s7 }
  0x10   : > { %3010 = vmatpush3.bf16.msra.mxu0 %v3219_v5  ;;  %2915 = vmatprep.subr.bf16.mxu1 %v3220_v7  ;;  %v2760_v13 = vld [vmem:[%s3394_s14] sm:$0xff]   ;;  %v2795_v24 = vld [vmem:[%s3394_s14 + $0x8] sm:$0xff]   ;;  %v2796_v47 = vld [vmem:[%s3394_s14 + $0x10] sm:$0xff]   ;;  %s2596_s7 = sshll.u32 %s4042_s16, 1 }
  0x11   : > { %3011 = vmatprep.subr.bf16.mxu0 %v3221_v8  ;;  %v2761_v15 = vunpack.c.l.bf16 %v2760_v13  ;;  %v2762_v16 = vunpack.c.h.bf16 %v2760_v13  ;;  %v2765_v26 = vunpack.c.l.bf16 %v2795_v24  ;;  %v2766_v29 = vunpack.c.h.bf16 %v2795_v24  ;;  %v2797_v53 = vld [vmem:[%s3394_s14 + $0x18] sm:$0xff]   ;;  %s208_s10 = scalar_lea.vmem %s4032_s4, %s2596_s7 }
  0x12   : > { %v2769_v48 = vunpack.c.l.bf16 %v2796_v47  ;;  %v2770_v49 = vunpack.c.h.bf16 %v2796_v47  ;;  %v2773_v55 = vunpack.c.l.bf16 %v2797_v53  ;;  %v2774_v2 = vunpack.c.h.bf16 %v2797_v53 }
  0x13   : > { %2916 = vmatpush3.bf16.msra.mxu1 %v3220_v7  ;;  %v232_v18 = vmul.f32 %v2761_v15, %v3402_v12  ;;  %v233_v20 = vmul.f32 %v2762_v16, %v3402_v12  ;;  %v234_v32 = vmul.f32 %v2765_v26, %v3402_v12  ;;  %v235_v34 = vmul.f32 %v2766_v29, %v3402_v12 }
  0x14   : > { %3012 = vmatpush3.bf16.msra.mxu0 %v3221_v8  ;;  %2917 = vmatprep.subr.bf16.mxu1 %v3222_v9  ;;  %v236_v51 = vmul.f32 %v2769_v48, %v3402_v12  ;;  %v237_v52 = vmul.f32 %v2770_v49, %v3402_v12  ;;  %v238_v5 = vmul.f32 %v2773_v55, %v3402_v12 }
  0x15   : > { %3013 = vmatprep.subr.bf16.mxu0 %v3223_v10  ;;  %v3422_v22 = vadd.f32 %v3411_v17, %v232_v18  ;;  %v3425_v23 = vadd.f32 %v3411_v17, %v233_v20  ;;  %v3444_v37 = vadd.f32 %v3411_v17, %v234_v32  ;;  %v3447_v39 = vadd.f32 %v3411_v17, %v235_v34 }
  0x16   : > { %v3469_v59 = vadd.f32 %v3411_v17, %v236_v51  ;;  %v3472_v60 = vadd.f32 %v3411_v17, %v237_v52  ;;  %v239_v16 = vmul.f32 %v2774_v2, %v3402_v12  ;;  %v3488_v24 = vadd.f32 %v3411_v17, %v238_v5 }
  0x17   : > { %2918 = vmatpush3.bf16.msra.mxu1 %v3222_v9  ;;  %v252_v25 = vmin.f32 %v3422_v22, 0.0  ;;  %v253_v28 = vmin.f32 %v3425_v23, 0.0  ;;  %v254_v41 = vmin.f32 %v3444_v37, 0.0  ;;  %v255_v42 = vmin.f32 %v3447_v39, 0.0 }
  0x18   : > { %3014 = vmatpush3.bf16.msra.mxu0 %v3223_v10  ;;  %2919 = vmatprep.subr.bf16.mxu1 %v3224_v11  ;;  %vm300_vm4 = vcmp.gt.f32.partialorder %v3422_v22, 0.0  ;;  %v256_v0 = vmin.f32 %v3469_v59, 0.0  ;;  %v257_v1 = vmin.f32 %v3472_v60, 0.0  ;;  %vm301_vm5 = vcmp.gt.f32.partialorder %v3425_v23, 0.0 }
  0x19   : > { %3015 = vmatprep.subr.bf16.mxu0 %v3225_v14  ;;  %v260_v31 = vmul.f32 13.333333, %v252_v25  ;;  %v261_v33 = vmul.f32 13.333333, %v253_v28  ;;  %v262_v43 = vmul.f32 13.333333, %v254_v41  ;;  %v3497_v32 = vadd.f32 %v3411_v17, %v239_v16 }
  0x1a   : > { %v263_v44 = vmul.f32 13.333333, %v255_v42  ;;  %v264_v7 = vmul.f32 13.333333, %v256_v0  ;;  %v265_v8 = vmul.f32 13.333333, %v257_v1 }
  0x1b   : > { %2920 = vmatpush3.bf16.msra.mxu1 %v3224_v11  ;;  %v268_v35 = vmul.f32 1.442695, %v260_v31  ;;  %v270_v38 = vmul.f32 1.442695, %v261_v33  ;;  %v272_v45 = vmul.f32 1.442695, %v262_v43 }
  0x1c   : > { %3016 = vmatpush3.bf16.msra.mxu0 %v3225_v14  ;;  %2921 = vmatprep.subr.bf16.mxu1 %v3226_v19  ;;  %v274_v46 = vmul.f32 1.442695, %v263_v44  ;;  %v3481_v10 = vrot.slane %v524_v57, 4  ;;  %vm302_vm6 = vcmp.gt.f32.partialorder %v3444_v37, 0.0  ;;  %vm303_vm7 = vcmp.gt.f32.partialorder %v3447_v39, 0.0 }
  0x1d   : > { %3017 = vmatprep.subr.bf16.mxu0 %v3227_v21  ;;  %3298 = vpow2.f32 %v268_v35  ;;  %v276_v15 = vmul.f32 1.442695, %v264_v7  ;;  %v529_v12 = vrot.slane %v527_v58, 5  ;;  %v259_v48 = vmin.f32 %v3497_v32, 0.0 }
  0x1e   : > { %3300 = vpow2.f32 %v270_v38  ;;  %v258_v38 = vmin.f32 %v3488_v24, 0.0  ;;  %vm304_vm13 = vcmp.gt.f32.partialorder %v3469_v59, 0.0  ;;  %vm305_vm14 = vcmp.gt.f32.partialorder %v3472_v60, 0.0 }
  0x1f   : > { %2922 = vmatpush3.bf16.msra.mxu1 %v3226_v19  ;;  %3302 = vpow2.f32 %v272_v45  ;;  %v530_v57 = vor.u32 %v529_v12, %v3481_v10  ;;  %vm306_vm2 = vcmp.gt.f32.partialorder %v3488_v24, 0.0  ;;  %vm307_vm3 = vcmp.gt.f32.partialorder %v3497_v32, 0.0 }
  0x20   : > { %3018 = vmatpush3.bf16.msra.mxu0 %v3227_v21  ;;  %2923 = vmatprep.subr.bf16.mxu1 %v3228_v27  ;;  %3304 = vpow2.f32 %v274_v46  ;;  %v278_v21 = vmul.f32 1.442695, %v265_v8  ;;  %v266_v1 = vmul.f32 13.333333, %v258_v38 }
  0x21   : > { %3019 = vmatprep.subr.bf16.mxu0 %v3229_v30  ;;  %3306 = vpow2.f32 %v276_v15  ;;  %v3524_v8 = vrot.slane %v530_v57, 4 }
  0x22   : > { %3308 = vpow2.f32 %v278_v21  ;;  %v280_v16 = vmul.f32 1.442695, %v266_v1 }
  0x23   : > { %2924 = vmatpush3.bf16.msra.mxu1 %v3228_v27 }
  0x24   : > { %3020 = vmatpush3.bf16.msra.mxu0 %v3229_v30  ;;  %2933 = vmatprep.subr.bf16.mxu1 %v3441_v36  ;;  %3310 = vpow2.f32 %v280_v16 }
  0x25   : > { %3029 = vmatprep.subr.bf16.mxu0 %v3452_v40 }
  0x27   : > { %v3299_v56 = vpop.eup %3298 }
  0x28   : > { %v3301_v61 = vpop.eup %3300  ;;  %v2599_v62 = vadd.f32 -1.0, %v3299_v56 }
  0x29   : > { %v2600_v63 = vadd.f32 -1.0, %v3301_v61  ;;  %v3303_v11 = vpop.eup %3302 }
  0x2a   : > { %v292_v3 = vmul.f32 0.075, %v2599_v62  ;;  %v3305_v18 = vpop.eup %3304  ;;  %v2601_v20 = vadd.f32 -1.0, %v3303_v11 }
  0x2b   : > { %v293_v6 = vmul.f32 0.075, %v2600_v63  ;;  %v2602_v26 = vadd.f32 -1.0, %v3305_v18  ;;  %v3307_v63 = vpop.eup %3306 }
  0x2c   : > { %v308_v9 = vsel %vm300_vm4, %v3422_v22, %v292_v3  ;;  %v294_v29 = vmul.f32 0.075, %v2601_v20  ;;  %v267_v3 = vmul.f32 13.333333, %v259_v48  ;;  %v3309_v7 = vpop.eup %3308  ;;  %vm3653_vm4 = vmor %vm941_vm15, %vm942_vm1 }
  0x2d   : > { %v316_v13 = vpack.c.bf16 %v308_v9, %v308_v9  ;;  %v309_v14 = vsel %vm301_vm5, %v3425_v23, %v293_v6  ;;  %v295_v31 = vmul.f32 0.075, %v2602_v26  ;;  %v2603_v6 = vadd.f32 -1.0, %v3307_v63 }
  0x2e   : > { %v317_v19 = vpack.c.bf16 %v309_v14, %v309_v14  ;;  %v310_v35 = vsel %vm302_vm6, %v3444_v37, %v294_v29  ;;  %v3528_v9 = vrot.slane %v533_v4, 5  ;;  %v282_v20 = vmul.f32 1.442695, %v267_v3 }
  0x2f   : > { %v325_v22 = vshrl.u32 %v316_v13, 16  ;;  %v328_v25 = vshll.u32 %v316_v13, 16  ;;  %v318_v42 = vpack.c.bf16 %v310_v35, %v310_v35  ;;  %v311_v17 = vsel %vm303_vm7, %v3447_v39, %v295_v31 }
  0x30   : > { %v332_v27 = vshrl.u32 %v317_v19, 16  ;;  %v335_v28 = vshll.u32 %v317_v19, 16  ;;  %v319_v44 = vpack.c.bf16 %v311_v17, %v311_v17  ;;  %v296_v21 = vmul.f32 0.075, %v2603_v6 }
  0x31   : > { %v327_v30 = vrot.slane %v325_v22, 7  ;;  %v339_v46 = vshrl.u32 %v318_v42, 16  ;;  %v342_v47 = vshll.u32 %v318_v42, 16  ;;  %v2604_v22 = vadd.f32 -1.0, %v3309_v7 }
  0x32   : > { %v334_v34 = vrot.slane %v332_v27, 7  ;;  %v346_v51 = vshrl.u32 %v319_v44, 16  ;;  %v349_v52 = vshll.u32 %v319_v44, 16  ;;  %v536_v31 = vsel %vm3538_vm12, %v3524_v8, %v3528_v9 }
  0x33   : > { %v330_v41 = vor.u32 %v328_v25, %v327_v30  ;;  %v341_v56 = vrot.slane %v339_v46, 7  ;;  %3312 = vpow2.f32 %v282_v20  ;;  %v297_v44 = vmul.f32 0.075, %v2604_v22 }
  0x34   : > { %v337_v43 = vor.u32 %v335_v28, %v334_v34  ;;  %v348_v62 = vrot.slane %v346_v51, 7 }
  0x35   : > { %v391_v45 = vsel %vm3492_vm8, 0, %v330_v41  ;;  %v344_v0 = vor.u32 %v342_v47, %v341_v56 }
  0x36   : > { %v402_v37 = vsel %vm3501_vm9, %v391_v45, 0  ;;  %v392_v49 = vsel %vm3492_vm8, 0, %v337_v43  ;;  %v351_v2 = vor.u32 %v349_v52, %v348_v62 }
  0x37   : > { %v2607_v53 = vcombine.low %v402_v37, %v402_v37  ;;  %v2608_v39 = vcombine.high %v402_v37, %v402_v37  ;;  %v403_v55 = vsel %vm3501_vm9, %v392_v49, 0  ;;  %v393_v5 = vsel %vm3492_vm8, 0, %v344_v0 }
  0x38   : > { %v2609_v58 = vcombine.low %v403_v55, %v403_v55  ;;  %v2610_v61 = vcombine.high %v403_v55, %v403_v55  ;;  %v404_v10 = vsel %vm3501_vm9, %v393_v5, 0  ;;  %v394_v11 = vsel %vm3492_vm8, 0, %v351_v2 }
  0x39   : > { %467 = vst [vmem:[#allocation2 + $0x8] sm:$0xf] %v2607_v53  ;;  %468 = vst [vmem:[#allocation2 + $0xc] sm:$0x1] %v2608_v39  ;;  %v2611_v13 = vcombine.low %v404_v10, %v404_v10  ;;  %v2612_v14 = vcombine.high %v404_v10, %v404_v10  ;;  %v405_v15 = vsel %vm3501_vm9, %v394_v11, 0  ;;  %v312_v39 = vsel %vm304_vm13, %v3469_v59, %v296_v21 }
  0x3a   : > { %469 = vst [vmem:[#allocation2 + $0x10] sm:$0xf] %v2609_v58  ;;  %470 = vst [vmem:[#allocation2 + $0x14] sm:$0x1] %v2610_v61  ;;  %v2613_v18 = vcombine.low %v405_v15, %v405_v15  ;;  %v2614_v19 = vcombine.high %v405_v15, %v405_v15 }
  0x3b   : > { %471 = vst [vmem:[#allocation2 + $0x18] sm:$0xf] %v2611_v13  ;;  %472 = vst [vmem:[#allocation2 + $0x1c] sm:$0x1] %v2612_v14 }
  0x3c   : > { %473 = vst [vmem:[#allocation2 + $0x20] sm:$0xf] %v2613_v18  ;;  %474 = vst [vmem:[#allocation2 + $0x24] sm:$0x1] %v2614_v19  ;;  %v3311_v19 = vpop.eup %3310 }
  0x40   : > { %v3543_v25 = vld [vmem:[#allocation2 + $0x8] sm:$0xf]  ;;  %v3545_v26 = vld [vmem:[#allocation2 + $0xc] sm:$0x1] }
  0x41   : > { %v1298_v27 = vld [vmem:[#allocation2 + $0x8] sm:$0xf]  ;;  %v538_v28 = vshrl.u32 %v3543_v25, 16  ;;  %v541_v29 = vshll.u32 %v3543_v25, 16  ;;  %v547_v30 = vshll.u32 %v3545_v26, 16 }
  0x42   : > { %v3550_v12 = vld [vmem:[#allocation2 + $0xc] sm:$0x1]  ;;  %v1300_v34 = vld [vmem:[#allocation2 + $0x10] sm:$0xf]  ;;  %v3557_v35 = vld [vmem:[#allocation2 + $0x14] sm:$0x1] }
  0x43   : > { %v1315_v38 = vshrl.u32 %v1298_v27, 16  ;;  %v1318_v41 = vshll.u32 %v1298_v27, 16  ;;  %v540_v42 = vrot.slane %v538_v28, 4  ;;  %v543_v17 = vrot.slane %v541_v29, 5  ;;  %v3560_v37 = vld [vmem:[#allocation2 + $0x10] sm:$0xf]  ;;  %v3313_v29 = vpop.eup %3312 }
  0x44   : > { %v1324_v43 = vshll.u32 %v3550_v12, 16  ;;  %v1329_v47 = vshrl.u32 %v1300_v34, 16  ;;  %v1332_v48 = vshll.u32 %v1300_v34, 16  ;;  %v549_v51 = vrot.slane %v547_v30, 5  ;;  %v3563_v53 = vld [vmem:[#allocation2 + $0x14] sm:$0x1] }
  0x45   : > { %v1317_v45 = vrot.slane %v1315_v38, 4  ;;  %v1320_v46 = vrot.slane %v1318_v41, 5  ;;  %v544_v49 = vor.u32 %v543_v17, %v540_v42  ;;  %v1338_v52 = vshll.u32 %v3557_v35, 16  ;;  %v3568_v61 = vld [vmem:[#allocation2 + $0x18] sm:$0xf] }
  0x46   : > { %v1326_v56 = vrot.slane %v1324_v43, 5  ;;  %v1331_v57 = vrot.slane %v1329_v47, 4  ;;  %v1334_v58 = vrot.slane %v1332_v48, 5  ;;  %v552_v0 = vshrl.u32 %v3560_v37, 16  ;;  %v3572_v5 = vld [vmem:[#allocation2 + $0x1c] sm:$0x1] }
  0x47   : > { %v1321_v55 = vor.u32 %v1320_v46, %v1317_v45  ;;  %v545_v62 = vrot.slane %v544_v49, 4  ;;  %v1340_v63 = vrot.slane %v1338_v52, 5  ;;  %v555_v1 = vshll.u32 %v3560_v37, 16  ;;  %v1302_v11 = vld [vmem:[#allocation2 + $0x18] sm:$0xf] }
  0x48   : > { %v1335_v3 = vor.u32 %v1334_v58, %v1331_v57  ;;  %v561_v6 = vshll.u32 %v3563_v53, 16  ;;  %v566_v59 = vshrl.u32 %v3568_v61, 16  ;;  %v554_v8 = vrot.slane %v552_v0, 4  ;;  %v3581_v18 = vld [vmem:[#allocation2 + $0x1c] sm:$0x1]  ;;  %v3232_v0 = vld [vmem:[%s4030_s2 + $0x8] sm:$0xff]  }
  0x49   : > { %v1322_v2 = vrot.slane %v1321_v55, 4  ;;  %v550_v7 = vsel %vm3538_vm12, %v545_v62, %v549_v51  ;;  %v557_v9 = vrot.slane %v555_v1, 5  ;;  %v569_v10 = vshll.u32 %v3568_v61, 16  ;;  %v1304_v28 = vld [vmem:[#allocation2 + $0x20] sm:$0xf] }
  0x4a   : > { %v2623_v13 = vcombine.low %v536_v31, %v550_v7  ;;  %v1336_v15 = vrot.slane %v1335_v3, 4  ;;  %v563_v16 = vrot.slane %v561_v6, 5  ;;  %v568_v21 = vrot.slane %v566_v59, 4  ;;  %v3586_v31 = vld [vmem:[#allocation2 + $0x24] sm:$0x1] }
  0x4b   : > { %v1327_v14 = vsel %vm3538_vm12, %v1322_v2, %v1326_v56  ;;  %v558_v20 = vor.u32 %v557_v9, %v554_v8  ;;  %v571_v22 = vrot.slane %v569_v10, 5  ;;  %v575_v27 = vshll.u32 %v3572_v5, 16 }
  0x4c   : > { %2925 = vmatprep.mubr.bf16.mxu1 %v2623_v13  ;;  %v1341_v30 = vsel %vm3538_vm12, %v1336_v15, %v1340_v63  ;;  %v1343_v34 = vshrl.u32 %v1302_v11, 16  ;;  %v320_v38 = vpack.c.bf16 %v312_v39, %v312_v39  ;;  %v313_v41 = vsel %vm305_vm14, %v3472_v60, %v297_v44  ;;  %v3595_v60 = vld [vmem:[#allocation2 + $0x20] sm:$0xf] }
  0x4d   : > { %v2679_v42 = vcombine.low %v1327_v14, %v1341_v30  ;;  %v559_v17 = vrot.slane %v558_v20, 4  ;;  %v572_v43 = vor.u32 %v571_v22, %v568_v21  ;;  %v577_v45 = vrot.slane %v575_v27, 5  ;;  %v3234_v21 = vld [vmem:[%s4030_s2 + $0x10] sm:$0xff]   ;;  %v3615_v30 = vld [vmem:[#allocation2 + $0x24] sm:$0x1] }
  0x4e   : > { %v1345_v46 = vrot.slane %v1343_v34, 4  ;;  %v1346_v47 = vshll.u32 %v1302_v11, 16  ;;  %v1352_v48 = vshll.u32 %v3581_v18, 16  ;;  %v1357_v49 = vshrl.u32 %v1304_v28, 16 }
  0x4f   : > { %3021 = vmatprep.mubr.bf16.mxu0 %v2679_v42  ;;  %v564_v51 = vsel %vm3538_vm12, %v559_v17, %v563_v16  ;;  %v573_v52 = vrot.slane %v572_v43, 4  ;;  %v1360_v55 = vshll.u32 %v1304_v28, 16  ;;  %v1366_v39 = vshll.u32 %v3586_v31, 16  ;;  %v3233_v42 = vld [vmem:[%s4030_s2 + $0x148] sm:$0xff]  }
  0x50   : > { %v1348_v56 = vrot.slane %v1346_v47, 5  ;;  %v1359_v57 = vrot.slane %v1357_v49, 4  ;;  %v321_v44 = vpack.c.bf16 %v313_v41, %v313_v41  ;;  %v1354_v62 = vrot.slane %v1352_v48, 5  ;;  %v917_v49 = vld [vmem:[#allocation2] sm:$0xe] }
  0x51   : > { %v578_v58 = vsel %vm3538_vm12, %v573_v52, %v577_v45  ;;  %v1362_v63 = vrot.slane %v1360_v55, 5  ;;  %v2605_v1 = vadd.f32 -1.0, %v3311_v19  ;;  %v353_v6 = vshrl.u32 %v320_v38, 16 }
  0x52   : > { %v2624_v2 = vcombine.low %v564_v51, %v578_v58  ;;  %v1349_v3 = vor.u32 %v1348_v56, %v1345_v46  ;;  %v356_v59 = vshll.u32 %v320_v38, 16  ;;  %v1368_v8 = vrot.slane %v1366_v39, 5  ;;  %v3236_v51 = vld [vmem:[%s4030_s2 + $0x18] sm:$0xff]   ;;  %v918_v56 = vld [vmem:[#allocation2 + $0x8] sm:$0xe] }
  0x53   : > { %v1363_v7 = vor.u32 %v1362_v63, %v1359_v57  ;;  %v580_v9 = vshrl.u32 %v3595_v60, 16  ;;  %v2606_v10 = vadd.f32 -1.0, %v3313_v29  ;;  %v355_v13 = vrot.slane %v353_v6, 7  ;;  %v3237_v6 = vld [vmem:[%s4030_s2 + $0x158] sm:$0xff]  }
  0x54   : > { %2926 = vmatmul.mubr.bf16.vlgmr.msra.gmra.mrb[0].mxu1 %v2624_v2  ;;  %v1350_v11 = vrot.slane %v1349_v3, 4  ;;  %v360_v14 = vshrl.u32 %v321_v44, 16  ;;  %v363_v15 = vshll.u32 %v321_v44, 16  ;;  %v583_v19 = vshll.u32 %v3595_v60, 16 }
  0x55   : > { %2934 = vmatpush3.bf16.msra.mxu1 %v3441_v36  ;;  %v1364_v16 = vrot.slane %v1363_v7, 4  ;;  %v358_v22 = vor.u32 %v356_v59, %v355_v13  ;;  %v298_v28 = vmul.f32 0.075, %v2605_v1  ;;  %v946_v36 = vrot.slane %v3464_v54, 5  ;;  %v3238_v59 = vld [vmem:[%s4030_s2 + $0x20] sm:$0xff]  }
  0x56   : > { %v1355_v20 = vsel %vm3538_vm12, %v1350_v11, %v1354_v62  ;;  %2935 = vmatprep.subr.bf16.mxu1 %v3232_v0  ;;  %v362_v27 = vrot.slane %v360_v14, 7  ;;  %v582_v34 = vrot.slane %v580_v9, 4  ;;  %v299_v38 = vmul.f32 0.075, %v2606_v10  ;;  %v3235_v62 = vld [vmem:[%s4030_s2 + $0x150] sm:$0xff]  }
  0x57   : > { %v1369_v29 = vsel %vm3538_vm12, %v1364_v16, %v1368_v8  ;;  %v395_v17 = vsel %vm3492_vm8, 0, %v358_v22  ;;  %v314_v54 = vsel %vm306_vm2, %v3488_v24, %v298_v28  ;;  %v585_v46 = vrot.slane %v583_v19, 5 }
  0x58   : > { %v2680_v41 = vcombine.low %v1355_v20, %v1369_v29  ;;  %v365_v43 = vor.u32 %v363_v15, %v362_v27  ;;  %v406_v45 = vsel %vm3501_vm9, %v395_v17, 0  ;;  %v322_v47 = vpack.c.bf16 %v314_v54, %v314_v54  ;;  %v3239_v20 = vld [vmem:[%s4030_s2 + $0x160] sm:$0xff]   ;;  %v3242_v54 = vld [vmem:[%s4030_s2 + $0x30] sm:$0xff]  }
  0x59   : > { %2936 = vmatpush3.bf16.msra.mxu1 %v3232_v0  ;;  %v315_v48 = vsel %vm307_vm3, %v3497_v32, %v299_v38  ;;  %v2615_v52 = vcombine.low %v406_v45, %v406_v45  ;;  %v2616_v55 = vcombine.high %v406_v45, %v406_v45  ;;  %v589_v57 = vshll.u32 %v3615_v30, 16 }
  0x5a   : > { %3022 = vmatmul.mubr.bf16.vlgmr.msra.gmra.mrb[0].mxu0 %v2680_v41  ;;  %2937 = vmatprep.subr.bf16.mxu1 %v3234_v21  ;;  %v396_v24 = vsel %vm3492_vm8, 0, %v365_v43  ;;  %v323_v39 = vpack.c.bf16 %v315_v48, %v315_v48  ;;  %v367_v44 = vshrl.u32 %v322_v47, 16  ;;  %v370_v58 = vshll.u32 %v322_v47, 16 }
  0x5b   : > { %3030 = vmatpush3.bf16.msra.mxu0 %v3452_v40  ;;  %v407_v32 = vsel %vm3501_vm9, %v396_v24, 0  ;;  %475 = vst [vmem:[#allocation2 + $0x28] sm:$0xf] %v2615_v52  ;;  %476 = vst [vmem:[#allocation2 + $0x2c] sm:$0x1] %v2616_v55  ;;  %v950_v2 = vrot.slane %v3545_v26, 5  ;;  %v586_v40 = vor.u32 %v585_v46, %v582_v34 }
  0x5c   : > { %3031 = vmatprep.subr.bf16.mxu0 %v3233_v42  ;;  %v2617_v63 = vcombine.low %v407_v32, %v407_v32  ;;  %v2618_v0 = vcombine.high %v407_v32, %v407_v32  ;;  %v374_v1 = vshrl.u32 %v323_v39, 16  ;;  %v369_v3 = vrot.slane %v367_v44, 7 }
  0x5d   : > { %2938 = vmatpush3.bf16.msra.mxu1 %v3234_v21  ;;  %v377_v8 = vshll.u32 %v323_v39, 16  ;;  %v2647_v9 = vrot.slane %v917_v49, 9  ;;  %v3649_v10 = vrot.slane %v589_v57, 5  ;;  %v2648_v13 = vrot.slane %v918_v56, 9  ;;  %v3240_v21 = vld [vmem:[%s4030_s2 + $0x28] sm:$0xff]  }
  0x5e   : > { %2939 = vmatprep.subr.bf16.mxu1 %v3236_v51  ;;  %477 = vst [vmem:[#allocation2 + $0x30] sm:$0xf] %v2617_v63  ;;  %478 = vst [vmem:[#allocation2 + $0x34] sm:$0x1] %v2618_v0  ;;  %v376_v7 = vrot.slane %v374_v1, 7  ;;  %v372_v26 = vor.u32 %v370_v58, %v369_v3  ;;  %v3657_v14 = vrot.slane %v586_v40, 4 }
  0x5f   : > { %3032 = vmatpush3.bf16.msra.mxu0 %v3233_v42  ;;  %v3663_v16 = vsel %vm3653_vm4, %v2647_v9, %v946_v36  ;;  %v3667_v19 = vsel %vm3653_vm4, %v2648_v13, %v950_v2  ;;  %v3241_v0 = vld [vmem:[%s4030_s2 + $0x168] sm:$0xff]  }
  0x60   : > { %3033 = vmatprep.subr.bf16.mxu0 %v3235_v62  ;;  %v397_v15 = vsel %vm3492_vm8, 0, %v372_v26  ;;  %v379_v27 = vor.u32 %v377_v8, %v376_v7  ;;  %v2655_v28 = vcombine.low %v3663_v16, %v3667_v19  ;;  %v592_v47 = vsel %vm3538_vm12, %v3657_v14, %v3649_v10  ;;  %v3244_v8 = vld [vmem:[%s4030_s2 + $0x38] sm:$0xff]   ;;  %v3257_v16 = vld [vmem:[%s4030_s2 + $0x1a0] sm:$0xff]   ;;  %v3261_v19 = vld [vmem:[%s4030_s2 + $0xb0] sm:$0xff]  }
  0x61   : > { %2940 = vmatpush3.bf16.msra.mxu1 %v3236_v51  ;;  %v408_v22 = vsel %vm3501_vm9, %v397_v15, 0 }
  0x62   : > { %2941 = vmatprep.subr.bf16.mxu1 %v3238_v59  ;;  %v3679_v36 = vld [vmem:[#allocation2 + $0x28] sm:$0xf]  ;;  %v3681_v29 = vld [vmem:[#allocation2 + $0x2c] sm:$0x1]  ;;  %v2619_v38 = vcombine.low %v408_v22, %v408_v22  ;;  %v2620_v41 = vcombine.high %v408_v22, %v408_v22  ;;  %v398_v57 = vsel %vm3492_vm8, 0, %v379_v27 }
  0x63   : > { %3034 = vmatpush3.bf16.msra.mxu0 %v3235_v62  ;;  %v1306_v34 = vld [vmem:[#allocation2 + $0x28] sm:$0xf]  ;;  %v594_v42 = vshrl.u32 %v3679_v36, 16  ;;  %v597_v17 = vshll.u32 %v3679_v36, 16  ;;  %v603_v43 = vshll.u32 %v3681_v29, 16  ;;  %v409_v27 = vsel %vm3501_vm9, %v398_v57, 0 }
  0x64   : > { %3035 = vmatprep.subr.bf16.mxu0 %v3237_v6  ;;  %v3689_v45 = vld [vmem:[#allocation2 + $0x2c] sm:$0x1]  ;;  %v1371_v46 = vshrl.u32 %v1306_v34, 16  ;;  %v1374_v51 = vshll.u32 %v1306_v34, 16  ;;  %479 = vst [vmem:[#allocation2 + $0x38] sm:$0xf] %v2619_v38 }
  0x65   : > { %2942 = vmatpush3.bf16.msra.mxu1 %v3238_v59  ;;  %v1308_v48 = vld [vmem:[#allocation2 + $0x30] sm:$0xf]  ;;  %v3695_v49 = vld [vmem:[#allocation2 + $0x34] sm:$0x1]  ;;  %v1380_v52 = vshll.u32 %v3689_v45, 16  ;;  %v596_v55 = vrot.slane %v594_v42, 4 }
  0x66   : > { %480 = vst [vmem:[#allocation2 + $0x3c] sm:$0x1] %v2620_v41  ;;  %2943 = vmatprep.subr.bf16.mxu1 %v3240_v21  ;;  %v599_v24 = vrot.slane %v597_v17, 5  ;;  %v1373_v39 = vrot.slane %v1371_v46, 4  ;;  %v3698_v56 = vld [vmem:[#allocation2 + $0x30] sm:$0xf]  ;;  %v2622_v17 = vcombine.high %v409_v27, %v409_v27 }
  0x67   : > { %3036 = vmatpush3.bf16.msra.mxu0 %v3237_v6  ;;  %v605_v32 = vrot.slane %v603_v43, 5  ;;  %v1376_v44 = vrot.slane %v1374_v51, 5  ;;  %v1385_v58 = vshrl.u32 %v1308_v48, 16  ;;  %v1388_v62 = vshll.u32 %v1308_v48, 16  ;;  %v3702_v63 = vld [vmem:[#allocation2 + $0x34] sm:$0x1] }
  0x68   : > { %3037 = vmatprep.subr.bf16.mxu0 %v3239_v20  ;;  %v600_v1 = vor.u32 %v599_v24, %v596_v55  ;;  %v1394_v2 = vshll.u32 %v3695_v49, 16  ;;  %v608_v40 = vshrl.u32 %v3698_v56, 16  ;;  %v611_v23 = vshll.u32 %v3698_v56, 16  ;;  %482 = vst [vmem:[#allocation2 + $0x44] sm:$0x1] %v2622_v17 }
  0x69   : > { %2944 = vmatpush3.bf16.msra.mxu1 %v3240_v21  ;;  %v1377_v3 = vor.u32 %v1376_v44, %v1373_v39  ;;  %v1382_v6 = vrot.slane %v1380_v52, 5  ;;  %v1387_v59 = vrot.slane %v1385_v58, 4  ;;  %v1390_v7 = vrot.slane %v1388_v62, 5  ;;  %v3243_v21 = vld [vmem:[%s4030_s2 + $0x170] sm:$0xff]   ;;  %v3733_v39 = vld [vmem:[%s4030_s2 + $0x80] sm:$0xff]   ;;  %v3245_v62 = vld [vmem:[%s4030_s2 + $0x178] sm:$0xff]  }
  0x6a   : > { %v601_v9 = vrot.slane %v600_v1, 4  ;;  %2945 = vmatprep.subr.bf16.mxu1 %v3242_v54  ;;  %v610_v10 = vrot.slane %v608_v40, 4  ;;  %v613_v26 = vrot.slane %v611_v23, 5  ;;  %v617_v13 = vshll.u32 %v3702_v63, 16 }
  0x6b   : > { %3038 = vmatpush3.bf16.msra.mxu0 %v3239_v20  ;;  %v1378_v14 = vrot.slane %v1377_v3, 4  ;;  %v1391_v15 = vor.u32 %v1390_v7, %v1387_v59  ;;  %v1396_v22 = vrot.slane %v1394_v2, 5  ;;  %v3721_v38 = vld [vmem:[#allocation2 + $0x38] sm:$0xf]  ;;  %v2621_v20 = vcombine.low %v409_v27, %v409_v27 }
  0x6c   : > { %3039 = vmatprep.subr.bf16.mxu0 %v3241_v0  ;;  %v606_v34 = vsel %vm3538_vm12, %v601_v9, %v605_v32  ;;  %v614_v42 = vor.u32 %v613_v26, %v610_v10  ;;  %v1310_v43 = vld [vmem:[#allocation2 + $0x38] sm:$0xf]  ;;  %v622_v33 = vshrl.u32 %v3721_v38, 16  ;;  %v625_v52 = vshll.u32 %v3721_v38, 16  ;;  %v1579_v10 = vld [vmem:[#allocation2 + $0x8] sm:$0xe] }
  0x6d   : > { %v3723_v41 = vld [vmem:[#allocation2 + $0x3c] sm:$0x1]  ;;  %v2625_v46 = vcombine.low %v592_v47, %v606_v34  ;;  %v1383_v48 = vsel %vm3538_vm12, %v1378_v14, %v1382_v6  ;;  %v1392_v51 = vrot.slane %v1391_v15, 4  ;;  %2946 = vmatpush3.bf16.msra.mxu1 %v3242_v54  ;;  %481 = vst [vmem:[#allocation2 + $0x40] sm:$0xf] %v2621_v20  ;;  %v1399_v24 = vshrl.u32 %v1310_v43, 16 }
  0x6e   : > { %v631_v55 = vshll.u32 %v3723_v41, 16  ;;  %2947 = vmatprep.subr.bf16.mxu1 %v3244_v8  ;;  %v919_v47 = vld [vmem:[#allocation2 + $0x10] sm:$0xe]  ;;  %v619_v54 = vrot.slane %v617_v13, 5  ;;  %v624_v32 = vrot.slane %v622_v33, 4  ;;  %v1402_v58 = vshll.u32 %v1310_v43, 16 }
  0x6f   : > { %3040 = vmatpush3.bf16.msra.mxu0 %v3241_v0  ;;  %2929 = vmatprep.mubr.bf16.mxu1 %v2625_v46  ;;  %v1397_v57 = vsel %vm3538_vm12, %v1392_v51, %v1396_v22  ;;  %v3737_v44 = vld [vmem:[#allocation2 + $0x3c] sm:$0x1]  ;;  %v615_v2 = vrot.slane %v614_v42, 4  ;;  %v627_v40 = vrot.slane %v625_v52, 5  ;;  %v954_v23 = vrot.slane %v3563_v53, 5  ;;  %v3747_v26 = vld [vmem:[%s4030_s2 + $0x180] sm:$0xff]  }
  0x70   : > { %v2681_v1 = vcombine.low %v1383_v48, %v1397_v57  ;;  %3041 = vmatprep.subr.bf16.mxu0 %v3243_v21  ;;  %v1401_v0 = vrot.slane %v1399_v24, 4  ;;  %v1404_v3 = vrot.slane %v1402_v58, 5  ;;  %v920_v6 = vld [vmem:[#allocation2 + $0x18] sm:$0xe]  ;;  %v2649_v59 = vrot.slane %v919_v47, 9 }
  0x71   : > { %2948 = vmatpush3.bf16.msra.mxu1 %v3244_v8  ;;  %v628_v7 = vor.u32 %v627_v40, %v624_v32  ;;  %v633_v9 = vrot.slane %v631_v55, 5  ;;  %v958_v13 = vrot.slane %v3572_v5, 5  ;;  %v1408_v53 = vshll.u32 %v3737_v44, 16  ;;  %v1580_v14 = vld [vmem:[#allocation2 + $0x10] sm:$0xe] }
  0x72   : > { %3025 = vmatprep.mubr.bf16.mxu0 %v2681_v1  ;;  %2957 = vmatprep.subr.bf16.mxu1 %v3733_v39  ;;  %v620_v8 = vsel %vm3538_vm12, %v615_v2, %v619_v54  ;;  %v1405_v22 = vor.u32 %v1404_v3, %v1401_v0  ;;  %v2650_v27 = vrot.slane %v920_v6, 9  ;;  %v1605_v34 = vrot.slane %v3550_v12, 5  ;;  %v3755_v17 = vld [vmem:[#allocation2 + $0x44] sm:$0x1]  ;;  %v1582_v1 = vld [vmem:[#allocation2 + $0x20] sm:$0xe] }
  0x73   : > { %3042 = vmatpush3.bf16.msra.mxu0 %v3243_v21  ;;  %v629_v15 = vrot.slane %v628_v7, 4  ;;  %v1609_v42 = vrot.slane %v3557_v35, 5  ;;  %v2635_v5 = vcombine.low %v3459_v50, %v3543_v25  ;;  %v3761_v21 = vsel %vm3653_vm4, %v2649_v59, %v954_v23 }
  0x74   : > { %3043 = vmatprep.subr.bf16.mxu0 %v3245_v62  ;;  %v1312_v20 = vld [vmem:[#allocation2 + $0x40] sm:$0xf]  ;;  %v1422_v51 = vshll.u32 %v3755_v17, 16  ;;  %v1410_v33 = vrot.slane %v1408_v53, 5  ;;  %v2691_v35 = vrot.slane %v1579_v10, 9  ;;  %v2692_v52 = vrot.slane %v1580_v14, 9 }
  0x75   : > { %v634_v43 = vsel %vm3538_vm12, %v629_v15, %v633_v9  ;;  %v1413_v46 = vshrl.u32 %v1312_v20, 16  ;;  %v1416_v48 = vshll.u32 %v1312_v20, 16  ;;  %v1406_v55 = vrot.slane %v1405_v22, 4  ;;  %v1583_v10 = vld [vmem:[#allocation2 + $0x28] sm:$0xe] }
  0x76   : > { %v2626_v12 = vcombine.low %v620_v8, %v634_v43  ;;  %v3769_v50 = vsel %vm3653_vm4, %v2650_v27, %v958_v13  ;;  %v1424_v54 = vrot.slane %v1422_v51, 5  ;;  %v1606_v32 = vsel %vm3653_vm4, %v2691_v35, %v1605_v34  ;;  %v1584_v13 = vld [vmem:[#allocation2 + $0x30] sm:$0xe]  ;;  %v3250_v14 = vld [vmem:[%s4030_s2 + $0x88] sm:$0xff]  }
  0x77   : > { %3044 = vmatpush3.bf16.msra.mxu0 %v3245_v62  ;;  %v1415_v24 = vrot.slane %v1413_v46, 4  ;;  %v1418_v47 = vrot.slane %v1416_v48, 5  ;;  %v2656_v25 = vcombine.low %v3761_v21, %v3769_v50  ;;  %v1610_v58 = vsel %vm3653_vm4, %v2692_v52, %v1609_v42  ;;  %v1581_v62 = vld [vmem:[#allocation2 + $0x18] sm:$0xe]  ;;  %v922_v52 = vld [vmem:[#allocation2 + $0x28] sm:$0xe] }
  0x78   : > { %3053 = vmatprep.subr.bf16.mxu0 %v3747_v26  ;;  %2930 = vmatmul.mubr.bf16.gmra.mrb[4].mxu1 %v2626_v12  ;;  %v1411_v2 = vsel %vm3538_vm12, %v1406_v55, %v1410_v33  ;;  %v1613_v23 = vrot.slane %v3581_v18, 5  ;;  %v1617_v0 = vrot.slane %v3586_v31, 5  ;;  %v2636_v3 = vcombine.low %v3560_v37, %v3568_v61  ;;  %v3254_v48 = vld [vmem:[%s4030_s2 + $0x98] sm:$0xff]   ;;  %v3258_v33 = vld [vmem:[%s4030_s2 + $0xa8] sm:$0xff]   ;;  %v3272_v21 = vld [vmem:[%s4030_s2 + $0xd0] sm:$0xff]  }
  0x79   : > { %v1419_v57 = vor.u32 %v1418_v47, %v1415_v24  ;;  %2949 = vmatprep.mubr.bf16.mxu1 %v2635_v5  ;;  %v2699_v59 = vcombine.low %v1606_v32, %v1610_v58  ;;  %v2693_v7 = vrot.slane %v1581_v62, 9  ;;  %v2694_v9 = vrot.slane %v1582_v1, 9  ;;  %v3255_v12 = vld [vmem:[%s4030_s2 + $0x198] sm:$0xff]   ;;  %v3259_v55 = vld [vmem:[%s4030_s2 + $0x1a8] sm:$0xff]   ;;  %v923_v58 = vld [vmem:[#allocation2 + $0x30] sm:$0xe] }
  0x7a   : > { %v2637_v18 = vcombine.low %v3595_v60, %v3679_v36  ;;  %v2695_v31 = vrot.slane %v1583_v10, 9  ;;  %v1621_v37 = vrot.slane %v3689_v45, 5  ;;  %v2696_v61 = vrot.slane %v1584_v13, 9  ;;  %v3252_v60 = vld [vmem:[%s4030_s2 + $0x90] sm:$0xff]   ;;  %v1585_v36 = vld [vmem:[#allocation2 + $0x38] sm:$0xe] }
  0x7b   : > { %v1420_v40 = vrot.slane %v1419_v57, 4  ;;  %v1625_v8 = vrot.slane %v3695_v49, 5  ;;  %v1614_v15 = vsel %vm3653_vm4, %v2693_v7, %v1613_v23  ;;  %v1618_v22 = vsel %vm3653_vm4, %v2694_v9, %v1617_v0  ;;  %v1586_v45 = vld [vmem:[#allocation2 + $0x40] sm:$0xe]  ;;  %v3251_v49 = vld [vmem:[%s4030_s2 + $0x188] sm:$0xff]   ;;  %v3264_v24 = vld [vmem:[%s4030_s2 + $0xb8] sm:$0xff]  }
  0x7c   : > { %v2700_v27 = vcombine.low %v1614_v15, %v1618_v22  ;;  %v2638_v42 = vcombine.low %v3698_v56, %v3721_v38  ;;  %v2697_v20 = vrot.slane %v1585_v36, 9  ;;  %v1629_v5 = vrot.slane %v3737_v44, 5  ;;  %v3253_v44 = vld [vmem:[%s4030_s2 + $0x190] sm:$0xff]   ;;  %v924_v62 = vld [vmem:[#allocation2 + $0x38] sm:$0xe]  ;;  %v3266_v23 = vld [vmem:[%s4030_s2 + $0xc0] sm:$0xff]  }
  0x7d   : > { %v1425_v6 = vsel %vm3538_vm12, %v1420_v40, %v1424_v54  ;;  %v1626_v34 = vsel %vm3653_vm4, %v2696_v61, %v1625_v8  ;;  %v2698_v43 = vrot.slane %v1586_v45, 9  ;;  %v1633_v46 = vrot.slane %v3755_v17, 5  ;;  %v3256_v17 = vld [vmem:[%s4030_s2 + $0xa0] sm:$0xff]   ;;  %v3267_v35 = vld [vmem:[#allocation2 + $0x10] ss:$8 sps:$4 sm:$0xff]  }
  0x7e   : > { %v2682_v53 = vcombine.low %v1411_v2, %v1425_v6  ;;  %v1630_v56 = vsel %vm3653_vm4, %v2697_v20, %v1629_v5  ;;  %v962_v57 = vrot.slane %v3615_v30, 5  ;;  %v2652_v54 = vrot.slane %v922_v52, 9  ;;  %v1958_v1 = vld [vmem:[#allocation2 + $0x10] sm:$0xf]  ;;  %v1960_v2 = vld [vmem:[#allocation2 + $0x18] sm:$0xf] }
  0x7f   : > { %v1634_v38 = vsel %vm3653_vm4, %v2698_v43, %v1633_v46  ;;  %v966_v32 = vrot.slane %v3681_v29, 5  ;;  %v3262_v40 = vld [vmem:[%s4030_s2 + $0x1b0] sm:$0xff]   ;;  %v2653_v29 = vrot.slane %v923_v58, 9  ;;  %v2654_v6 = vrot.slane %v924_v62, 9  ;;  %v3875_v22 = vld [vmem:[#allocation2 + $0x1c] sm:$0x1] }
  0x80   : > { %3026 = vmatmul.mubr.bf16.gmra.mrb[4].mxu0 %v2682_v53  ;;  %2950 = vmatmul.mubr.bf16.vlgmr.msra.gmra.mrb[0].mxu1 %v2636_v3  ;;  %v970_v3 = vrot.slane %v3702_v63, 5  ;;  %v1975_v7 = vshrl.u32 %v1958_v1, 16  ;;  %v1978_v9 = vshll.u32 %v1958_v1, 16  ;;  %v1989_v10 = vshrl.u32 %v1960_v2, 16  ;;  %v3265_v53 = vld [vmem:[%s4030_s2 + $0x1b8] sm:$0xff]  }
  0x81   : > { %3045 = vmatprep.mubr.bf16.mxu0 %v2699_v59  ;;  %2958 = vmatpush3.bf16.msra.mxu1 %v3733_v39  ;;  %v1622_v39 = vsel %vm3653_vm4, %v2695_v31, %v1621_v37  ;;  %v967_v0 = vsel %vm3653_vm4, %v2652_v54, %v966_v32  ;;  %v974_v59 = vrot.slane %v3723_v41, 5  ;;  %v1992_v13 = vshll.u32 %v1960_v2, 16  ;;  %v3873_v15 = vld [vmem:[#allocation2 + $0x14] sm:$0x1]  ;;  %v3286_v20 = vld [vmem:[#allocation2 + $0x8] ss:$8 sps:$4 sm:$0xff]  }
  0x82   : > { %2959 = vmatprep.subr.bf16.mxu1 %v3250_v14  ;;  %2953 = vmatprep.mubr.bf16.mxu1 %v2637_v18  ;;  %v2701_v51 = vcombine.low %v1622_v39, %v1626_v34  ;;  %v971_v41 = vsel %vm3653_vm4, %v2653_v29, %v970_v3  ;;  %v1977_v31 = vrot.slane %v1975_v7, 4  ;;  %v1980_v37 = vrot.slane %v1978_v9, 5  ;;  %v3271_v39 = vld [vmem:[%s4030_s2 + $0x1c8] sm:$0xff]   ;;  %v3274_v34 = vld [vmem:[%s4030_s2 + $0xd8] sm:$0xff]   ;;  %v1966_v52 = vld [vmem:[#allocation2 + $0x30] sm:$0xf] }
  0x83   : > { %v975_v18 = vsel %vm3653_vm4, %v2654_v6, %v974_v59  ;;  %v1991_v61 = vrot.slane %v1989_v10, 4  ;;  %v1994_v8 = vrot.slane %v1992_v13, 5  ;;  %v1984_v45 = vshll.u32 %v3873_v15, 16  ;;  %v3281_v54 = vld [vmem:[%s4030_s2 + $0xf0] sm:$0xff]   ;;  %v3284_v3 = vld [vmem:[%s4030_s2 + $0xf8] sm:$0xff]  }
  0x84   : > { %v2658_v50 = vcombine.low %v971_v41, %v975_v18  ;;  %v1981_v36 = vor.u32 %v1980_v37, %v1977_v31  ;;  %v2031_v32 = vshrl.u32 %v1966_v52, 16  ;;  %v2034_v58 = vshll.u32 %v1966_v52, 16  ;;  %v3921_v6 = vld [vmem:[#allocation2 + $0x2c] sm:$0x1]  ;;  %v1970_v59 = vld [vmem:[#allocation2 + $0x40] sm:$0xf] }
  0x85   : > { %2960 = vmatpush3.bf16.msra.mxu1 %v3250_v14  ;;  %v3270_v14 = vld [vmem:[%s4030_s2 + $0xc8] sm:$0xff]   ;;  %v1986_v43 = vrot.slane %v1984_v45, 5  ;;  %v3924_v41 = vld [vmem:[#allocation2 + $0x34] sm:$0x1]  ;;  %v3926_v18 = vld [vmem:[#allocation2 + $0x3c] sm:$0x1] }
  0x86   : > { %2961 = vmatprep.subr.bf16.mxu1 %v3252_v60  ;;  %v1982_v5 = vrot.slane %v1981_v36, 4  ;;  %v2033_v7 = vrot.slane %v2031_v32, 4  ;;  %v2036_v9 = vrot.slane %v2034_v58, 5  ;;  %v2026_v37 = vshll.u32 %v3921_v6, 16  ;;  %v3290_v52 = vld [vmem:[#allocation2 + $0x28] ss:$8 sps:$4 sm:$0xff]  }
  0x87   : > { %v2040_v45 = vshll.u32 %v3924_v41, 16 }
  0x88   : > { %3046 = vmatmul.mubr.bf16.vlgmr.msra.gmra.mrb[0].mxu0 %v2700_v27  ;;  %2954 = vmatmul.mubr.bf16.gmra.mrb[4].mxu1 %v2638_v42  ;;  %v1995_v27 = vor.u32 %v1994_v8, %v1991_v61  ;;  %v3280_v42 = vld [vmem:[#allocation2 + $0x30] ss:$8 sps:$4 sm:$0xff]   ;;  %v2059_v61 = vshrl.u32 %v1970_v59, 16  ;;  %v2062_v8 = vshll.u32 %v1970_v59, 16  ;;  %v2037_v36 = vor.u32 %v2036_v9, %v2033_v7 }
  0x89   : > { %3054 = vmatpush3.bf16.msra.mxu0 %v3747_v26  ;;  %2962 = vmatpush3.bf16.msra.mxu1 %v3252_v60  ;;  %v2702_v26 = vcombine.low %v1630_v56, %v1634_v38  ;;  %v3268_v60 = vld [vmem:[%s4030_s2 + $0x1c0] sm:$0xff]  }
  0x8a   : > { %3055 = vmatprep.subr.bf16.mxu0 %v3251_v49  ;;  %2963 = vmatprep.subr.bf16.mxu1 %v3254_v48  ;;  %v1996_v46 = vrot.slane %v1995_v27, 4  ;;  %v3276_v56 = vld [vmem:[%s4030_s2 + $0xe0] sm:$0xff]  }
  0x8b   : > { %3049 = vmatprep.mubr.bf16.mxu0 %v2701_v51  ;;  %2973 = vmatprep.mubr.bf16.mxu1 %v2655_v28  ;;  %v921_v28 = vld [vmem:[#allocation2 + $0x20] sm:$0xe]  ;;  %v3273_v51 = vld [vmem:[%s4030_s2 + $0x1d0] sm:$0xff]  }
  0x8c   : > { %v2651_v47 = vrot.slane %v921_v28, 9  ;;  %v3282_v38 = vld [vmem:[#allocation2 + $0x40] ss:$8 sps:$4 sm:$0xff]  }
  0x8d   : > { %3056 = vmatpush3.bf16.msra.mxu0 %v3251_v49  ;;  %2964 = vmatpush3.bf16.msra.mxu1 %v3254_v48  ;;  %v1998_v49 = vshll.u32 %v3875_v22, 16  ;;  %v3291_v59 = vld [vmem:[#allocation2 + $0x38] ss:$8 sps:$4 sm:$0xff]  }
  0x8e   : > { %3057 = vmatprep.subr.bf16.mxu0 %v3253_v44  ;;  %2965 = vmatprep.subr.bf16.mxu1 %v3256_v17  ;;  %v963_v30 = vsel %vm3653_vm4, %v2651_v47, %v962_v57  ;;  %v3277_v57 = vld [vmem:[%s4030_s2 + $0x1e0] sm:$0xff]  }
  0x8f   : > { %v2657_v63 = vcombine.low %v963_v30, %v967_v0  ;;  %v2000_v48 = vrot.slane %v1998_v49, 5  ;;  %v3916_v30 = vld [vmem:[#allocation2 + $0x24] sm:$0x1]  ;;  %v2054_v49 = vshll.u32 %v3926_v18, 16 }
  0x90   : > { %3050 = vmatmul.mubr.bf16.gmra.mrb[4].mxu0 %v2702_v26  ;;  %v1962_v26 = vld [vmem:[#allocation2 + $0x20] sm:$0xf] }
  0x91   : > { %3058 = vmatpush3.bf16.msra.mxu0 %v3253_v44  ;;  %2966 = vmatpush3.bf16.msra.mxu1 %v3256_v17  ;;  %v1987_v44 = vsel %vm3538_vm12, %v1982_v5, %v1986_v43  ;;  %v2001_v17 = vsel %vm3538_vm12, %v1996_v46, %v2000_v48  ;;  %v2006_v28 = vshll.u32 %v1962_v26, 16  ;;  %v2028_v43 = vrot.slane %v2026_v37, 5  ;;  %v3945_v46 = vld [vmem:[%s4030_s2 + $0x208] sm:$0xff]   ;;  %v3947_v48 = vld [vmem:[#allocation2 + $0x44] sm:$0x1] }
  0x92   : > { %3059 = vmatprep.subr.bf16.mxu0 %v3255_v12  ;;  %2967 = vmatprep.subr.bf16.mxu1 %v3258_v33  ;;  %v2269_v37 = vrot.slane %v3875_v22, 5 }
  0x93   : > { %3069 = vmatprep.mubr.bf16.mxu0 %v3267_v35  ;;  %v3278_v35 = vld [vmem:[%s4030_s2 + $0xe8] sm:$0xff]  }
  0x95   : > { %3060 = vmatpush3.bf16.msra.mxu0 %v3255_v12  ;;  %2968 = vmatpush3.bf16.msra.mxu1 %v3258_v33  ;;  %v1964_v12 = vld [vmem:[#allocation2 + $0x28] sm:$0xf]  ;;  %v3275_v33 = vld [vmem:[%s4030_s2 + $0x1d8] sm:$0xff]  }
  0x96   : > { %3061 = vmatprep.subr.bf16.mxu0 %v3257_v16  ;;  %2969 = vmatprep.subr.bf16.mxu1 %v3261_v19  ;;  %v2020_v47 = vshll.u32 %v1964_v12, 16 }
  0x98   : > { %v2022_v0 = vrot.slane %v2020_v47, 5  ;;  %v2281_v47 = vrot.slane %v3924_v41, 5 }
  0x99   : > { %3062 = vmatpush3.bf16.msra.mxu0 %v3257_v16  ;;  %2970 = vmatpush3.bf16.msra.mxu1 %v3261_v19  ;;  %v2723_v16 = vcombine.low %v1987_v44, %v2001_v17  ;;  %v2003_v19 = vshrl.u32 %v1962_v26, 16  ;;  %v2243_v17 = vld [vmem:[#allocation2 + $0x30] sm:$0xe]  ;;  %v2244_v26 = vld [vmem:[#allocation2 + $0x38] sm:$0xe] }
  0x9a   : > { %3063 = vmatprep.subr.bf16.mxu0 %v3259_v55  ;;  %2971 = vmatprep.subr.bf16.mxu1 %v3264_v24 }
  0x9b   : > { %v2005_v2 = vrot.slane %v2003_v19, 4  ;;  %v3950_v19 = vld [vmem:[#allocation2 + $0x4c] sm:$0x1] }
  0x9d   : > { %3064 = vmatpush3.bf16.msra.mxu0 %v3259_v55  ;;  %2972 = vmatpush3.bf16.msra.mxu1 %v3264_v24  ;;  %v1968_v55 = vld [vmem:[#allocation2 + $0x38] sm:$0xf]  ;;  %v2017_v24 = vshrl.u32 %v1964_v12, 16  ;;  %v2038_v12 = vrot.slane %v2037_v36, 4  ;;  %v3295_v36 = vld [vmem:[%s4030_s2 + $0x228] sm:$0xff]  }
  0x9e   : > { %3065 = vmatprep.subr.bf16.mxu0 %v3262_v40  ;;  %2981 = vmatprep.subr.bf16.mxu1 %v3266_v23  ;;  %v2045_v62 = vshrl.u32 %v1968_v55, 16  ;;  %v2048_v1 = vshll.u32 %v1968_v55, 16  ;;  %v2068_v55 = vshll.u32 %v3947_v48, 16 }
  0x9f   : > { %v2019_v29 = vrot.slane %v2017_v24, 4  ;;  %v2739_v24 = vrot.slane %v2243_v17, 9  ;;  %v2277_v17 = vrot.slane %v3921_v6, 5 }
  0xa0   : > { %2974 = vmatmul.mubr.bf16.vlgmr.msra.gmra.mrb[0].mxu1 %v2656_v25  ;;  %v3269_v25 = vld [vmem:[#allocation2 + $0x20] ss:$8 sps:$4 sm:$0xff]   ;;  %v2047_v10 = vrot.slane %v2045_v62, 4  ;;  %v2050_v13 = vrot.slane %v2048_v1, 5  ;;  %v2082_v1 = vshll.u32 %v3950_v19, 16  ;;  %v2070_v7 = vrot.slane %v2068_v55, 5 }
  0xa1   : > { %3066 = vmatpush3.bf16.msra.mxu0 %v3262_v40  ;;  %2982 = vmatpush3.bf16.msra.mxu1 %v3266_v23  ;;  %v2008_v40 = vrot.slane %v2006_v28, 5  ;;  %v3279_v23 = vld [vmem:[%s4030_s2 + $0x1e8] sm:$0xff]   ;;  %v2023_v31 = vor.u32 %v2022_v0, %v2019_v29  ;;  %v2239_v29 = vld [vmem:[#allocation2 + $0x10] sm:$0xe]  ;;  %v2240_v0 = vld [vmem:[#allocation2 + $0x18] sm:$0xe]  ;;  %v2282_v9 = vsel %vm3653_vm4, %v2739_v24, %v2281_v47 }
  0xa2   : > { %3067 = vmatprep.subr.bf16.mxu0 %v3265_v53  ;;  %2983 = vmatprep.subr.bf16.mxu1 %v3270_v14  ;;  %v2051_v27 = vor.u32 %v2050_v13, %v2047_v10  ;;  %v2735_v41 = vrot.slane %v2239_v29, 9 }
  0xa3   : > { %2977 = vmatprep.mubr.bf16.mxu1 %v2657_v63  ;;  %v2012_v63 = vshll.u32 %v3916_v30, 16  ;;  %v2024_v5 = vrot.slane %v2023_v31, 4  ;;  %v2736_v31 = vrot.slane %v2240_v0, 9 }
  0xa5   : > { %3068 = vmatpush3.bf16.msra.mxu0 %v3265_v53  ;;  %2984 = vmatpush3.bf16.msra.mxu1 %v3270_v14  ;;  %v1972_v53 = vld [vmem:[#allocation2 + $0x48] sm:$0xf]  ;;  %v2009_v14 = vor.u32 %v2008_v40, %v2005_v2  ;;  %v2029_v32 = vsel %vm3538_vm12, %v2024_v5, %v2028_v43  ;;  %v2270_v22 = vsel %vm3653_vm4, %v2736_v31, %v2269_v37  ;;  %v3297_v5 = vld [vmem:[%s4030_s2 + $0x238] sm:$0xff]   ;;  %v2241_v43 = vld [vmem:[#allocation2 + $0x20] sm:$0xe] }
  0xa6   : > { %3077 = vmatprep.subr.bf16.mxu0 %v3268_v60  ;;  %2985 = vmatprep.subr.bf16.mxu1 %v3272_v21 }
  0xa8   : > { %3070 = vmatmul.mubr.bf16.vlgmr.msra.gmra.mrb[0].mxu0 %v3269_v25  ;;  %2978 = vmatmul.mubr.bf16.gmra.mrb[4].mxu1 %v2658_v50  ;;  %v3283_v50 = vld [vmem:[%s4030_s2 + $0x1f0] sm:$0xff]   ;;  %v3935_v25 = vld [vmem:[%s4030_s2 + $0x200] sm:$0xff]  }
  0xa9   : > { %3078 = vmatpush3.bf16.msra.mxu0 %v3268_v60  ;;  %2986 = vmatpush3.bf16.msra.mxu1 %v3272_v21  ;;  %v2073_v60 = vshrl.u32 %v1972_v53, 16  ;;  %v2076_v21 = vshll.u32 %v1972_v53, 16 }
  0xaa   : > { %3079 = vmatprep.subr.bf16.mxu0 %v3271_v39  ;;  %2987 = vmatprep.subr.bf16.mxu1 %v3274_v34 }
  0xab   : > { %3073 = vmatprep.mubr.bf16.mxu0 %v3280_v42  ;;  %2997 = vmatprep.mubr.bf16.mxu1 %v3286_v20  ;;  %v2014_v42 = vrot.slane %v2012_v63, 5  ;;  %v3285_v20 = vld [vmem:[%s4030_s2 + $0x1f8] sm:$0xff]   ;;  %v2078_v44 = vrot.slane %v2076_v21, 5  ;;  %v2084_v63 = vrot.slane %v2082_v1, 5 }
  0xad   : > { %3080 = vmatpush3.bf16.msra.mxu0 %v3271_v39  ;;  %2988 = vmatpush3.bf16.msra.mxu1 %v3274_v34  ;;  %v3287_v39 = vld [vmem:[#allocation2 + $0x18] ss:$8 sps:$4 sm:$0xff]   ;;  %v2010_v34 = vrot.slane %v2009_v14, 4 }
  0xae   : > { %3081 = vmatprep.subr.bf16.mxu0 %v3273_v51  ;;  %2989 = vmatprep.subr.bf16.mxu1 %v3276_v56 }
  0xaf   : > { %v2015_v28 = vsel %vm3538_vm12, %v2010_v34, %v2014_v42  ;;  %v2293_v34 = vrot.slane %v3950_v19, 5 }
  0xb0   : > { %3074 = vmatmul.mubr.bf16.gmra.mrb[4].mxu0 %v3282_v38  ;;  %v2075_v38 = vrot.slane %v2073_v60, 4 }
  0xb1   : > { %3082 = vmatpush3.bf16.msra.mxu0 %v3273_v51  ;;  %2990 = vmatpush3.bf16.msra.mxu1 %v3276_v56  ;;  %v2061_v51 = vrot.slane %v2059_v61, 4  ;;  %v2064_v56 = vrot.slane %v2062_v8, 5  ;;  %v3293_v61 = vld [vmem:[%s4030_s2 + $0x218] sm:$0xff]  }
  0xb2   : > { %3083 = vmatprep.subr.bf16.mxu0 %v3275_v33  ;;  %2991 = vmatprep.subr.bf16.mxu1 %v3278_v35  ;;  %v2079_v62 = vor.u32 %v2078_v44, %v2075_v38  ;;  %v2737_v38 = vrot.slane %v2241_v43, 9 }
  0xb3   : > { %3093 = vmatprep.mubr.bf16.mxu0 %v2723_v16  ;;  %v2056_v16 = vrot.slane %v2054_v49, 5  ;;  %v2065_v58 = vor.u32 %v2064_v56, %v2061_v51  ;;  %v2246_v49 = vld [vmem:[#allocation2 + $0x48] sm:$0xe]  ;;  %v2273_v56 = vrot.slane %v3916_v30, 5 }
  0xb4   : > { %v2080_v14 = vrot.slane %v2079_v62, 4 }
  0xb5   : > { %3084 = vmatpush3.bf16.msra.mxu0 %v3275_v33  ;;  %2992 = vmatpush3.bf16.msra.mxu1 %v3278_v35  ;;  %v2042_v33 = vrot.slane %v2040_v45, 5  ;;  %v2052_v35 = vrot.slane %v2051_v27, 4  ;;  %v2066_v53 = vrot.slane %v2065_v58, 4  ;;  %v3296_v45 = vld [vmem:[%s4030_s2 + $0x230] sm:$0xff]   ;;  %v2245_v27 = vld [vmem:[#allocation2 + $0x40] sm:$0xe] }
  0xb6   : > { %3085 = vmatprep.subr.bf16.mxu0 %v3277_v57  ;;  %2993 = vmatprep.subr.bf16.mxu1 %v3281_v54  ;;  %v2085_v21 = vsel %vm3538_vm12, %v2080_v14, %v2084_v63  ;;  %v2741_v42 = vrot.slane %v2245_v27, 9 }
  0xb7   : > { %v2043_v2 = vsel %vm3538_vm12, %v2038_v12, %v2042_v33  ;;  %v2057_v40 = vsel %vm3538_vm12, %v2052_v35, %v2056_v16  ;;  %v2071_v60 = vsel %vm3538_vm12, %v2066_v53, %v2070_v7  ;;  %v2274_v12 = vsel %vm3653_vm4, %v2737_v38, %v2273_v56 }
  0xb8   : > { %v2725_v13 = vcombine.low %v2043_v2, %v2057_v40 }
  0xb9   : > { %3086 = vmatpush3.bf16.msra.mxu0 %v3277_v57  ;;  %2994 = vmatpush3.bf16.msra.mxu1 %v3281_v54  ;;  %v2740_v57 = vrot.slane %v2244_v26, 9  ;;  %v2285_v54 = vrot.slane %v3926_v18, 5  ;;  %v2265_v18 = vrot.slane %v3873_v15, 5 }
  0xba   : > { %3087 = vmatprep.subr.bf16.mxu0 %v3279_v23  ;;  %2995 = vmatprep.subr.bf16.mxu1 %v3284_v3 }
  0xbb   : > { %v2286_v10 = vsel %vm3653_vm4, %v2740_v57, %v2285_v54  ;;  %v2266_v15 = vsel %vm3653_vm4, %v2735_v41, %v2265_v18 }
  0xbc   : > { %v2745_v8 = vcombine.low %v2282_v9, %v2286_v10  ;;  %v2743_v4 = vcombine.low %v2266_v15, %v2270_v22 }
  0xbd   : > { %3088 = vmatpush3.bf16.msra.mxu0 %v3279_v23  ;;  %2996 = vmatpush3.bf16.msra.mxu1 %v3284_v3  ;;  %v3292_v23 = vld [vmem:[%s4030_s2 + $0x210] sm:$0xff]   ;;  %v2724_v3 = vcombine.low %v2015_v28, %v2029_v32 }
  0xbe   : > { %3089 = vmatprep.subr.bf16.mxu0 %v3283_v50  ;;  %3125 = vmatprep.subr.bf16.mxu1 %v3935_v25 }
  0xc0   : > { %2998 = vmatmul.mubr.bf16.vlgmr.msra.gmra.mrb[0].mxu1 %v3287_v39  ;;  %v2289_v39 = vrot.slane %v3947_v48, 5 }
  0xc1   : > { %3090 = vmatpush3.bf16.msra.mxu0 %v3283_v50  ;;  %3133 = vmatpush3.bf16.msra.mxu1 %v3935_v25  ;;  %v3294_v50 = vld [vmem:[%s4030_s2 + $0x220] sm:$0xff]  }
  0xc2   : > { %3091 = vmatprep.subr.bf16.mxu0 %v3285_v20  ;;  %3126 = vmatprep.subr.bf16.mxu1 %v3945_v46  ;;  %v2290_v51 = vsel %vm3653_vm4, %v2741_v42, %v2289_v39 }
  0xc3   : > { %3001 = vmatprep.mubr.bf16.mxu1 %v3290_v52 }
  0xc5   : > { %3092 = vmatpush3.bf16.msra.mxu0 %v3285_v20  ;;  %3134 = vmatpush3.bf16.msra.mxu1 %v3945_v46  ;;  %v2742_v20 = vrot.slane %v2246_v49, 9 }
  0xc6   : > { %3101 = vmatprep.subr.bf16.mxu0 %v3935_v25  ;;  %3127 = vmatprep.subr.bf16.mxu1 %v3292_v23 }
  0xc7   : > { %v2294_v48 = vsel %vm3653_vm4, %v2742_v20, %v2293_v34 }
  0xc8   : > { %3094 = vmatmul.mubr.bf16.vlgmr.msra.gmra.mrb[0].mxu0 %v2724_v3  ;;  %3002 = vmatmul.mubr.bf16.gmra.mrb[4].mxu1 %v3291_v59  ;;  %v2746_v26 = vcombine.low %v2290_v51, %v2294_v48 }
  0xc9   : > { %3102 = vmatpush3.bf16.msra.mxu0 %v3935_v25  ;;  %3097 = vmatprep.mubr.bf16.mxu0 %v2725_v13  ;;  %v2726_v25 = vcombine.low %v2071_v60, %v2085_v21 }
  0xca   : > { %3103 = vmatprep.subr.bf16.mxu0 %v3945_v46  ;;  %3135 = vmatpush3.bf16.msra.mxu1 %v3292_v23 }
  0xcb   : > { %3128 = vmatprep.subr.bf16.mxu1 %v3293_v61  ;;  %3121 = vmatprep.mubr.bf16.mxu1 %v2745_v8 }
  0xcd   : > { %3104 = vmatpush3.bf16.msra.mxu0 %v3945_v46  ;;  %v2242_v46 = vld [vmem:[#allocation2 + $0x28] sm:$0xe] }
  0xce   : > { %3105 = vmatprep.subr.bf16.mxu0 %v3292_v23  ;;  %3136 = vmatpush3.bf16.msra.mxu1 %v3293_v61  ;;  %v2738_v44 = vrot.slane %v2242_v46, 9 }
  0xcf   : > { %3129 = vmatprep.subr.bf16.mxu1 %v3294_v50 }
  0xd0   : > { %3098 = vmatmul.mubr.bf16.gmra.mrb[4].mxu0 %v2726_v25  ;;  %v2278_v33 = vsel %vm3653_vm4, %v2738_v44, %v2277_v17 }
  0xd1   : > { %3106 = vmatpush3.bf16.msra.mxu0 %v3292_v23  ;;  %3117 = vmatprep.mubr.bf16.mxu0 %v2743_v4  ;;  %v2744_v35 = vcombine.low %v2274_v12, %v2278_v33 }
  0xd2   : > { %3107 = vmatprep.subr.bf16.mxu0 %v3293_v61  ;;  %3137 = vmatpush3.bf16.msra.mxu1 %v3294_v50 }
  0xd3   : > { %3130 = vmatprep.subr.bf16.mxu1 %v3295_v36 }
  0xd5   : > { %3108 = vmatpush3.bf16.msra.mxu0 %v3293_v61 }
  0xd6   : > { %3109 = vmatprep.subr.bf16.mxu0 %v3294_v50  ;;  %3138 = vmatpush3.bf16.msra.mxu1 %v3295_v36 }
  0xd7   : > { %3131 = vmatprep.subr.bf16.mxu1 %v3296_v45 }
  0xd9   : > { %3110 = vmatpush3.bf16.msra.mxu0 %v3294_v50 }
  0xda   : > { %3111 = vmatprep.subr.bf16.mxu0 %v3295_v36  ;;  %3139 = vmatpush3.bf16.msra.mxu1 %v3296_v45 }
  0xdb   : > { %3132 = vmatprep.subr.bf16.mxu1 %v3297_v5 }
  0xdd   : > { %3112 = vmatpush3.bf16.msra.mxu0 %v3295_v36 }
  0xde   : > { %3113 = vmatprep.subr.bf16.mxu0 %v3296_v45  ;;  %3140 = vmatpush3.bf16.msra.mxu1 %v3297_v5 }
  0xe1   : > { %3114 = vmatpush3.bf16.msra.mxu0 %v3296_v45  ;;  %3122 = vmatmul.mubr.bf16.vlgmr.msra.gmra.mrb[8].mxu1 %v2746_v26 }
  0xe2   : > { %3115 = vmatprep.subr.bf16.mxu0 %v3297_v5 }
  0xe5   : > { %3116 = vmatpush3.bf16.msra.mxu0 %v3297_v5 }
  0xe8   : > { %3118 = vmatmul.mubr.bf16.vlgmr.msra.gmra.mrb[0].mxu0 %v2744_v35 }
 0x193   : > { %v2999_v30 = vpop.f32.mrb[0].mxu1 }
 0x194   : > { %v1259_v16 = vpop.f32.mrb[1].mxu1 }
 0x195   : > { %v3000_v19 = vpop.f32.mrb[2].mxu1 }
 0x196   : > { %v1262_v28 = vpop.f32.mrb[3].mxu1 }
 0x19b   : > { %v3003_v6 = vpop.f32.mrb[4].mxu1 }
 0x19c   : > { %v1275_v52 = vpop.f32.mrb[5].mxu1 }
 0x19d   : > { %v3004_v55 = vpop.f32.mrb[6].mxu1 }
 0x19e   : > { %v1278_v24 = vpop.f32.mrb[7].mxu1 }
 0x1a3   : > { %v3099_v47 = vpop.f32.mrb[4].mxu0 }
 0x1a4   : > { %v3145_v57 = vadd.f32 %v3099_v47, %v3003_v6  ;;  %v2216_v54 = vpop.f32.mrb[5].mxu0 }
 0x1a5   : > { %v3147_v32 = vadd.f32 %v2216_v54, %v1275_v52  ;;  %v3100_v11 = vpop.f32.mrb[6].mxu0 }
 0x1a6   : > { %v3149_v58 = vadd.f32 %v3100_v11, %v3004_v55  ;;  %v2219_v62 = vpop.f32.mrb[7].mxu0 }
 0x1a7   : > { %v3151_v1 = vadd.f32 %v2219_v62, %v1278_v24 }
 0x1b4   : > { %v3123_v2 = vpop.f32.mrb[8].mxu1 }
 0x1b5   : > { %v3146_v40 = vadd.f32 %v3145_v57, %v3123_v2  ;;  %v2425_v23 = vpop.f32.mrb[9].mxu1 }
 0x1b6   : > { %v3148_v29 = vadd.f32 %v3147_v32, %v2425_v23  ;;  %v3124_v0 = vpop.f32.mrb[10].mxu1 }
 0x1b7   : > { %v3150_v3 = vadd.f32 %v3149_v58, %v3124_v0  ;;  %v2428_v59 = vpop.f32.mrb[11].mxu1  ;;  %v2483_v5 = vmul.f32 %v3146_v40, %v3146_v40 }
 0x1b8   : > { %v3152_v7 = vadd.f32 %v3151_v1, %v2428_v59  ;;  %v2481_v27 = vmul.f32 %v3148_v29, %v3148_v29 }
 0x1b9   : > { %v2793_v9 = vpack.c.bf16 %v3150_v3, %v3146_v40  ;;  %v2484_v51 = vmul.f32 %v3150_v3, %v3150_v3 }
 0x1ba   : > { %v2788_v10 = vpack.c.bf16 %v3152_v7, %v3148_v29  ;;  %v2482_v42 = vmul.f32 %v3152_v7, %v3152_v7 }
 0x1bb   : > { %v3119_v13 = vpop.f32.mrb[0].mxu0  ;;  %2800 = vst [vmem:[%s204_s6 + $0x18] sm:$0xff] %v2793_v9  }
 0x1bc   : > { %v3141_v53 = vadd.f32 %v3119_v13, %v2999_v30  ;;  %v2409_v14 = vpop.f32.mrb[1].mxu0  ;;  %2799 = vst [vmem:[%s204_s6 + $0x10] sm:$0xff] %v2788_v10  }
 0x1bd   : > { %v3142_v63 = vadd.f32 %v2409_v14, %v1259_v16  ;;  %v3120_v41 = vpop.f32.mrb[2].mxu0 }
 0x1be   : > { %v3143_v18 = vadd.f32 %v3120_v41, %v3000_v19  ;;  %v2412_v31 = vpop.f32.mrb[3].mxu0  ;;  %v2479_v22 = vmul.f32 %v3141_v53, %v3141_v53 }
 0x1bf   : > { %v3144_v37 = vadd.f32 %v2412_v31, %v1262_v28  ;;  %v2477_v8 = vmul.f32 %v3142_v63, %v3142_v63 }
 0x1c0   : > { %v2783_v61 = vpack.c.bf16 %v3143_v18, %v3141_v53  ;;  %v2480_v4 = vmul.f32 %v3143_v18, %v3143_v18 }
 0x1c1   : > { %v2778_v60 = vpack.c.bf16 %v3144_v37, %v3142_v63  ;;  %v2464_v21 = vadd.f32 %v3144_v37, %v3142_v63  ;;  %v2478_v15 = vmul.f32 %v3144_v37, %v3144_v37 }
 0x1c2   : > { %2798 = vst [vmem:[%s204_s6 + $0x8] sm:$0xff] %v2783_v61  }
 0x1c3   : > { %2779 = vst [vmem:[%s204_s6] sm:$0xff] %v2778_v60   ;;  %v2465_v50 = vadd.f32 %v3141_v53, %v2464_v21  ;;  %v2485_v25 = vadd.f32 %v2478_v15, %v2477_v8 }
 0x1c5   : > { %v2486_v36 = vadd.f32 %v2485_v25, %v2479_v22  ;;  %v2466_v45 = vadd.f32 %v3143_v18, %v2465_v50 }
 0x1c7   : > { %v2467_v49 = vadd.f32 %v3148_v29, %v2466_v45  ;;  %v2487_v39 = vadd.f32 %v2486_v36, %v2480_v4 }
 0x1c9   : > { %v2468_v34 = vadd.f32 %v3152_v7, %v2467_v49  ;;  %v2488_v20 = vadd.f32 %v2487_v39, %v2481_v27 }
 0x1cb   : > { %v2469_v43 = vadd.f32 %v3146_v40, %v2468_v34  ;;  %v2489_v46 = vadd.f32 %v2488_v20, %v2482_v42 }
 0x1cd   : > { %v2470_v48 = vadd.f32 %v3150_v3, %v2469_v43  ;;  %v2490_v56 = vadd.f32 %v2489_v46, %v2483_v5 }
 0x1cf   : > { %v2471_v38 = vrot.slane %v2470_v48, 4  ;;  %v2491_v44 = vadd.f32 %v2490_v56, %v2484_v51 }
 0x1d1   : > { %v2472_v17 = vadd.f32 %v2471_v38, %v2470_v48  ;;  %v2492_v26 = vrot.slane %v2491_v44, 4 }
 0x1d3   : > { %v2473_v12 = vrot.slane %v2472_v17, 2  ;;  %v2493_v33 = vadd.f32 %v2492_v26, %v2491_v44 }
 0x1d5   : > { %v2474_v35 = vadd.f32 %v2473_v12, %v2472_v17  ;;  %v2494_v30 = vrot.slane %v2493_v33, 2 }
 0x1d7   : > { %v2475_v16 = vrot.slane %v2474_v35, 1  ;;  %v2495_v19 = vadd.f32 %v2494_v30, %v2493_v33 }
 0x1d9   : > { %v2496_v28 = vrot.slane %v2495_v19, 1  ;;  %v2476_v6 = vadd.f32 %v2475_v16, %v2474_v35 }
 0x1db   : > { %v2497_v52 = vadd.f32 %v2496_v28, %v2495_v19 }
 0x1dd   : > { %v2499_v55 = vsel %vm388_vm0, %v2476_v6, %v2497_v52 }
 0x1de   : > { %2500 = vst [vmem:[%s208_s10] sm:$0x3] %v2499_v55 }
 0x1df PF: > { %s15_s15 = sadd.s32 1, %s3320_s15  }
 0x1e0   : > { %p12_p4 = scmp.ge.s32.totalorder %s15_s15, 4  }
 0x1e2   :  { %14 = sbr.rel (!%p12_p4) target bundleno = 1 (0x1), region = 77 }

// kernel: res_layer_forward.4
= control target key start
LH: loop header
LB: loop body
LE: loop exit
PB: predicated region body
PF: predicated region fallthrough
CT: control target
= control target key end

     0   :  { %s3637_s12 = smov 0   ;;  %s4848_s0 = inlined_call_operand.vmem [shape: bf16[2,16,16,4], index: 0, kind: input, shape index: {}]   ;;  %s4849_s1 = inlined_call_operand.vmem [shape: bf16[36,128], index: 1, kind: input, shape index: {}]   ;;  %s4850_s2 = inlined_call_operand.vmem [shape: bf16[2,8,8,128], index: 2, kind: output, shape index: {0}]   ;;  %s4851_s3 = inlined_call_operand.vmem [shape: f32[2,2,128], index: 3, kind: output, shape index: {1}]  }
   0x1 LB: > { %s3099_s13 = sadd.s32 4294967295, %s3606_s12   ;;  %p3103_p0 = scmp.ge.s32.totalorder %s3606_s12, 1  ;;  %s3606_s12 = sphi %s3637_s12, %s14_s12  }
   0x2   : > { %p140_p1 = scmp.lt.s32.totalorder %s3606_s12, 3 }
   0x4   : > { %p141_p2 = pnand %p3103_p0, %p140_p1 }
   0x6   : > { %144 = sbr.rel (%p141_p2) target bundleno = 652 (0x28c), region = 28 }
   0xd   : > { %vm651_vm0 = vcmask 27648   ;;  %vm654_vm1 = vcmask 24576   ;;  %v3608_v0 = vmov 0   ;;  %p168_p3 = scmp.lt.s32.totalorder %s3099_s13, 1  ;;  %vm1302_vm2 = vcmask 1046528   ;;  %s3609_s18 = smov 8  }
   0xe   : > { %701 = vst.msk [vmem:[#allocation2] sm:$0xf] %vm651_vm0, %v3608_v0  ;;  %702 = vst.msk [vmem:[#allocation2 + $0x4] sm:$0xf] %vm651_vm0, %v3608_v0  ;;  %vm440_vm3 = vsmask.f32 256 }
   0xf   : > { %703 = vst.msk [vmem:[#allocation2 + $0x8] sm:$0x1] %vm654_vm1, %v3608_v0  ;;  %707 = vst.msk [vmem:[#allocation2 + $0xd4] sm:$0x1] %vm654_vm1, %v3608_v0  ;;  %s4864_s13 = smov (!%p168_p3, %s3099_s13), 1  ;;  %vm439_vm5 = vcmask 1040384  }
  0x10   : > { %705 = vst.msk [vmem:[#allocation2 + $0xcc] sm:$0xf] %vm651_vm0, %v3608_v0  ;;  %706 = vst.msk [vmem:[#allocation2 + $0xd0] sm:$0xf] %vm651_vm0, %v3608_v0  ;;  %s3338_s14 = sshll.u32 %s4864_s13, 7  ;;  %s3610_s19 = smov 4  }
  0x11   : > { %s3657_s17 = scalar_lea.vmem %s4848_s0, %s3338_s14  ;;  %vm1029_vm4 = vsmask.f32 7424  ;;  %vm3667_vm6 = vmand %vm439_vm5, %vm440_vm3  ;;  %s3611_s20 = smov 12   ;;  %vm2724_vm7 = vcmask 1041408   ;;  %vm2407_vm8 = vcmask 31744   ;;  %vm2440_vm9 = vcmask 64512  }
  0x12   : > { %v3448_v1 = vld [vmem:[%s3657_s17 + $0x8] sm:$0xff]   ;;  %v3451_v10 = vld [vmem:[%s3657_s17] sm:$0xff]   ;;  %v3454_v23 = vld [vmem:[%s3657_s17 + $0x10] sm:$0xff]   ;;  %s3612_s21 = smov 24   ;;  %s3613_s26 = smov 20   ;;  %vm2473_vm10 = vcmask 97280  }
  0x13   : > { %v303_v7 = vshrl.u32 %v3448_v1, 16  ;;  %v306_v9 = vshll.u32 %v3448_v1, 16  ;;  %v296_v18 = vshrl.u32 %v3451_v10, 16  ;;  %v299_v19 = vshll.u32 %v3451_v10, 16  ;;  %v3468_v25 = vld [vmem:[%s3657_s17 + $0x38] sm:$0xff]   ;;  %v3681_v37 = vld [vmem:[%s3657_s17 + $0x40] sm:$0xff]  }
  0x14   : > { %v310_v30 = vshrl.u32 %v3454_v23, 16  ;;  %v313_v31 = vshll.u32 %v3454_v23, 16  ;;  %v345_v32 = vshrl.u32 %v3468_v25, 16  ;;  %v348_v41 = vshll.u32 %v3468_v25, 16  ;;  %s3614_s27 = smov 32   ;;  %s3615_s28 = smov 16  }
  0x15   : > { %v709_v2 = vld [vmem:[#allocation2 + $0x4] sm:$0xf]  ;;  %v756_v3 = vld [vmem:[#allocation2] sm:$0xe]  ;;  %v305_v14 = vrot.slane %v303_v7, 7  ;;  %v298_v27 = vrot.slane %v296_v18, 7 }
  0x16   : > { %v3445_v4 = vld [vmem:[#allocation2 + $0x8] ss:$0 sps:$4 sm:$0x11]   ;;  %v3205_v5 = vcombine.low %v756_v3, %v709_v2  ;;  %v708_v6 = vld [vmem:[#allocation2] sm:$0xf]  ;;  %v312_v38 = vrot.slane %v310_v30, 7 }
  0x17   : > { %v3660_v8 = vcombine.low %v708_v6, %v709_v2  ;;  %v1304_v12 = vrot.slane %v3445_v4, 1  ;;  %v1038_v13 = vshll.u32 %v3445_v4, 16  ;;  %v308_v22 = vor.u32 %v306_v9, %v305_v14  ;;  %s3616_s29 = smov 28   ;;  %s3339_s5 = sshll.u32 %s4864_s13, 5 }
  0x18   : > { %v1303_v11 = vrot.slane %v3205_v5, 1  ;;  %v459_v24 = vsel %vm3667_vm6, %v305_v14, 0  ;;  %v301_v36 = vor.u32 %v299_v19, %v298_v27  ;;  %v458_v39 = vsel %vm3667_vm6, %v298_v27, 0  ;;  %s4834_s8 = scalar_lea.vmem %s4850_s2, %s3339_s5  ;;  %s3108_s9 = sshll.u32 %s4864_s13, 1 }
  0x19   : > { %v1031_v15 = vshrl.u32 %v3660_v8, 16  ;;  %v1033_v16 = vshll.u32 %v3660_v8, 16  ;;  %v1040_v21 = vrot.slane %v1038_v13, 1  ;;  %v3130_v28 = vcombine.low %v459_v24, %v459_v24  ;;  %s181_s14 = scalar_lea.vmem %s4851_s3, %s3108_s9 }
  0x1a   : > { %v1305_v20 = vsel %vm1302_vm2, %v1303_v11, %v1304_v12  ;;  %v443_v29 = vsel %vm3667_vm6, 0, %v308_v22  ;;  %v347_v40 = vrot.slane %v345_v32, 7  ;;  %v442_v43 = vsel %vm3667_vm6, 0, %v301_v36 }
  0x1b   : > { %1351 = vrot.lane.b32.xlu1 %v1305_v20, %s3609_s18  ;;  %v1035_v26 = vrot.slane %v1033_v16, 1  ;;  %v3128_v34 = vcombine.low %v443_v29, %v443_v29  ;;  %v3129_v35 = vcombine.high %v443_v29, %v443_v29  ;;  %658 = vst.msk [vmem:[#allocation2 + $0x20] sm:$0x1] %vm654_vm1, %v3130_v28  ;;  %v3127_v44 = vcombine.low %v458_v39, %v458_v39 }
  0x1c   : > { %v352_v45 = vshrl.u32 %v3681_v37, 16  ;;  %v3125_v46 = vcombine.low %v442_v43, %v442_v43  ;;  %v3126_v47 = vcombine.high %v442_v43, %v442_v43  ;;  %v315_v48 = vor.u32 %v313_v31, %v312_v38 }
  0x1d   : > { %v1036_v33 = vor.u32 %v1035_v26, %v1031_v15  ;;  %656 = vst.msk [vmem:[#allocation2 + $0x18] sm:$0xf] %vm651_vm0, %v3128_v34  ;;  %657 = vst.msk [vmem:[#allocation2 + $0x1c] sm:$0xf] %vm651_vm0, %v3129_v35  ;;  %v460_v49 = vsel %vm3667_vm6, %v312_v38, 0  ;;  %v350_v51 = vor.u32 %v348_v41, %v347_v40  ;;  %v465_v52 = vsel %vm3667_vm6, %v347_v40, 0 }
  0x1e   : > { %655 = vst.msk [vmem:[#allocation2 + $0x14] sm:$0x1] %vm654_vm1, %v3127_v44  ;;  %v3133_v50 = vcombine.low %v460_v49, %v460_v49  ;;  %v3697_v53 = vrot.slane %v352_v45, 7  ;;  %v444_v54 = vsel %vm3667_vm6, 0, %v315_v48  ;;  %v3148_v55 = vcombine.low %v465_v52, %v465_v52  ;;  %v3757_v52 = vld [vmem:[%s3657_s17 + $0x48] sm:$0xff]  }
  0x1f   : > { %v1041_v42 = vsel %vm1029_vm4, %v1036_v33, %v1040_v21  ;;  %652 = vst.msk [vmem:[#allocation2 + $0xc] sm:$0xf] %vm651_vm0, %v3125_v46  ;;  %653 = vst.msk [vmem:[#allocation2 + $0x10] sm:$0xf] %vm651_vm0, %v3126_v47  ;;  %v3131_v56 = vcombine.low %v444_v54, %v444_v54  ;;  %v3132_v57 = vcombine.high %v444_v54, %v444_v54  ;;  %v449_v58 = vsel %vm3667_vm6, 0, %v350_v51  ;;  %v3532_v47 = vld [vmem:[%s4849_s1] sm:$0xff]  }
  0x20   : > { %1222 = vrot.lane.b32.xlu0 %v1041_v42, %s3610_s19  ;;  %661 = vst.msk [vmem:[#allocation2 + $0x2c] sm:$0x1] %vm654_vm1, %v3133_v50  ;;  %v466_v59 = vsel %vm3667_vm6, %v3697_v53, 0  ;;  %v3146_v60 = vcombine.low %v449_v58, %v449_v58  ;;  %v3147_v61 = vcombine.high %v449_v58, %v449_v58  ;;  %676 = vst.msk [vmem:[#allocation2 + $0x68] sm:$0x1] %vm654_vm1, %v3148_v55  ;;  %v355_v18 = vshll.u32 %v3681_v37, 16 }
  0x21   : > { %v3151_v62 = vcombine.low %v466_v59, %v466_v59  ;;  %659 = vst.msk [vmem:[#allocation2 + $0x24] sm:$0xf] %vm651_vm0, %v3131_v56  ;;  %660 = vst.msk [vmem:[#allocation2 + $0x28] sm:$0xf] %vm651_vm0, %v3132_v57  ;;  %3382 = vmatprep.subr.bf16.mxu0 %v3532_v47  ;;  %3420 = vmatprep.subr.bf16.mxu1 %v3532_v47  ;;  %vm2506_vm11 = vcmask 130048   ;;  %vm2539_vm12 = vcmask 162816  }
  0x22   : > { %v3712_v63 = vld [vmem:[#allocation2 + $0x20] ss:$0 sps:$4 sm:$0x11]   ;;  %674 = vst.msk [vmem:[#allocation2 + $0x60] sm:$0xf] %vm651_vm0, %v3146_v60  ;;  %3383 = vmatpush3.bf16.msra.mxu0 %v3532_v47  ;;  %3423 = vmatpush3.bf16.msra.mxu1 %v3532_v47  ;;  %vm2572_vm13 = vcmask 195584  }
  0x23   : > { %675 = vst.msk [vmem:[#allocation2 + $0x64] sm:$0xf] %vm651_vm0, %v3147_v61  ;;  %v3723_v11 = vld [vmem:[#allocation2 + $0x20] ss:$0 sps:$4 sm:$0x11]   ;;  %v2328_v16 = vrot.slane %v3712_v63, 1 }
  0x24   : > { %v774_v0 = vld [vmem:[#allocation2 + $0x18] sm:$0xf]  ;;  %v775_v1 = vld [vmem:[#allocation2 + $0x1c] sm:$0xf]  ;;  %679 = vst.msk [vmem:[#allocation2 + $0x74] sm:$0x1] %vm654_vm1, %v3151_v62 }
  0x25   : > { %v821_v2 = vld [vmem:[#allocation2 + $0x18] sm:$0xe]  ;;  %v3717_v3 = vcombine.low %v774_v0, %v775_v1  ;;  %v838_v5 = vld [vmem:[#allocation2 + $0x1c] sm:$0xf]  ;;  %v1819_v41 = vrot.slane %v3723_v11, 1  ;;  %v1563_v57 = vshll.u32 %v3723_v11, 16 }
  0x26   : > { %v837_v4 = vld [vmem:[#allocation2 + $0x18] sm:$0xf]  ;;  %v3719_v7 = vld [vmem:[#allocation2 + $0x14] ss:$0 sps:$4 sm:$0x11]   ;;  %v3254_v12 = vcombine.low %v821_v2, %v775_v1  ;;  %v3537_v2 = vld [vmem:[%s4849_s1 + $0x8] sm:$0xff]  }
  0x27   : > { %v885_v6 = vld [vmem:[#allocation2 + $0x18] sm:$0xe]  ;;  %1465 = vrot.lane.b32.xlu1 %v3717_v3, %s3611_s20  ;;  %v772_v9 = vld [vmem:[#allocation2 + $0xc] sm:$0xf]  ;;  %v773_v10 = vld [vmem:[#allocation2 + $0x10] sm:$0xf]  ;;  %v3729_v20 = vcombine.low %v837_v4, %v838_v5  ;;  %3384 = vmatprep.subr.bf16.mxu0 %v3537_v2 }
  0x28   : > { %v820_v13 = vld [vmem:[#allocation2 + $0xc] sm:$0xe]  ;;  %v3725_v14 = vcombine.low %v772_v9, %v773_v10  ;;  %v711_v15 = vld [vmem:[#allocation2 + $0x10] sm:$0xf]  ;;  %v3301_v21 = vcombine.low %v885_v6, %v838_v5  ;;  %v1558_v24 = vshll.u32 %v3717_v3, 16  ;;  %v1816_v27 = vrot.slane %v3719_v7, 1  ;;  %3421 = vmatprep.subr.bf16.mxu1 %v3537_v2  ;;  %3385 = vmatpush3.bf16.msra.mxu0 %v3537_v2 }
  0x29   : > { %v3253_v19 = vcombine.low %v820_v13, %v773_v10  ;;  %v757_v22 = vld [vmem:[#allocation2 + $0xc] sm:$0xe]  ;;  %v839_v25 = vld [vmem:[#allocation2 + $0x24] sm:$0xf]  ;;  %v840_v26 = vld [vmem:[#allocation2 + $0x28] sm:$0xf]  ;;  %3424 = vmatpush3.bf16.msra.mxu1 %v3537_v2 }
  0x2a   : > { %v710_v23 = vld [vmem:[#allocation2 + $0xc] sm:$0xf]  ;;  %1463 = vrot.lane.b32.xlu0 %v3725_v14, %s3611_s20  ;;  %v3206_v28 = vcombine.low %v757_v22, %v711_v15  ;;  %v886_v30 = vld [vmem:[#allocation2 + $0x24] sm:$0xe]  ;;  %v3737_v31 = vcombine.low %v839_v25, %v840_v26  ;;  %v1546_v34 = vshll.u32 %v3725_v14, 16  ;;  %v1818_v38 = vrot.slane %v3254_v12, 1 }
  0x2b   : > { %v3735_v29 = vcombine.low %v710_v23, %v711_v15  ;;  %v1815_v32 = vrot.slane %v3253_v19, 1  ;;  %v3460_v33 = vld [vmem:[#allocation2 + $0x14] ss:$0 sps:$4 sm:$0x11]   ;;  %v3302_v35 = vcombine.low %v886_v30, %v840_v26  ;;  %v2327_v40 = vrot.slane %v3301_v21, 1 }
  0x2c   : > { %v1306_v36 = vrot.slane %v3206_v28, 1  ;;  %1977 = vrot.lane.b32.xlu1 %v3737_v31, %s3612_s21  ;;  %v1307_v39 = vrot.slane %v3460_v33, 1  ;;  %v3743_v42 = vld [vmem:[#allocation2 + $0x2c] ss:$0 sps:$4 sm:$0x11]   ;;  %v2070_v43 = vshll.u32 %v3737_v31, 16  ;;  %v357_v23 = vor.u32 %v355_v18, %v3697_v53 }
  0x2d   : > { %v1817_v44 = vsel %vm1302_vm2, %v1815_v32, %v1816_v27  ;;  %v1045_v45 = vshll.u32 %v3735_v29, 16  ;;  %v1050_v46 = vshll.u32 %v3460_v33, 16  ;;  %v1043_v49 = vshrl.u32 %v3735_v29, 16  ;;  %v712_v58 = vld [vmem:[#allocation2 + $0x18] sm:$0xf] }
  0x2e   : > { %1975 = vrot.lane.b32.xlu0 %v3729_v20, %s3612_s21  ;;  %v1308_v48 = vsel %vm1302_vm2, %v1306_v36, %v1307_v39  ;;  %v1556_v50 = vshrl.u32 %v3717_v3, 16  ;;  %v1560_v51 = vrot.slane %v1558_v24, 1  ;;  %v2058_v54 = vshll.u32 %v3729_v20, 16  ;;  %v3761_v59 = vld [vmem:[#allocation2 + $0x1c] sm:$0xf] }
  0x2f   : > { %v2330_v55 = vrot.slane %v3302_v35, 1  ;;  %v1047_v56 = vrot.slane %v1045_v45, 1  ;;  %v2329_v60 = vsel %vm1302_vm2, %v2327_v40, %v2328_v16  ;;  %v2331_v61 = vrot.slane %v3743_v42, 1  ;;  %v724_v1 = vld [vmem:[#allocation2 + $0x60] sm:$0xf] }
  0x30   : > { %1353 = vrot.lane.b32.xlu1 %v1308_v48, %s3609_s18  ;;  %v1052_v62 = vrot.slane %v1050_v46, 1  ;;  %v1544_v0 = vshrl.u32 %v3725_v14, 16  ;;  %v1820_v3 = vsel %vm1302_vm2, %v1818_v38, %v1819_v41  ;;  %v1565_v4 = vrot.slane %v1563_v57, 1  ;;  %v3773_v9 = vld [vmem:[#allocation2 + $0x20] ss:$0 sps:$4 sm:$0x11]  }
  0x31   : > { %v1548_v5 = vrot.slane %v1546_v34, 1  ;;  %v1551_v6 = vshll.u32 %v3719_v7, 16  ;;  %v1048_v10 = vor.u32 %v1047_v56, %v1043_v49  ;;  %v1561_v11 = vor.u32 %v1560_v51, %v1556_v50  ;;  %v3776_v14 = vld [vmem:[#allocation2 + $0x64] sm:$0xf]  ;;  %v3799_v30 = vld [vmem:[#allocation2 + $0x28] sm:$0xf] }
  0x32   : > { %1863 = vrot.lane.b32.xlu0 %v1817_v44, %s3613_s26  ;;  %v2068_v12 = vshrl.u32 %v3737_v31, 16  ;;  %v2072_v13 = vrot.slane %v2070_v43, 1  ;;  %v2075_v15 = vshll.u32 %v3743_v42, 16  ;;  %v2056_v16 = vshrl.u32 %v3729_v20, 16  ;;  %v714_v27 = vld [vmem:[#allocation2 + $0x24] sm:$0xf] }
  0x33   : > { %v2060_v19 = vrot.slane %v2058_v54, 1  ;;  %v2063_v7 = vshll.u32 %v3712_v63, 16  ;;  %v3783_v21 = vcombine.low %v712_v58, %v3761_v59  ;;  %v3785_v22 = vld [vmem:[#allocation2 + $0x68] ss:$0 sps:$4 sm:$0x11]   ;;  %v359_v24 = vshrl.u32 %v3757_v52, 16 }
  0x34   : > { %1865 = vrot.lane.b32.xlu1 %v1820_v3, %s3613_s26  ;;  %v2332_v20 = vsel %vm1302_vm2, %v2330_v55, %v2331_v61  ;;  %v1549_v25 = vor.u32 %v1548_v5, %v1544_v0  ;;  %v1553_v26 = vrot.slane %v1551_v6, 1  ;;  %v3794_v63 = vcombine.low %v724_v1, %v3776_v14  ;;  %v3814_v47 = vld [vmem:[#allocation2 + $0x2c] ss:$0 sps:$4 sm:$0x11]   ;;  %v3485_v54 = vld [vmem:[%s3657_s17 + $0x18] sm:$0xff]  }
  0x35   : > { %v1053_v28 = vsel %vm1029_vm4, %v1048_v10, %v1052_v62  ;;  %v1566_v37 = vsel %vm1029_vm4, %v1561_v11, %v1565_v4  ;;  %v2073_v53 = vor.u32 %v2072_v13, %v2068_v12  ;;  %v1057_v18 = vshll.u32 %v3783_v21, 16  ;;  %v3818_v48 = vld [vmem:[#allocation2 + $0x74] ss:$0 sps:$4 sm:$0x11]   ;;  %v758_v1 = vld [vmem:[#allocation2 + $0x18] sm:$0xe] }
  0x36   : > { %2375 = vrot.lane.b32.xlu0 %v2329_v60, %s3614_s27  ;;  %v2077_v31 = vrot.slane %v2075_v15, 1  ;;  %v2061_v32 = vor.u32 %v2060_v19, %v2056_v16  ;;  %v1062_v33 = vshll.u32 %v3773_v9, 16  ;;  %v1129_v34 = vshll.u32 %v3794_v63, 16  ;;  %v764_v4 = vld [vmem:[#allocation2 + $0x60] sm:$0xe] }
  0x37   : > { %v2065_v35 = vrot.slane %v2063_v7, 1  ;;  %v1055_v36 = vshrl.u32 %v3783_v21, 16  ;;  %v1134_v38 = vshll.u32 %v3785_v22, 16  ;;  %v450_v39 = vsel %vm3667_vm6, 0, %v357_v23  ;;  %v759_v11 = vld [vmem:[#allocation2 + $0x24] sm:$0xe] }
  0x38   : > { %2377 = vrot.lane.b32.xlu1 %v2332_v20, %s3614_s27  ;;  %v1059_v40 = vrot.slane %v1057_v18, 1  ;;  %v3149_v41 = vcombine.low %v450_v39, %v450_v39  ;;  %v3150_v42 = vcombine.high %v450_v39, %v450_v39  ;;  %v3810_v43 = vcombine.low %v714_v27, %v3799_v30  ;;  %v827_v17 = vld [vmem:[#allocation2 + $0x60] sm:$0xe] }
  0x39   : > { %v1554_v44 = vsel %vm1029_vm4, %v1549_v25, %v1553_v26  ;;  %v1127_v45 = vshrl.u32 %v3794_v63, 16  ;;  %v1131_v46 = vrot.slane %v1129_v34, 1  ;;  %v2078_v50 = vsel %vm1029_vm4, %v2073_v53, %v2077_v31  ;;  %v776_v25 = vld [vmem:[#allocation2 + $0x24] sm:$0xf]  ;;  %v3838_v26 = vld [vmem:[#allocation2 + $0x28] sm:$0xf] }
  0x3a   : > { %1224 = vrot.lane.b32.xlu0 %v1053_v28, %s3610_s19  ;;  %677 = vst.msk [vmem:[#allocation2 + $0x6c] sm:$0xf] %vm651_vm0, %v3149_v41  ;;  %678 = vst.msk [vmem:[#allocation2 + $0x70] sm:$0xf] %vm651_vm0, %v3150_v42  ;;  %v1069_v49 = vshll.u32 %v3810_v43, 16  ;;  %v361_v51 = vrot.slane %v359_v24, 7  ;;  %v2066_v55 = vsel %vm1029_vm4, %v2061_v32, %v2065_v35  ;;  %v1060_v56 = vor.u32 %v1059_v40, %v1055_v36 }
  0x3b   : > { %v1064_v57 = vrot.slane %v1062_v33, 1  ;;  %v1136_v58 = vrot.slane %v1134_v38, 1  ;;  %v1132_v60 = vor.u32 %v1131_v46, %v1127_v45  ;;  %v1067_v61 = vshrl.u32 %v3810_v43, 16 }
  0x3c   : > { %1737 = vrot.lane.b32.xlu1 %v1566_v37, %s3615_s28  ;;  %v1071_v62 = vrot.slane %v1069_v49, 1  ;;  %v1074_v0 = vshll.u32 %v3814_v47, 16  ;;  %v1146_v2 = vshll.u32 %v3818_v48, 16  ;;  %v362_v3 = vshll.u32 %v3757_v52, 16  ;;  %v3496_v49 = vld [vmem:[%s3657_s17 + $0x50] sm:$0xff]  }
  0x3d   : > { %v317_v5 = vshrl.u32 %v3485_v54, 16  ;;  %v1065_v6 = vsel %vm1029_vm4, %v1060_v56, %v1064_v57  ;;  %v3207_v10 = vcombine.low %v758_v1, %v3761_v59  ;;  %v1137_v13 = vsel %vm1029_vm4, %v1132_v60, %v1136_v58 }
  0x3e   : > { %1735 = vrot.lane.b32.xlu0 %v1554_v44, %s3615_s28  ;;  %v364_v12 = vor.u32 %v362_v3, %v361_v51  ;;  %v1072_v19 = vor.u32 %v1071_v62, %v1067_v61  ;;  %v1076_v7 = vrot.slane %v1074_v0, 1  ;;  %v320_v52 = vshll.u32 %v3485_v54, 16  ;;  %v3871_v62 = vld [vmem:[#allocation2 + $0x2c] ss:$0 sps:$4 sm:$0x11]  }
  0x3f   : > { %v1148_v24 = vrot.slane %v1146_v2, 1  ;;  %v1310_v20 = vrot.slane %v3773_v9, 1  ;;  %v3213_v59 = vcombine.low %v764_v4, %v3776_v14  ;;  %v319_v28 = vrot.slane %v317_v5, 7  ;;  %v3880_v5 = vld [vmem:[#allocation2 + $0x74] ss:$0 sps:$4 sm:$0x11]  }
  0x40   : > { %2249 = vrot.lane.b32.xlu1 %v2078_v50, %s3616_s29  ;;  %v451_v27 = vsel %vm3667_vm6, 0, %v364_v12  ;;  %v1309_v18 = vrot.slane %v3207_v10, 1  ;;  %v1077_v32 = vsel %vm1029_vm4, %v1072_v19, %v1076_v7  ;;  %v3208_v33 = vcombine.low %v759_v11, %v3799_v30 }
  0x41   : > { %v726_v15 = vld [vmem:[#allocation2 + $0x6c] sm:$0xf]  ;;  %v727_v16 = vld [vmem:[#allocation2 + $0x70] sm:$0xf]  ;;  %v3152_v9 = vcombine.low %v451_v27, %v451_v27  ;;  %v3153_v34 = vcombine.high %v451_v27, %v451_v27  ;;  %v322_v35 = vor.u32 %v320_v52, %v319_v28  ;;  %v1328_v36 = vrot.slane %v3785_v22, 1 }
  0x42   : > { %2247 = vrot.lane.b32.xlu0 %v2066_v55, %s3616_s29  ;;  %v3835_v23 = vcombine.low %v726_v15, %v727_v16  ;;  %v765_v31 = vld [vmem:[#allocation2 + $0x6c] sm:$0xe]  ;;  %v1327_v39 = vrot.slane %v3213_v59, 1  ;;  %v3851_v41 = vld [vmem:[#allocation2 + $0x70] sm:$0xf]  ;;  %v3223_v42 = vcombine.low %v776_v25, %v3838_v26  ;;  %v467_v22 = vsel %vm3667_vm6, %v361_v51, 0 }
  0x43   : > { %v788_v38 = vld [vmem:[#allocation2 + $0x6c] sm:$0xf]  ;;  %680 = vst.msk [vmem:[#allocation2 + $0x78] sm:$0xf] %vm651_vm0, %v3152_v9  ;;  %v3214_v40 = vcombine.low %v765_v31, %v727_v16  ;;  %681 = vst.msk [vmem:[#allocation2 + $0x7c] sm:$0xf] %vm651_vm0, %v3153_v34  ;;  %v1311_v50 = vsel %vm1302_vm2, %v1309_v18, %v1310_v20  ;;  %v3154_v56 = vcombine.low %v467_v22, %v467_v22 }
  0x44   : > { %1226 = vrot.lane.b32.xlu1 %v1065_v6, %s3610_s19  ;;  %v1139_v37 = vshrl.u32 %v3835_v23, 16  ;;  %v1141_v53 = vshll.u32 %v3835_v23, 16  ;;  %v445_v30 = vsel %vm3667_vm6, 0, %v322_v35  ;;  %v1312_v54 = vrot.slane %v3208_v33, 1  ;;  %v822_v20 = vld [vmem:[#allocation2 + $0x24] sm:$0xe] }
  0x45   : > { %v3134_v45 = vcombine.low %v445_v30, %v445_v30  ;;  %v3135_v46 = vcombine.high %v445_v30, %v445_v30  ;;  %v1313_v55 = vrot.slane %v3814_v47, 1  ;;  %v461_v58 = vsel %vm3667_vm6, %v319_v28, 0  ;;  %682 = vst.msk [vmem:[#allocation2 + $0x80] sm:$0x1] %vm654_vm1, %v3154_v56 }
  0x46   : > { %1238 = vrot.lane.b32.xlu0 %v1137_v13, %s3610_s19  ;;  %v1143_v14 = vrot.slane %v1141_v53, 1  ;;  %v1330_v60 = vrot.slane %v3214_v40, 1  ;;  %v1331_v51 = vrot.slane %v3818_v48, 1  ;;  %v3229_v61 = vcombine.low %v788_v38, %v3851_v41 }
  0x47   : > { %662 = vst.msk [vmem:[#allocation2 + $0x30] sm:$0xf] %vm651_vm0, %v3134_v45  ;;  %663 = vst.msk [vmem:[#allocation2 + $0x34] sm:$0xf] %vm651_vm0, %v3135_v46  ;;  %v3136_v47 = vcombine.low %v461_v58, %v461_v58  ;;  %v1329_v0 = vsel %vm1302_vm2, %v1327_v39, %v1328_v36  ;;  %v1570_v1 = vshll.u32 %v3223_v42, 16  ;;  %v366_v2 = vshrl.u32 %v3496_v49, 16 }
  0x48   : > { %v1144_v44 = vor.u32 %v1143_v14, %v1139_v37  ;;  %v1314_v3 = vsel %vm1302_vm2, %v1312_v54, %v1313_v55  ;;  %v1332_v6 = vsel %vm1302_vm2, %v1330_v60, %v1331_v51  ;;  %v1642_v10 = vshll.u32 %v3229_v61, 16  ;;  %v828_v14 = vld [vmem:[#allocation2 + $0x6c] sm:$0xe] }
  0x49   : > { %664 = vst.msk [vmem:[#allocation2 + $0x38] sm:$0x1] %vm654_vm1, %v3136_v47  ;;  %v1575_v12 = vshll.u32 %v3871_v62, 16  ;;  %v1568_v13 = vshrl.u32 %v3223_v42, 16  ;;  %v1572_v15 = vrot.slane %v1570_v1, 1  ;;  %v368_v16 = vrot.slane %v366_v2, 7 }
  0x4a   : > { %1228 = vrot.lane.b32.xlu0 %v1077_v32, %s3610_s19  ;;  %v1149_v57 = vsel %vm1029_vm4, %v1144_v44, %v1148_v24  ;;  %v790_v4 = vld [vmem:[#allocation2 + $0x78] sm:$0xf]  ;;  %v3878_v48 = vld [vmem:[#allocation2 + $0x7c] sm:$0xf]  ;;  %v369_v19 = vshll.u32 %v3496_v49, 16  ;;  %v3499_v24 = vld [vmem:[%s3657_s17 + $0x20] sm:$0xff]   ;;  %v3255_v34 = vcombine.low %v822_v20, %v3838_v26  ;;  %v3261_v56 = vcombine.low %v828_v14, %v3851_v41 }
  0x4b   : > { %1240 = vrot.lane.b32.xlu1 %v1149_v57, %s3610_s19  ;;  %v3230_v11 = vcombine.low %v790_v4, %v3878_v48  ;;  %v1640_v59 = vshrl.u32 %v3229_v61, 16  ;;  %v1647_v27 = vshll.u32 %v3880_v5, 16  ;;  %v1644_v37 = vrot.slane %v1642_v10, 1 }
  0x4c   : > { %v1577_v53 = vrot.slane %v1575_v12, 1  ;;  %v3893_v18 = vld [vmem:[#allocation2 + $0x80] ss:$0 sps:$4 sm:$0x11]   ;;  %v1573_v9 = vor.u32 %v1572_v15, %v1568_v13  ;;  %v371_v33 = vor.u32 %v369_v19, %v368_v16  ;;  %v324_v40 = vshrl.u32 %v3499_v24, 16 }
  0x4d   : > { %v1654_v28 = vshll.u32 %v3230_v11, 16  ;;  %v1649_v36 = vrot.slane %v1647_v27, 1  ;;  %v1645_v30 = vor.u32 %v1644_v37, %v1640_v59  ;;  %v1652_v44 = vshrl.u32 %v3230_v11, 16  ;;  %v3924_v19 = vld [vmem:[#allocation2 + $0x7c] sm:$0xf] }
  0x4e   : > { %1355 = vrot.lane.b32.xlu0 %v1311_v50, %s3609_s18  ;;  %v778_v7 = vld [vmem:[#allocation2 + $0x30] sm:$0xf]  ;;  %v3887_v52 = vld [vmem:[#allocation2 + $0x34] sm:$0xf]  ;;  %v1578_v46 = vsel %vm1029_vm4, %v1573_v9, %v1577_v53  ;;  %v1659_v22 = vshll.u32 %v3893_v18, 16  ;;  %v452_v26 = vsel %vm3667_vm6, 0, %v371_v33 }
  0x4f   : > { %1367 = vrot.lane.b32.xlu1 %v1329_v0, %s3609_s18  ;;  %v3224_v25 = vcombine.low %v778_v7, %v3887_v52  ;;  %v1656_v45 = vrot.slane %v1654_v28, 1  ;;  %v3155_v54 = vcombine.low %v452_v26, %v452_v26  ;;  %v3156_v55 = vcombine.high %v452_v26, %v452_v26  ;;  %v823_v57 = vld [vmem:[#allocation2 + $0x30] sm:$0xe]  ;;  %v3919_v10 = vld [vmem:[#allocation2 + $0x34] sm:$0xf] }
  0x50   : > { %v3896_v32 = vld [vmem:[#allocation2 + $0x38] ss:$0 sps:$4 sm:$0x11]   ;;  %v326_v58 = vrot.slane %v324_v40, 7  ;;  %v1650_v60 = vsel %vm1029_vm4, %v1645_v30, %v1649_v36  ;;  %v1822_v47 = vrot.slane %v3871_v62, 1  ;;  %v1661_v0 = vrot.slane %v1659_v22, 1 }
  0x51   : > { %v1582_v31 = vshll.u32 %v3224_v25, 16  ;;  %v1580_v35 = vshrl.u32 %v3224_v25, 16  ;;  %v1587_v39 = vshll.u32 %v3896_v32, 16  ;;  %v1657_v51 = vor.u32 %v1656_v45, %v1652_v44  ;;  %683 = vst.msk [vmem:[#allocation2 + $0x84] sm:$0xf] %vm651_vm0, %v3155_v54 }
  0x52   : > { %1357 = vrot.lane.b32.xlu0 %v1314_v3, %s3609_s18  ;;  %684 = vst.msk [vmem:[#allocation2 + $0x88] sm:$0xf] %vm651_vm0, %v3156_v55  ;;  %v468_v41 = vsel %vm3667_vm6, %v368_v16, 0  ;;  %v462_v2 = vsel %vm3667_vm6, %v326_v58, 0  ;;  %v829_v3 = vld [vmem:[#allocation2 + $0x78] sm:$0xe]  ;;  %v3256_v4 = vcombine.low %v823_v57, %v3887_v52 }
  0x53   : > { %1369 = vrot.lane.b32.xlu1 %v1332_v6, %s3609_s18  ;;  %v1584_v38 = vrot.slane %v1582_v31, 1  ;;  %v1589_v50 = vrot.slane %v1587_v39, 1  ;;  %v841_v62 = vld [vmem:[#allocation2 + $0x30] sm:$0xf]  ;;  %v3139_v13 = vcombine.low %v462_v2, %v462_v2  ;;  %v1839_v15 = vrot.slane %v3261_v56, 1 }
  0x54   : > { %v853_v16 = vld [vmem:[#allocation2 + $0x78] sm:$0xf]  ;;  %v3262_v52 = vcombine.low %v829_v3, %v3878_v48  ;;  %v1662_v20 = vsel %vm1029_vm4, %v1657_v51, %v1661_v0  ;;  %v3271_v59 = vcombine.low %v841_v62, %v3919_v10  ;;  %v1824_v28 = vrot.slane %v3256_v4, 1  ;;  %v887_v39 = vld [vmem:[#allocation2 + $0x30] sm:$0xe] }
  0x55   : > { %v1585_v49 = vor.u32 %v1584_v38, %v1580_v35  ;;  %667 = vst.msk [vmem:[#allocation2 + $0x44] sm:$0x1] %vm654_vm1, %v3139_v13  ;;  %v1825_v37 = vrot.slane %v3896_v32, 1  ;;  %v3277_v48 = vcombine.low %v853_v16, %v3924_v19  ;;  %v1843_v31 = vrot.slane %v3893_v18, 1  ;;  %v728_v40 = vld [vmem:[#allocation2 + $0x78] sm:$0xf] }
  0x56   : > { %1467 = vrot.lane.b32.xlu0 %v3223_v42, %s3611_s20  ;;  %v327_v42 = vshll.u32 %v3499_v24, 16  ;;  %v2082_v9 = vshll.u32 %v3271_v59, 16  ;;  %v3942_v33 = vld [vmem:[#allocation2 + $0x38] ss:$0 sps:$4 sm:$0x11]   ;;  %v2080_v26 = vshrl.u32 %v3271_v59, 16 }
  0x57   : > { %1479 = vrot.lane.b32.xlu1 %v3229_v61, %s3611_s20  ;;  %v1821_v61 = vrot.slane %v3255_v34, 1  ;;  %v1590_v6 = vsel %vm1029_vm4, %v1585_v49, %v1589_v50  ;;  %v1826_v32 = vsel %vm1302_vm2, %v1824_v28, %v1825_v37  ;;  %v893_v34 = vld [vmem:[#allocation2 + $0x78] sm:$0xe]  ;;  %v2154_v36 = vshll.u32 %v3277_v48, 16  ;;  %v3950_v30 = vld [vmem:[#allocation2 + $0x7c] sm:$0xf] }
  0x58   : > { %v329_v1 = vor.u32 %v327_v42, %v326_v58  ;;  %v855_v35 = vld [vmem:[#allocation2 + $0x84] sm:$0xf]  ;;  %v3947_v38 = vld [vmem:[#allocation2 + $0x80] ss:$0 sps:$4 sm:$0x11]   ;;  %v2084_v49 = vrot.slane %v2082_v9, 1  ;;  %v3309_v56 = vcombine.low %v893_v34, %v3924_v19  ;;  %v3974_v2 = vcombine.low %v728_v40, %v3950_v30 }
  0x59   : > { %v1823_v27 = vsel %vm1302_vm2, %v1821_v61, %v1822_v47  ;;  %v3945_v14 = vld [vmem:[#allocation2 + $0x88] sm:$0xf]  ;;  %v716_v44 = vld [vmem:[#allocation2 + $0x30] sm:$0xf]  ;;  %v3952_v18 = vld [vmem:[#allocation2 + $0x34] sm:$0xf]  ;;  %v3303_v47 = vcombine.low %v887_v39, %v3919_v10 }
  0x5a   : > { %1469 = vrot.lane.b32.xlu0 %v3224_v25, %s3611_s20  ;;  %v446_v12 = vsel %vm3667_vm6, 0, %v329_v1  ;;  %v1840_v25 = vrot.slane %v3880_v5, 1  ;;  %v1842_v5 = vrot.slane %v3262_v52, 1  ;;  %v3278_v42 = vcombine.low %v855_v35, %v3945_v14  ;;  %v3982_v19 = vld [vmem:[#allocation2 + $0x80] ss:$0 sps:$4 sm:$0x11]  }
  0x5b   : > { %1481 = vrot.lane.b32.xlu1 %v3230_v11, %s3611_s20  ;;  %v3157_v11 = vcombine.low %v468_v41, %v468_v41  ;;  %v3137_v7 = vcombine.low %v446_v12, %v446_v12  ;;  %v3138_v24 = vcombine.high %v446_v12, %v446_v12  ;;  %v2087_v54 = vshll.u32 %v3942_v33, 16  ;;  %v3998_v39 = vld [vmem:[#allocation2 + $0x88] sm:$0xf] }
  0x5c   : > { %v1841_v53 = vsel %vm1302_vm2, %v1839_v15, %v1840_v25  ;;  %v1844_v45 = vsel %vm1302_vm2, %v1842_v5, %v1843_v31  ;;  %v3961_v55 = vld [vmem:[#allocation2 + $0x44] ss:$0 sps:$4 sm:$0x11]   ;;  %v3965_v57 = vcombine.low %v716_v44, %v3952_v18  ;;  %v2156_v51 = vrot.slane %v2154_v36, 1  ;;  %v3522_v25 = vld [vmem:[%s3657_s17 + $0x58] sm:$0xff]   ;;  %v3525_v5 = vld [vmem:[%s3657_s17 + $0x28] sm:$0xff]  }
  0x5d   : > { %685 = vst.msk [vmem:[#allocation2 + $0x8c] sm:$0x1] %vm654_vm1, %v3157_v11  ;;  %v2159_v61 = vshll.u32 %v3947_v38, 16  ;;  %v2166_v0 = vshll.u32 %v3278_v42, 16  ;;  %v2085_v1 = vor.u32 %v2084_v49, %v2080_v26  ;;  %v2089_v3 = vrot.slane %v2087_v54, 1 }
  0x5e   : > { %1739 = vrot.lane.b32.xlu0 %v1578_v46, %s3615_s28  ;;  %665 = vst.msk [vmem:[#allocation2 + $0x3c] sm:$0xf] %vm651_vm0, %v3137_v7  ;;  %666 = vst.msk [vmem:[#allocation2 + $0x40] sm:$0xf] %vm651_vm0, %v3138_v24  ;;  %v2099_v62 = vshll.u32 %v3961_v55, 16  ;;  %v1081_v12 = vshll.u32 %v3965_v57, 16 }
  0x5f   : > { %1751 = vrot.lane.b32.xlu1 %v1650_v60, %s3615_s28  ;;  %v2152_v60 = vshrl.u32 %v3277_v48, 16  ;;  %v3977_v11 = vld [vmem:[#allocation2 + $0x38] ss:$0 sps:$4 sm:$0x11]   ;;  %v2161_v13 = vrot.slane %v2159_v61, 1  ;;  %v2351_v15 = vrot.slane %v3309_v56, 1 }
  0x60   : > { %v2352_v16 = vrot.slane %v3947_v38, 1  ;;  %v2164_v7 = vshrl.u32 %v3278_v42, 16  ;;  %v2168_v24 = vrot.slane %v2166_v0, 1  ;;  %v2101_v28 = vrot.slane %v2099_v62, 1  ;;  %v730_v38 = vld [vmem:[#allocation2 + $0x84] sm:$0xf] }
  0x61   : > { %v2157_v10 = vor.u32 %v2156_v51, %v2152_v60  ;;  %v1153_v37 = vshll.u32 %v3974_v2, 16  ;;  %v2334_v31 = vrot.slane %v3942_v33, 1  ;;  %v1079_v9 = vshrl.u32 %v3965_v57, 16  ;;  %v894_v26 = vld [vmem:[#allocation2 + $0x84] sm:$0xe] }
  0x62   : > { %1741 = vrot.lane.b32.xlu0 %v1590_v6, %s3615_s28  ;;  %v1086_v34 = vshll.u32 %v3977_v11, 16  ;;  %v2353_v36 = vsel %vm1302_vm2, %v2351_v15, %v2352_v16  ;;  %v2169_v40 = vor.u32 %v2168_v24, %v2164_v7  ;;  %v1151_v33 = vshrl.u32 %v3974_v2, 16  ;;  %v4014_v0 = vld [vmem:[#allocation2 + $0x44] ss:$0 sps:$4 sm:$0x11]  }
  0x63   : > { %1753 = vrot.lane.b32.xlu1 %v1662_v20, %s3615_s28  ;;  %v2333_v20 = vrot.slane %v3303_v47, 1  ;;  %v2162_v35 = vsel %vm1029_vm4, %v2157_v10, %v2161_v13  ;;  %v1155_v49 = vrot.slane %v1153_v37, 1  ;;  %v373_v54 = vshrl.u32 %v3522_v25, 16 }
  0x64   : > { %v3971_v41 = vld [vmem:[#allocation2 + $0x8c] ss:$0 sps:$4 sm:$0x11]   ;;  %v1088_v60 = vrot.slane %v1086_v34, 1  ;;  %v4010_v51 = vcombine.low %v730_v38, %v3998_v39  ;;  %v376_v61 = vshll.u32 %v3522_v25, 16  ;;  %v4045_v38 = vld [vmem:[%s3657_s17 + $0x30] sm:$0xff]  }
  0x65   : > { %v843_v46 = vld [vmem:[#allocation2 + $0x3c] sm:$0xf]  ;;  %v3957_v22 = vld [vmem:[#allocation2 + $0x40] sm:$0xf]  ;;  %v2171_v52 = vshll.u32 %v3971_v41, 16  ;;  %v2335_v47 = vsel %vm1302_vm2, %v2333_v20, %v2334_v31  ;;  %v1156_v24 = vor.u32 %v1155_v49, %v1151_v33  ;;  %vm2605_vm14 = vcmask 228352  }
  0x66   : > { %1867 = vrot.lane.b32.xlu0 %v1823_v27, %s3613_s26  ;;  %v3272_v50 = vcombine.low %v843_v46, %v3957_v22  ;;  %v4005_v46 = vld [vmem:[#allocation2 + $0x30] sm:$0xe]  ;;  %v888_v56 = vld [vmem:[#allocation2 + $0x3c] sm:$0xe]  ;;  %v4036_v31 = vld [vmem:[%s3657_s17 + $0x60] sm:$0xff]   ;;  %vm2638_vm15 = vcmask 261120  }
  0x67   : > { %1879 = vrot.lane.b32.xlu1 %v1841_v53, %s3613_s26  ;;  %v3989_v53 = vld [vmem:[#allocation2 + $0x40] sm:$0xf]  ;;  %v2173_v44 = vrot.slane %v2171_v52, 1  ;;  %v3209_v10 = vcombine.low %v4005_v46, %v3952_v18  ;;  %v3304_v13 = vcombine.low %v888_v56, %v3957_v22  ;;  %v4028_v25 = vld [vmem:[#allocation2 + $0x8c] ss:$0 sps:$4 sm:$0x11]  }
  0x68   : > { %v2094_v58 = vshll.u32 %v3272_v50, 16  ;;  %v2092_v4 = vshrl.u32 %v3272_v50, 16  ;;  %v1098_v18 = vshll.u32 %v4014_v0, 16  ;;  %vm2691_vm3 = vcmask 293888  }
  0x69   : > { %v2174_v62 = vsel %vm1029_vm4, %v2169_v40, %v2173_v44 }
  0x6a   : > { %1869 = vrot.lane.b32.xlu0 %v1826_v32, %s3613_s26  ;;  %v2096_v6 = vrot.slane %v2094_v58, 1  ;;  %v1083_v32 = vrot.slane %v1081_v12, 1 }
  0x6b   : > { %1881 = vrot.lane.b32.xlu1 %v1844_v45, %s3613_s26 }
  0x6c   : > { %v2097_v27 = vor.u32 %v2096_v6, %v2092_v4  ;;  %v1084_v58 = vor.u32 %v1083_v32, %v1079_v9  ;;  %v334_v4 = vshll.u32 %v3525_v5, 16  ;;  %v3310_v6 = vcombine.low %v894_v26, %v3945_v14 }
  0x6d   : > { %v1165_v14 = vshll.u32 %v4010_v51, 16  ;;  %v2336_v9 = vrot.slane %v3304_v13, 1  ;;  %v2337_v32 = vrot.slane %v3961_v55, 1  ;;  %v3544_v55 = vld [vmem:[%s4849_s1 + $0x10] ss:$0 sps:$4 sm:$0x33]  }
  0x6e   : > { %1979 = vrot.lane.b32.xlu0 %v3271_v59, %s3612_s21  ;;  %v2090_v59 = vsel %vm1029_vm4, %v2085_v1, %v2089_v3  ;;  %v375_v1 = vrot.slane %v373_v54, 7  ;;  %v331_v3 = vshrl.u32 %v3525_v5, 16  ;;  %v1089_v52 = vsel %vm1029_vm4, %v1084_v58, %v1088_v60  ;;  %v766_v54 = vld [vmem:[#allocation2 + $0x78] sm:$0xe]  ;;  %3426 = vmatprep.subr.msk.bf16.mxu0 %vm2724_vm7, %v3544_v55 }
  0x6f   : > { %1991 = vrot.lane.b32.xlu1 %v3277_v48, %s3612_s21  ;;  %v718_v48 = vld [vmem:[#allocation2 + $0x3c] sm:$0xf]  ;;  %v2354_v40 = vrot.slane %v3310_v6, 1  ;;  %v2355_v26 = vrot.slane %v3971_v41, 1  ;;  %v1167_v49 = vrot.slane %v1165_v14, 1  ;;  %v1100_v60 = vrot.slane %v1098_v18, 1  ;;  %3427 = vmatprep.subr.msk.bf16.mxu1 %vm2724_vm7, %v3544_v55 }
  0x70   : > { %v4003_v45 = vcombine.low %v718_v48, %v3989_v53  ;;  %v378_v16 = vor.u32 %v376_v61, %v375_v1  ;;  %v333_v7 = vrot.slane %v331_v3, 7  ;;  %v469_v20 = vsel %vm3667_vm6, %v375_v1, 0  ;;  %v761_v61 = vld [vmem:[#allocation2 + $0x3c] sm:$0xe]  ;;  %v4073_v14 = vld [vmem:[#allocation2 + $0x40] sm:$0xf] }
  0x71   : > { %v380_v41 = vshrl.u32 %v4036_v31, 16  ;;  %v3215_v1 = vcombine.low %v766_v54, %v3950_v30  ;;  %v2356_v6 = vsel %vm1302_vm2, %v2354_v40, %v2355_v26  ;;  %v1315_v13 = vrot.slane %v3209_v10, 1  ;;  %v4092_v40 = vld [vmem:[#allocation2 + $0x44] ss:$0 sps:$4 sm:$0x11]  }
  0x72   : > { %1981 = vrot.lane.b32.xlu0 %v3272_v50, %s3612_s21  ;;  %v1158_v50 = vshll.u32 %v3982_v19, 16  ;;  %v1093_v12 = vshll.u32 %v4003_v45, 16  ;;  %v453_v22 = vsel %vm3667_vm6, 0, %v378_v16  ;;  %v3210_v30 = vcombine.low %v761_v61, %v3989_v53 }
  0x73   : > { %1993 = vrot.lane.b32.xlu1 %v3278_v42, %s3612_s21  ;;  %v2102_v42 = vsel %vm1029_vm4, %v2097_v27, %v2101_v28  ;;  %v3160_v27 = vcombine.low %v469_v20, %v469_v20  ;;  %v1091_v28 = vshrl.u32 %v4003_v45, 16  ;;  %v3158_v48 = vcombine.low %v453_v22, %v453_v22 }
  0x74   : > { %v1160_v15 = vrot.slane %v1158_v50, 1  ;;  %v1095_v37 = vrot.slane %v1093_v12, 1  ;;  %v3159_v5 = vcombine.high %v453_v22, %v453_v22  ;;  %v1170_v50 = vshll.u32 %v4028_v25, 16 }
  0x75   : > { %688 = vst.msk [vmem:[#allocation2 + $0x98] sm:$0x1] %vm654_vm1, %v3160_v27  ;;  %v382_v3 = vrot.slane %v380_v41, 7  ;;  %v383_v20 = vshll.u32 %v4036_v31, 16  ;;  %v341_v18 = vshll.u32 %v4045_v38, 16  ;;  %v1334_v27 = vrot.slane %v3982_v19, 1 }
  0x76   : > { %2251 = vrot.lane.b32.xlu0 %v2090_v59, %s3616_s29  ;;  %v336_v59 = vor.u32 %v334_v4, %v333_v7  ;;  %686 = vst.msk [vmem:[#allocation2 + $0x90] sm:$0xf] %vm651_vm0, %v3158_v48  ;;  %687 = vst.msk [vmem:[#allocation2 + $0x94] sm:$0xf] %vm651_vm0, %v3159_v5  ;;  %v1161_v56 = vsel %vm1029_vm4, %v1156_v24, %v1160_v15  ;;  %v1096_v58 = vor.u32 %v1095_v37, %v1091_v28  ;;  %v767_v15 = vld [vmem:[#allocation2 + $0x84] sm:$0xe] }
  0x77   : > { %2263 = vrot.lane.b32.xlu1 %v2162_v35, %s3616_s29  ;;  %v463_v35 = vsel %vm3667_vm6, %v333_v7, 0  ;;  %v2726_v4 = vsel %vm2724_vm7, %v3544_v55, 0  ;;  %v1172_v12 = vrot.slane %v1170_v50, 1  ;;  %v1316_v7 = vrot.slane %v3977_v11, 1  ;;  %v780_v24 = vld [vmem:[#allocation2 + $0x3c] sm:$0xf] }
  0x78   : > { %v447_v34 = vsel %vm3667_vm6, 0, %v336_v59  ;;  %v3142_v46 = vcombine.low %v463_v35, %v463_v35  ;;  %3387 = vmatpush3.bf16.msra.mxu0 %v2726_v4  ;;  %v1101_v16 = vsel %vm1029_vm4, %v1096_v58, %v1100_v60  ;;  %3425 = vmatpush3.bf16.msra.mxu1 %v2726_v4  ;;  %v1333_v59 = vrot.slane %v3215_v1, 1  ;;  %v792_v31 = vld [vmem:[#allocation2 + $0x84] sm:$0xf] }
  0x79   : > { %v3140_v44 = vcombine.low %v447_v34, %v447_v34  ;;  %v3141_v33 = vcombine.high %v447_v34, %v447_v34  ;;  %v3216_v11 = vcombine.low %v767_v15, %v3998_v39  ;;  %v1317_v28 = vsel %vm1302_vm2, %v1315_v13, %v1316_v7 }
  0x7a   : > { %2253 = vrot.lane.b32.xlu0 %v2102_v42, %s3616_s29  ;;  %v1163_v42 = vshrl.u32 %v4010_v51, 16  ;;  %670 = vst.msk [vmem:[#allocation2 + $0x50] sm:$0x1] %vm654_vm1, %v3142_v46  ;;  %v3225_v37 = vcombine.low %v780_v24, %v4073_v14  ;;  %v1318_v48 = vrot.slane %v3210_v30, 1  ;;  %v1319_v5 = vrot.slane %v4014_v0, 1 }
  0x7b   : > { %2265 = vrot.lane.b32.xlu1 %v2174_v62, %s3616_s29  ;;  %668 = vst.msk [vmem:[#allocation2 + $0x48] sm:$0xf] %vm651_vm0, %v3140_v44  ;;  %669 = vst.msk [vmem:[#allocation2 + $0x4c] sm:$0xf] %vm651_vm0, %v3141_v33  ;;  %v1337_v19 = vrot.slane %v4028_v25, 1  ;;  %v1335_v44 = vsel %vm1302_vm2, %v1333_v59, %v1334_v27 }
  0x7c   : > { %v1168_v62 = vor.u32 %v1167_v49, %v1163_v42  ;;  %v1594_v33 = vshll.u32 %v3225_v37, 16  ;;  %v1320_v55 = vsel %vm1302_vm2, %v1318_v48, %v1319_v5  ;;  %v4124_v15 = vld [vmem:[#allocation2 + $0x98] ss:$0 sps:$4 sm:$0x11]  }
  0x7d   : > { %v794_v46 = vld [vmem:[#allocation2 + $0x90] sm:$0xf]  ;;  %v4098_v26 = vld [vmem:[#allocation2 + $0x94] sm:$0xf] }
  0x7e   : > { %2379 = vrot.lane.b32.xlu0 %v2335_v47, %s3614_s27  ;;  %v338_v47 = vshrl.u32 %v4045_v38, 16  ;;  %v1173_v53 = vsel %vm1029_vm4, %v1168_v62, %v1172_v12  ;;  %v1336_v38 = vrot.slane %v3216_v11, 1  ;;  %v3232_v61 = vcombine.low %v794_v46, %v4098_v26  ;;  %v824_v11 = vld [vmem:[#allocation2 + $0x3c] sm:$0xe]  ;;  %v857_v46 = vld [vmem:[#allocation2 + $0x90] sm:$0xf] }
  0x7f   : > { %2391 = vrot.lane.b32.xlu1 %v2353_v36, %s3614_s27  ;;  %v2338_v36 = vsel %vm1302_vm2, %v2336_v9, %v2337_v32  ;;  %v4086_v9 = vld [vmem:[#allocation2 + $0x88] sm:$0xf]  ;;  %v385_v32 = vor.u32 %v383_v20, %v382_v3  ;;  %v1596_v1 = vrot.slane %v1594_v33, 1 }
  0x80   : > { %v340_v10 = vrot.slane %v338_v47, 7  ;;  %v3231_v0 = vcombine.low %v792_v31, %v4086_v9  ;;  %v1338_v54 = vsel %vm1302_vm2, %v1336_v38, %v1337_v19  ;;  %v1592_v47 = vshrl.u32 %v3225_v37, 16 }
  0x81   : > { %v454_v49 = vsel %vm3667_vm6, 0, %v385_v32  ;;  %v4115_v62 = vld [vmem:[#allocation2 + $0x50] ss:$0 sps:$4 sm:$0x11]   ;;  %v1678_v30 = vshll.u32 %v3232_v61, 16  ;;  %v1676_v48 = vshrl.u32 %v3232_v61, 16 }
  0x82   : > { %1230 = vrot.lane.b32.xlu0 %v1089_v52, %s3610_s19  ;;  %v470_v52 = vsel %vm3667_vm6, %v382_v3, 0  ;;  %v343_v39 = vor.u32 %v341_v18, %v340_v10  ;;  %v782_v34 = vld [vmem:[#allocation2 + $0x48] sm:$0xf]  ;;  %v4088_v35 = vld [vmem:[#allocation2 + $0x4c] sm:$0xf]  ;;  %v3161_v50 = vcombine.low %v454_v49, %v454_v49  ;;  %v3162_v58 = vcombine.high %v454_v49, %v454_v49 }
  0x83   : > { %1242 = vrot.lane.b32.xlu1 %v1161_v56, %s3610_s19  ;;  %v3163_v22 = vcombine.low %v470_v52, %v470_v52  ;;  %v3226_v42 = vcombine.low %v782_v34, %v4088_v35  ;;  %v4107_v56 = vld [vmem:[#allocation2 + $0x8c] ss:$0 sps:$4 sm:$0x11]   ;;  %v464_v12 = vsel %vm3667_vm6, %v340_v10, 0  ;;  %v1664_v24 = vshrl.u32 %v3231_v0, 16 }
  0x84   : > { %v448_v25 = vsel %vm3667_vm6, 0, %v343_v39  ;;  %689 = vst.msk [vmem:[#allocation2 + $0x9c] sm:$0xf] %vm651_vm0, %v3161_v50  ;;  %690 = vst.msk [vmem:[#allocation2 + $0xa0] sm:$0xf] %vm651_vm0, %v3162_v58  ;;  %v1671_v13 = vshll.u32 %v4107_v56, 16  ;;  %v1597_v20 = vor.u32 %v1596_v1, %v1592_v47  ;;  %v3257_v34 = vcombine.low %v824_v11, %v4073_v14 }
  0x85   : > { %691 = vst.msk [vmem:[#allocation2 + $0xa4] sm:$0x1] %vm654_vm1, %v3163_v22  ;;  %v3143_v60 = vcombine.low %v448_v25, %v448_v25  ;;  %v3144_v41 = vcombine.high %v448_v25, %v448_v25  ;;  %v1606_v4 = vshll.u32 %v3226_v42, 16  ;;  %v1604_v22 = vshrl.u32 %v3226_v42, 16  ;;  %v845_v31 = vld [vmem:[#allocation2 + $0x48] sm:$0xf] }
  0x86   : > { %2381 = vrot.lane.b32.xlu0 %v2338_v36, %s3614_s27  ;;  %v1666_v36 = vshll.u32 %v3231_v0, 16  ;;  %v1611_v10 = vshll.u32 %v4115_v62, 16  ;;  %v1673_v27 = vrot.slane %v1671_v13, 1  ;;  %v1680_v5 = vrot.slane %v1678_v30, 1  ;;  %v4136_v32 = vld [vmem:[#allocation2 + $0x4c] sm:$0xf] }
  0x87   : > { %2393 = vrot.lane.b32.xlu1 %v2356_v6, %s3614_s27  ;;  %v1599_v6 = vshll.u32 %v4092_v40, 16  ;;  %671 = vst.msk [vmem:[#allocation2 + $0x54] sm:$0xf] %vm651_vm0, %v3143_v60  ;;  %672 = vst.msk [vmem:[#allocation2 + $0x58] sm:$0xf] %vm651_vm0, %v3144_v41  ;;  %v1608_v59 = vrot.slane %v1606_v4, 1 }
  0x88   : > { %v1668_v52 = vrot.slane %v1666_v36, 1  ;;  %v830_v39 = vld [vmem:[#allocation2 + $0x84] sm:$0xe]  ;;  %v1681_v25 = vor.u32 %v1680_v5, %v1676_v48  ;;  %v1827_v36 = vrot.slane %v3257_v34, 1  ;;  %v4162_v1 = vld [vmem:[%s3657_s17 + $0x68] sm:$0xff]   ;;  %v1846_v13 = vrot.slane %v4107_v56, 1 }
  0x89   : > { %v1601_v18 = vrot.slane %v1599_v6, 1  ;;  %v1609_v19 = vor.u32 %v1608_v59, %v1604_v22  ;;  %v3263_v49 = vcombine.low %v830_v39, %v4086_v9  ;;  %v1849_v56 = vrot.slane %v4124_v15, 1  ;;  %v4190_v48 = vld [vmem:[#allocation2 + $0x90] sm:$0xe]  ;;  %v4192_v5 = vld [vmem:[#allocation2 + $0x48] sm:$0xe] }
  0x8a   : > { %1232 = vrot.lane.b32.xlu0 %v1101_v16, %s3610_s19  ;;  %v3145_v16 = vcombine.low %v464_v12, %v464_v12 }
  0x8b   : > { %1244 = vrot.lane.b32.xlu1 %v1173_v53, %s3610_s19  ;;  %v1602_v38 = vsel %vm1029_vm4, %v1597_v20, %v1601_v18  ;;  %v4176_v20 = vld [vmem:[#allocation2 + $0x98] ss:$0 sps:$4 sm:$0x11]   ;;  %v859_v34 = vld [vmem:[#allocation2 + $0x9c] sm:$0xf] }
  0x8c   : > { %673 = vst.msk [vmem:[#allocation2 + $0x5c] sm:$0x1] %vm654_vm1, %v3145_v16 }
  0x8d   : > { %v4112_v3 = vpop.permute.xlu1 %1351 }
  0x8e   : > { %1359 = vrot.lane.b32.xlu0 %v1317_v28, %s3609_s18  ;;  %v1683_v28 = vshll.u32 %v4124_v15, 16  ;;  %v847_v22 = vld [vmem:[#allocation2 + $0x54] sm:$0xf]  ;;  %v4181_v59 = vld [vmem:[#allocation2 + $0x58] sm:$0xf] }
  0x8f   : > { %1371 = vrot.lane.b32.xlu1 %v1335_v44, %s3609_s18  ;;  %v1613_v44 = vrot.slane %v1611_v10, 1  ;;  %v387_v10 = vshrl.u32 %v4162_v1, 16 }
  0x90   : > { %v1685_v50 = vrot.slane %v1683_v28, 1 }
  0x91   : > { %v1614_v41 = vsel %vm1029_vm4, %v1609_v19, %v1613_v44  ;;  %v4200_v19 = vcombine.low %v847_v22, %v4181_v59 }
  0x92   : > { %1361 = vrot.lane.b32.xlu0 %v1320_v55, %s3609_s18  ;;  %v4127_v7 = vpop.permute.xlu0 %1222  ;;  %v4143_v55 = vld [vmem:[#allocation2 + $0x94] sm:$0xf]  ;;  %v1686_v12 = vsel %vm1029_vm4, %v1681_v25, %v1685_v50 }
  0x93   : > { %1373 = vrot.lane.b32.xlu1 %v1338_v54, %s3609_s18  ;;  %v831_v54 = vld [vmem:[#allocation2 + $0x90] sm:$0xe]  ;;  %v4159_v9 = vcombine.low %v857_v46, %v4143_v55 }
  0x94   : > { %v3264_v6 = vcombine.low %v831_v54, %v4098_v26  ;;  %v732_v54 = vld [vmem:[#allocation2 + $0x90] sm:$0xf] }
  0x95   : > { %v2178_v26 = vshll.u32 %v4159_v9, 16 }
  0x96   : > { %1471 = vrot.lane.b32.xlu0 %v3225_v37, %s3611_s20  ;;  %v1669_v37 = vor.u32 %v1668_v52, %v1664_v24  ;;  %v1831_v52 = vrot.slane %v4115_v62, 1 }
  0x97   : > { %1483 = vrot.lane.b32.xlu1 %v3231_v0, %s3611_s20  ;;  %v825_v0 = vld [vmem:[#allocation2 + $0x48] sm:$0xe]  ;;  %v2180_v46 = vrot.slane %v2178_v26, 1 }
  0x98   : > { %v1674_v14 = vsel %vm1029_vm4, %v1669_v37, %v1673_v27  ;;  %v3258_v58 = vcombine.low %v825_v0, %v4088_v35  ;;  %v4166_v35 = vld [vmem:[#allocation2 + $0x50] ss:$0 sps:$4 sm:$0x11]   ;;  %v1848_v37 = vrot.slane %v3264_v6, 1  ;;  %v2176_v0 = vshrl.u32 %v4159_v9, 16 }
  0x99   : > { %v4132_v53 = vpop.permute.xlu1 %1465  ;;  %v2111_v27 = vshll.u32 %v4166_v35, 16  ;;  %v3311_v6 = vcombine.low %v4190_v48, %v4143_v55 }
  0x9a   : > { %1473 = vrot.lane.b32.xlu0 %v3226_v42, %s3611_s20  ;;  %v4146_v42 = vcombine.low %v845_v31, %v4136_v32  ;;  %v1830_v24 = vrot.slane %v3258_v58, 1  ;;  %v4194_v31 = vld [vmem:[#allocation2 + $0xa4] ss:$0 sps:$4 sm:$0x11]   ;;  %v390_v58 = vshll.u32 %v4162_v1, 16  ;;  %v3305_v1 = vcombine.low %v4192_v5, %v4136_v32 }
  0x9b   : > { %1485 = vrot.lane.b32.xlu1 %v3232_v61, %s3611_s20  ;;  %v1828_v61 = vrot.slane %v4092_v40, 1  ;;  %v1845_v40 = vrot.slane %v3263_v49, 1  ;;  %v2183_v49 = vshll.u32 %v4176_v20, 16  ;;  %v2113_v50 = vrot.slane %v2111_v27, 1 }
  0x9c   : > { %v4140_v33 = vpop.permute.xlu0 %1463  ;;  %v2106_v4 = vshll.u32 %v4146_v42, 16  ;;  %v2104_v11 = vshrl.u32 %v4146_v42, 16  ;;  %v1832_v15 = vsel %vm1302_vm2, %v1830_v24, %v1831_v52  ;;  %v2181_v52 = vor.u32 %v2180_v46, %v2176_v0 }
  0x9d   : > { %v1829_v30 = vsel %vm1302_vm2, %v1827_v36, %v1828_v61  ;;  %v1847_v28 = vsel %vm1302_vm2, %v1845_v40, %v1846_v13  ;;  %v4216_v61 = vld [vmem:[#allocation2 + $0x94] sm:$0xf]  ;;  %v4227_v40 = vld [vmem:[#allocation2 + $0x5c] ss:$0 sps:$4 sm:$0x11]   ;;  %v389_v13 = vrot.slane %v387_v10, 7 }
  0x9e   : > { %1743 = vrot.lane.b32.xlu0 %v1602_v38, %s3615_s28  ;;  %v4152_v60 = vpop.permute.xlu1 %1977  ;;  %v2108_v62 = vrot.slane %v2106_v4, 1  ;;  %v4197_v38 = vld [vmem:[#allocation2 + $0xa0] sm:$0xf]  ;;  %v720_v4 = vld [vmem:[#allocation2 + $0x48] sm:$0xf]  ;;  %v2185_v26 = vrot.slane %v2183_v49, 1 }
  0x9f   : > { %1755 = vrot.lane.b32.xlu1 %v1674_v14, %s3615_s28  ;;  %v2409_v14 = vsel %vm2407_vm8, %v3660_v8, %v4127_v7  ;;  %v4214_v36 = vcombine.low %v859_v34, %v4197_v38  ;;  %v4218_v8 = vld [vmem:[#allocation2 + $0x4c] sm:$0xf]  ;;  %v2195_v22 = vshll.u32 %v4194_v31, 16  ;;  %v392_v10 = vor.u32 %v390_v58, %v389_v13 }
  0xa0   : > { %v4156_v47 = vpop.permute.xlu0 %1975  ;;  %v2109_v25 = vor.u32 %v2108_v62, %v2104_v11  ;;  %v4237_v11 = vcombine.low %v720_v4, %v4218_v8  ;;  %v2116_v27 = vshrl.u32 %v4200_v19, 16 }
  0xa1   : > { %v2190_v62 = vshll.u32 %v4214_v36, 16 }
  0xa2   : > { %1745 = vrot.lane.b32.xlu0 %v1614_v41, %s3615_s28  ;;  %v4172_v16 = vpop.permute.xlu1 %1353  ;;  %v1850_v41 = vsel %vm1302_vm2, %v1848_v37, %v1849_v56  ;;  %v2114_v32 = vsel %vm1029_vm4, %v2109_v25, %v2113_v50  ;;  %v2188_v25 = vshrl.u32 %v4214_v36, 16  ;;  %v1105_v50 = vshll.u32 %v4237_v11, 16 }
  0xa3   : > { %1757 = vrot.lane.b32.xlu1 %v1686_v12, %s3615_s28  ;;  %v2118_v12 = vshll.u32 %v4200_v19, 16  ;;  %v2192_v58 = vrot.slane %v2190_v62, 1  ;;  %v2339_v62 = vrot.slane %v3305_v1, 1 }
  0xa4   : > { %v4178_v18 = vpop.permute.xlu0 %1863 }
  0xa5   : > { %v2120_v5 = vrot.slane %v2118_v12, 1 }
  0xa6   : > { %1871 = vrot.lane.b32.xlu0 %v1829_v30, %s3613_s26  ;;  %v1866_v39 = vpop.permute.xlu1 %1865  ;;  %v2442_v30 = vsel %vm2440_vm9, %v2409_v14, %v4112_v3 }
  0xa7   : > { %1883 = vrot.lane.b32.xlu1 %v1847_v28, %s3613_s26  ;;  %v4246_v28 = vcombine.low %v732_v54, %v4216_v61  ;;  %v2121_v4 = vor.u32 %v2120_v5, %v2116_v27 }
  0xa8   : > { %v4202_v44 = vpop.permute.xlu0 %2375 }
  0xa9   : > { %4857 = vst [vmem:[#allocation4_spill] sm:$0xff] %v4246_v28  ;;  %v1177_v5 = vshll.u32 %v4246_v28, 16 }
  0xaa   : > { %1873 = vrot.lane.b32.xlu0 %v1832_v15, %s3613_s26  ;;  %v4220_v7 = vpop.permute.xlu1 %2377  ;;  %v2123_v15 = vshll.u32 %v4227_v40, 16 }
  0xab   : > { %1885 = vrot.lane.b32.xlu1 %v1850_v41, %s3613_s26 }
  0xac   : > { %v1225_v24 = vpop.permute.xlu0 %1224  ;;  %v2125_v12 = vrot.slane %v2123_v15, 1  ;;  %v1103_v15 = vshrl.u32 %v4237_v11, 16 }
  0xad   : > { %v2411_v56 = vsel %vm2407_vm8, %v3735_v29, %v1225_v24 }
  0xae   : > { %v2444_v3 = vsel %vm2440_vm9, %v2411_v56, %v4172_v16  ;;  %1983 = vrot.lane.b32.xlu0 %v4146_v42, %s3612_s21  ;;  %v1738_v29 = vpop.permute.xlu1 %1737  ;;  %v455_v16 = vsel %vm3667_vm6, 0, %v392_v10  ;;  %v2475_v42 = vsel %vm2473_vm10, %v2442_v30, %v4140_v33  ;;  %v2186_v10 = vsel %vm1029_vm4, %v2181_v52, %v2185_v26 }
  0xaf   : > { %v2477_v37 = vsel %vm2473_vm10, %v2444_v3, %v4132_v53  ;;  %v3164_v46 = vcombine.low %v455_v16, %v455_v16  ;;  %v3165_v49 = vcombine.high %v455_v16, %v455_v16  ;;  %1995 = vrot.lane.b32.xlu1 %v4159_v9, %s3612_s21  ;;  %v4268_v9 = vld [vmem:[#allocation2 + $0x50] ss:$0 sps:$4 sm:$0x11]   ;;  %v2197_v3 = vrot.slane %v2195_v22, 1  ;;  %v734_v22 = vld [vmem:[#allocation2 + $0x9c] sm:$0xf] }
  0xb0   : > { %v2510_v34 = vsel %vm2506_vm11, %v2477_v37, %v1738_v29  ;;  %v1736_v0 = vpop.permute.xlu0 %1735  ;;  %v722_v29 = vld [vmem:[#allocation2 + $0x54] sm:$0xf]  ;;  %v4281_v37 = vld [vmem:[#allocation2 + $0x58] sm:$0xf]  ;;  %v2193_v52 = vor.u32 %v2192_v58, %v2188_v25  ;;  %v1107_v26 = vrot.slane %v1105_v50, 1  ;;  %v1175_v50 = vshrl.u32 %v4246_v28, 16 }
  0xb1   : > { %v2543_v14 = vsel %vm2539_vm12, %v2510_v34, %v1866_v39  ;;  %v2508_v53 = vsel %vm2506_vm11, %v2475_v42, %v1736_v0  ;;  %692 = vst.msk [vmem:[#allocation2 + $0xa8] sm:$0xf] %vm651_vm0, %v3164_v46  ;;  %693 = vst.msk [vmem:[#allocation2 + $0xac] sm:$0xf] %vm651_vm0, %v3165_v49  ;;  %v471_v39 = vsel %vm3667_vm6, %v389_v13, 0  ;;  %v2340_v42 = vrot.slane %v4166_v35, 1 }
  0xb2   : > { %v2541_v33 = vsel %vm2539_vm12, %v2508_v53, %v4178_v18  ;;  %1985 = vrot.lane.b32.xlu0 %v4200_v19, %s3612_s21  ;;  %v2576_v54 = vsel %vm2572_vm13, %v2543_v14, %v4152_v60  ;;  %v2250_v41 = vpop.permute.xlu1 %2249  ;;  %v4276_v19 = vld [vmem:[#allocation2 + $0x98] ss:$0 sps:$4 sm:$0x11]   ;;  %v3166_v30 = vcombine.low %v471_v39, %v471_v39  ;;  %v3576_v60 = vld [vmem:[%s3657_s17 + $0x70] sm:$0xff]   ;;  %v4295_v16 = vld [vmem:[#allocation2 + $0xa0] sm:$0xf]  ;;  %v4301_v34 = vcombine.low %v722_v29, %v4281_v37 }
  0xb3   : > { %v2574_v18 = vsel %vm2572_vm13, %v2541_v33, %v4156_v47  ;;  %v2609_v24 = vsel %vm2605_vm14, %v2576_v54, %v2250_v41  ;;  %1997 = vrot.lane.b32.xlu1 %v4214_v36, %s3612_s21  ;;  %v890_v47 = vld [vmem:[#allocation2 + $0x54] sm:$0xe]  ;;  %v1110_v36 = vshll.u32 %v4268_v9, 16  ;;  %v2357_v0 = vrot.slane %v3311_v6, 1  ;;  %v896_v53 = vld [vmem:[#allocation2 + $0x9c] sm:$0xe] }
  0xb4   : > { %v2248_v56 = vpop.permute.xlu0 %2247  ;;  %v2642_v27 = vsel %vm2638_vm15, %v2609_v24, %v4220_v7  ;;  %694 = vst.msk [vmem:[#allocation2 + $0xb0] sm:$0x1] %vm654_vm1, %v3166_v30  ;;  %v2126_v7 = vsel %vm1029_vm4, %v2121_v4, %v2125_v12  ;;  %4858 = vst [vmem:[#allocation5_spill] sm:$0xff] %v4301_v34  ;;  %v2358_v46 = vrot.slane %v4176_v20, 1  ;;  %v1182_v49 = vshll.u32 %v4276_v19, 16 }
  0xb5   : > { %v2607_v13 = vsel %vm2605_vm14, %v2574_v18, %v2248_v56  ;;  %v397_v14 = vshll.u32 %v3576_v60, 16  ;;  %v3306_v35 = vcombine.low %v890_v47, %v4181_v59  ;;  %v1179_v33 = vrot.slane %v1177_v5, 1  ;;  %v4321_v6 = vld [vmem:[#allocation2 + $0x5c] ss:$0 sps:$4 sm:$0x11]  }
  0xb6   : > { %2255 = vrot.lane.b32.xlu0 %v2114_v32, %s3616_s29  ;;  %v2640_v1 = vsel %vm2638_vm15, %v2607_v13, %v4202_v44  ;;  %v394_v32 = vshrl.u32 %v3576_v60, 16  ;;  %v4313_v25 = vpop.permute.xlu1 %1226  ;;  %v4317_v54 = vcombine.low %v734_v22, %v4295_v16  ;;  %v2198_v55 = vsel %vm1029_vm4, %v2193_v52, %v2197_v3  ;;  %v4329_v12 = vld [vmem:[#allocation2 + $0xa4] ss:$0 sps:$4 sm:$0x11]   ;;  %v762_v29 = vld [vmem:[#allocation2 + $0x48] sm:$0xe] }
  0xb7   : > { %3388 = vmatprep.mubr.msk.bf16.mxu0 %vm2691_vm3, %v2640_v1  ;;  %2267 = vrot.lane.b32.xlu1 %v2186_v10, %s3616_s29  ;;  %v1108_v20 = vor.u32 %v1107_v26, %v1103_v15  ;;  %v1112_v48 = vrot.slane %v1110_v36, 1  ;;  %v2341_v59 = vsel %vm1302_vm2, %v2339_v62, %v2340_v42  ;;  %v1117_v39 = vshll.u32 %v4301_v34, 16 }
  0xb8   : > { %3389 = vmatmul.mubr.msk.bf16.vlgmr.msra.gmra.mrb[0].mxu0 %vm2691_vm3, %v2642_v27  ;;  %v4304_v44 = vpop.permute.xlu0 %1238  ;;  %4859 = vst [vmem:[#allocation6_spill] sm:$0xff] %v4317_v54  ;;  %v396_v58 = vrot.slane %v394_v32, 7  ;;  %v3312_v41 = vcombine.low %v896_v53, %v4197_v38  ;;  %v2359_v4 = vsel %vm1302_vm2, %v2357_v0, %v2358_v46  ;;  %v1180_v60 = vor.u32 %v1179_v33, %v1175_v50  ;;  %v763_v50 = vld [vmem:[#allocation2 + $0x54] sm:$0xe]  ;;  %v736_v28 = vld [vmem:[#allocation2 + $0xa8] sm:$0xf] }
  0xb9   : > { %v1184_v24 = vrot.slane %v1182_v49, 1  ;;  %v2342_v56 = vrot.slane %v3306_v35, 1  ;;  %v2343_v10 = vrot.slane %v4227_v40, 1  ;;  %v1113_v3 = vsel %vm1029_vm4, %v1108_v20, %v1112_v48 }
  0xba   : > { %2257 = vrot.lane.b32.xlu0 %v2126_v7, %s3616_s29  ;;  %v399_v30 = vor.u32 %v397_v14, %v396_v58  ;;  %v1189_v38 = vshll.u32 %v4317_v54, 16  ;;  %v1122_v62 = vshll.u32 %v4321_v6, 16  ;;  %v1115_v27 = vshrl.u32 %v4301_v34, 16  ;;  %v768_v14 = vld [vmem:[#allocation2 + $0x90] sm:$0xe] }
  0xbb   : > { %2269 = vrot.lane.b32.xlu1 %v2198_v55, %s3616_s29  ;;  %v1119_v5 = vrot.slane %v1117_v39, 1  ;;  %v1185_v52 = vsel %vm1029_vm4, %v1180_v60, %v1184_v24  ;;  %v2360_v26 = vrot.slane %v3312_v41, 1  ;;  %v2361_v36 = vrot.slane %v4194_v31, 1  ;;  %v784_v60 = vld [vmem:[#allocation2 + $0x54] sm:$0xf] }
  0xbc   : > { %v4326_v18 = vpop.permute.xlu0 %1228  ;;  %v456_v47 = vsel %vm3667_vm6, 0, %v399_v30  ;;  %v3211_v22 = vcombine.low %v762_v29, %v4218_v8  ;;  %v1187_v7 = vshrl.u32 %v4317_v54, 16  ;;  %v1191_v42 = vrot.slane %v1189_v38, 1  ;;  %v4370_v24 = vld [vmem:[#allocation2 + $0x58] sm:$0xf] }
  0xbd   : > { %v4339_v13 = vpop.permute.xlu1 %1240  ;;  %v3167_v15 = vcombine.low %v456_v47, %v456_v47  ;;  %v3168_v1 = vcombine.high %v456_v47, %v456_v47  ;;  %v1194_v32 = vshll.u32 %v4329_v12, 16  ;;  %v472_v0 = vsel %vm3667_vm6, %v396_v58, 0  ;;  %v769_v58 = vld [vmem:[#allocation2 + $0x9c] sm:$0xe] }
  0xbe   : > { %2383 = vrot.lane.b32.xlu0 %v2341_v59, %s3614_s27  ;;  %v2344_v31 = vsel %vm1302_vm2, %v2342_v56, %v2343_v10  ;;  %v1120_v49 = vor.u32 %v1119_v5, %v1115_v27  ;;  %v1124_v8 = vrot.slane %v1122_v62, 1  ;;  %v3169_v53 = vcombine.low %v472_v0, %v472_v0  ;;  %v796_v62 = vld [vmem:[#allocation2 + $0x9c] sm:$0xf]  ;;  %v4400_v0 = vld [vmem:[#allocation2 + $0xac] sm:$0xf] }
  0xbf   : > { %2395 = vrot.lane.b32.xlu1 %v2359_v4, %s3614_s27  ;;  %695 = vst.msk [vmem:[#allocation2 + $0xb4] sm:$0xf] %vm651_vm0, %v3167_v15  ;;  %696 = vst.msk [vmem:[#allocation2 + $0xb8] sm:$0xf] %vm651_vm0, %v3168_v1  ;;  %v2362_v33 = vsel %vm1302_vm2, %v2360_v26, %v2361_v36  ;;  %v1192_v55 = vor.u32 %v1191_v42, %v1187_v7  ;;  %v1196_v20 = vrot.slane %v1194_v32, 1  ;;  %v1321_v41 = vrot.slane %v3211_v22, 1 }
  0xc0   : > { %v4342_v40 = vpop.permute.xlu0 %1355  ;;  %697 = vst.msk [vmem:[#allocation2 + $0xbc] sm:$0x1] %vm654_vm1, %v3169_v53  ;;  %v3217_v48 = vcombine.low %v768_v14, %v4216_v61  ;;  %v1125_v39 = vsel %vm1029_vm4, %v1120_v49, %v1124_v8  ;;  %v1322_v4 = vrot.slane %v4268_v9, 1  ;;  %v3212_v30 = vcombine.low %v763_v50, %v4281_v37  ;;  %v4379_v9 = vld [vmem:[#allocation2 + $0xa0] sm:$0xf]  ;;  %v3589_v49 = vld [vmem:[%s3657_s17 + $0x78] sm:$0xff]  }
  0xc1   : > { %v4355_v46 = vpop.permute.xlu1 %1367  ;;  %v3218_v10 = vcombine.low %v769_v58, %v4295_v16  ;;  %v1197_v61 = vsel %vm1029_vm4, %v1192_v55, %v1196_v20  ;;  %v1340_v38 = vrot.slane %v4276_v19, 1  ;;  %v3227_v37 = vcombine.low %v784_v60, %v4370_v24  ;;  %v786_v15 = vld [vmem:[#allocation2 + $0x60] sm:$0xf]  ;;  %v4388_v1 = vld [vmem:[#allocation2 + $0x64] sm:$0xf] }
  0xc2   : > { %1234 = vrot.lane.b32.xlu0 %v1113_v3, %s3610_s19  ;;  %v1339_v3 = vrot.slane %v3217_v48, 1  ;;  %v1323_v47 = vsel %vm1302_vm2, %v1321_v41, %v1322_v4  ;;  %v1324_v27 = vrot.slane %v3212_v30, 1  ;;  %v1325_v5 = vrot.slane %v4321_v6, 1  ;;  %v4395_v7 = vld [vmem:[#allocation2 + $0x5c] ss:$0 sps:$4 sm:$0x11]  }
  0xc3   : > { %1246 = vrot.lane.b32.xlu1 %v1185_v52, %s3610_s19  ;;  %v1342_v19 = vrot.slane %v3218_v10, 1  ;;  %v1343_v52 = vrot.slane %v4329_v12, 1  ;;  %v3233_v26 = vcombine.low %v796_v62, %v4379_v9  ;;  %v1618_v22 = vshll.u32 %v3227_v37, 16  ;;  %v798_v32 = vld [vmem:[#allocation2 + $0xa8] sm:$0xf] }
  0xc4   : > { %v4358_v35 = vpop.permute.xlu0 %1357  ;;  %v1341_v36 = vsel %vm1302_vm2, %v1339_v3, %v1340_v38  ;;  %v1326_v42 = vsel %vm1302_vm2, %v1324_v27, %v1325_v5  ;;  %v4408_v53 = vld [vmem:[#allocation2 + $0xa4] ss:$0 sps:$4 sm:$0x11]   ;;  %v3234_v50 = vcombine.low %v798_v32, %v4400_v0  ;;  %v1623_v20 = vshll.u32 %v4395_v7, 16 }
  0xc5   : > { %v4365_v59 = vpop.permute.xlu1 %1369  ;;  %v1344_v8 = vsel %vm1302_vm2, %v1342_v19, %v1343_v52  ;;  %v1690_v14 = vshll.u32 %v3233_v26, 16  ;;  %v1620_v55 = vrot.slane %v1618_v22, 1  ;;  %v401_v41 = vshrl.u32 %v3589_v49, 16  ;;  %v4422_v27 = vld [vmem:[#allocation2 + $0xb0] ss:$0 sps:$4 sm:$0x11]  }
  0xc6   : > { %2385 = vrot.lane.b32.xlu0 %v2344_v31, %s3614_s27  ;;  %v3228_v31 = vcombine.low %v786_v15, %v4388_v1  ;;  %v404_v4 = vshll.u32 %v3589_v49, 16  ;;  %v1688_v60 = vshrl.u32 %v3233_v26, 16  ;;  %v1702_v38 = vshll.u32 %v3234_v50, 16 }
  0xc7   : > { %2397 = vrot.lane.b32.xlu1 %v2362_v33, %s3614_s27  ;;  %v1616_v33 = vshrl.u32 %v3227_v37, 16  ;;  %v1692_v10 = vrot.slane %v1690_v14, 1  ;;  %v403_v3 = vrot.slane %v401_v41, 7  ;;  %v1700_v14 = vshrl.u32 %v3234_v50, 16 }
  0xc8   : > { %v4372_v56 = vpop.permute.xlu0 %1467  ;;  %v1630_v58 = vshll.u32 %v3228_v31, 16  ;;  %v1628_v5 = vshrl.u32 %v3228_v31, 16 }
  0xc9   : > { %v4382_v29 = vpop.permute.xlu1 %1479  ;;  %v1621_v62 = vor.u32 %v1620_v55, %v1616_v33  ;;  %v473_v22 = vsel %vm3667_vm6, %v403_v3, 0  ;;  %v1704_v55 = vrot.slane %v1702_v38, 1  ;;  %v4446_v38 = vld [vmem:[#allocation2 + $0xac] sm:$0xf] }
  0xca   : > { %1236 = vrot.lane.b32.xlu0 %v1125_v39, %s3610_s19  ;;  %v4415_v39 = vld [vmem:[#allocation2 + $0x68] ss:$0 sps:$4 sm:$0x11]   ;;  %v1632_v19 = vrot.slane %v1630_v58, 1  ;;  %v3172_v49 = vcombine.low %v473_v22, %v473_v22 }
  0xcb   : > { %1248 = vrot.lane.b32.xlu1 %v1197_v61, %s3610_s19  ;;  %v1695_v61 = vshll.u32 %v4408_v53, 16  ;;  %v1635_v52 = vshll.u32 %v4415_v39, 16 }
  0xcc   : > { %v4386_v16 = vpop.permute.xlu0 %1469  ;;  %700 = vst.msk [vmem:[#allocation2 + $0xc8] sm:$0x1] %vm654_vm1, %v3172_v49 }
  0xcd   : > { %v4397_v6 = vpop.permute.xlu1 %1481 }
  0xce   : > { %1363 = vrot.lane.b32.xlu0 %v1323_v47, %s3609_s18  ;;  %v1625_v47 = vrot.slane %v1623_v20, 1  ;;  %v1707_v20 = vshll.u32 %v4422_v27, 16 }
  0xcf   : > { %1375 = vrot.lane.b32.xlu1 %v1341_v36, %s3609_s18  ;;  %v406_v36 = vor.u32 %v404_v4, %v403_v3  ;;  %v832_v4 = vld [vmem:[#allocation2 + $0x9c] sm:$0xe] }
  0xd0   : > { %v4404_v12 = vpop.permute.xlu0 %1739 }
  0xd1   : > { %v4413_v48 = vpop.permute.xlu1 %1751  ;;  %v457_v33 = vsel %vm3667_vm6, 0, %v406_v36 }
  0xd2   : > { %1365 = vrot.lane.b32.xlu0 %v1326_v42, %s3609_s18  ;;  %v826_v42 = vld [vmem:[#allocation2 + $0x54] sm:$0xe]  ;;  %v3170_v58 = vcombine.low %v457_v33, %v457_v33  ;;  %v3171_v41 = vcombine.high %v457_v33, %v457_v33 }
  0xd3   : > { %1377 = vrot.lane.b32.xlu1 %v1344_v8, %s3609_s18  ;;  %v1697_v8 = vrot.slane %v1695_v61, 1  ;;  %v3259_v3 = vcombine.low %v826_v42, %v4370_v24  ;;  %v3265_v24 = vcombine.low %v832_v4, %v4379_v9 }
  0xd4   : > { %v4417_v30 = vpop.permute.xlu0 %1741  ;;  %698 = vst.msk [vmem:[#allocation2 + $0xc0] sm:$0xf] %vm651_vm0, %v3170_v58  ;;  %699 = vst.msk [vmem:[#allocation2 + $0xc4] sm:$0xf] %vm651_vm0, %v3171_v41  ;;  %v4468_v58 = vld [vmem:[#allocation2 + $0x70] sm:$0xf] }
  0xd5   : > { %v4424_v15 = vpop.permute.xlu1 %1753  ;;  %v1833_v49 = vrot.slane %v3259_v3, 1 }
  0xd6   : > { %1475 = vrot.lane.b32.xlu0 %v3227_v37, %s3611_s20  ;;  %v1693_v37 = vor.u32 %v1692_v10, %v1688_v60  ;;  %v1633_v60 = vor.u32 %v1632_v19, %v1628_v5  ;;  %v1637_v10 = vrot.slane %v1635_v52, 1  ;;  %v833_v5 = vld [vmem:[#allocation2 + $0xa8] sm:$0xe]  ;;  %v3260_v19 = vcombine.low %v827_v17, %v4388_v1 }
  0xd7   : > { %1487 = vrot.lane.b32.xlu1 %v3233_v26, %s3611_s20  ;;  %v1626_v26 = vsel %vm1029_vm4, %v1621_v62, %v1625_v47  ;;  %v1705_v62 = vor.u32 %v1704_v55, %v1700_v14  ;;  %v1709_v47 = vrot.slane %v1707_v20, 1  ;;  %v851_v14 = vld [vmem:[#allocation2 + $0x6c] sm:$0xf]  ;;  %v3266_v1 = vcombine.low %v833_v5, %v4400_v0  ;;  %v4477_v0 = vld [vmem:[#allocation2 + $0xb0] ss:$0 sps:$4 sm:$0x11]  }
  0xd8   : > { %v4429_v32 = vpop.permute.xlu0 %1867  ;;  %v1698_v36 = vsel %vm1029_vm4, %v1693_v37, %v1697_v8  ;;  %v1638_v42 = vsel %vm1029_vm4, %v1633_v60, %v1637_v10  ;;  %v849_v37 = vld [vmem:[#allocation2 + $0x60] sm:$0xf]  ;;  %v4461_v8 = vld [vmem:[#allocation2 + $0x64] sm:$0xf]  ;;  %v1851_v20 = vrot.slane %v3265_v24, 1  ;;  %v1836_v41 = vrot.slane %v3260_v19, 1 }
  0xd9   : > { %v4438_v22 = vpop.permute.xlu1 %1879  ;;  %v1710_v55 = vsel %vm1029_vm4, %v1705_v62, %v1709_v47  ;;  %v3275_v60 = vcombine.low %v849_v37, %v4461_v8  ;;  %v1854_v24 = vrot.slane %v3266_v1, 1  ;;  %v4489_v62 = vld [vmem:[#allocation2 + $0x60] sm:$0xe]  ;;  %v863_v19 = vld [vmem:[#allocation2 + $0xb4] sm:$0xf]  ;;  %v2207_v1 = vshll.u32 %v4477_v0, 16 }
  0xda   : > { %1477 = vrot.lane.b32.xlu0 %v3228_v31, %s3611_s20  ;;  %v861_v31 = vld [vmem:[#allocation2 + $0xa8] sm:$0xf] }
  0xdb   : > { %1489 = vrot.lane.b32.xlu1 %v3234_v50, %s3611_s20  ;;  %v1834_v50 = vrot.slane %v4395_v7, 1  ;;  %v4459_v9 = vcombine.low %v861_v31, %v4446_v38  ;;  %v1852_v7 = vrot.slane %v4408_v53, 1  ;;  %v4482_v53 = vcombine.low %v851_v14, %v4468_v58  ;;  %v4484_v31 = vld [vmem:[#allocation2 + $0x68] ss:$0 sps:$4 sm:$0x11]  }
  0xdc   : > { %v4441_v61 = vpop.permute.xlu0 %1869  ;;  %v2209_v34 = vrot.slane %v2207_v1, 1 }
  0xdd   : > { %v4452_v52 = vpop.permute.xlu1 %1881  ;;  %v1835_v3 = vsel %vm1302_vm2, %v1833_v49, %v1834_v50  ;;  %v2202_v17 = vshll.u32 %v4459_v9, 16  ;;  %v2130_v49 = vshll.u32 %v3275_v60, 16  ;;  %v2200_v37 = vshrl.u32 %v4459_v9, 16 }
  0xde   : > { %1747 = vrot.lane.b32.xlu0 %v1626_v26, %s3615_s28  ;;  %v1837_v26 = vrot.slane %v4415_v39, 1  ;;  %v1855_v39 = vrot.slane %v4422_v27, 1  ;;  %v2413_v27 = vsel %vm2407_vm8, %v3783_v21, %v4313_v25  ;;  %v4513_v21 = vld [vmem:[#allocation2 + $0xa8] sm:$0xe]  ;;  %v2425_v25 = vsel %vm2407_vm8, %v3794_v63, %v4304_v44  ;;  %v4528_v63 = vld [vmem:[#allocation2 + $0xac] sm:$0xf] }
  0xdf   : > { %1759 = vrot.lane.b32.xlu1 %v1698_v36, %s3615_s28  ;;  %v1853_v36 = vsel %vm1302_vm2, %v1851_v20, %v1852_v7  ;;  %v2204_v14 = vrot.slane %v2202_v17, 1  ;;  %v2142_v20 = vshll.u32 %v4482_v53, 16  ;;  %v3307_v7 = vcombine.low %v4489_v62, %v4461_v8 }
  0xe0   : > { %v4456_v33 = vpop.permute.xlu0 %1979  ;;  %v1838_v5 = vsel %vm1302_vm2, %v1836_v41, %v1837_v26  ;;  %v1856_v41 = vsel %vm1302_vm2, %v1854_v24, %v1855_v39  ;;  %v2128_v26 = vshrl.u32 %v3275_v60, 16  ;;  %v2135_v17 = vshll.u32 %v4484_v31, 16 }
  0xe1   : > { %v4470_v4 = vpop.permute.xlu1 %1991  ;;  %v2132_v62 = vrot.slane %v2130_v49, 1  ;;  %v2140_v24 = vshrl.u32 %v4482_v53, 16  ;;  %v2415_v39 = vsel %vm2407_vm8, %v3810_v43, %v4326_v18  ;;  %v2205_v54 = vor.u32 %v2204_v14, %v2200_v37  ;;  %v4541_v14 = vld [vmem:[#allocation2 + $0xbc] ss:$0 sps:$4 sm:$0x11]  }
  0xe2   : > { %1749 = vrot.lane.b32.xlu0 %v1638_v42, %s3615_s28  ;;  %v4494_v42 = vld [vmem:[#allocation2 + $0xb8] sm:$0xf]  ;;  %v3313_v43 = vcombine.low %v4513_v21, %v4446_v38  ;;  %v2458_v18 = vsel %vm2440_vm9, %v2425_v25, %v4355_v46  ;;  %v2137_v37 = vrot.slane %v2135_v17, 1  ;;  %v4551_v46 = vcombine.low %v736_v28, %v4528_v63 }
  0xe3   : > { %1761 = vrot.lane.b32.xlu1 %v1710_v55, %s3615_s28  ;;  %v4502_v55 = vld [vmem:[#allocation2 + $0x74] ss:$0 sps:$4 sm:$0x11]   ;;  %v2491_v1 = vsel %vm2473_vm10, %v2458_v18, %v4382_v29  ;;  %v2210_v29 = vsel %vm1029_vm4, %v2205_v54, %v2209_v34  ;;  %v892_v18 = vld [vmem:[#allocation2 + $0x6c] sm:$0xe] }
  0xe4   : > { %v4475_v10 = vpop.permute.xlu0 %1981  ;;  %v2147_v49 = vshll.u32 %v4502_v55, 16 }
  0xe5   : > { %v4491_v47 = vpop.permute.xlu1 %1993 }
  0xe6   : > { %1875 = vrot.lane.b32.xlu0 %v1835_v3, %s3613_s26  ;;  %v4510_v3 = vcombine.low %v863_v19, %v4494_v42 }
  0xe7   : > { %1887 = vrot.lane.b32.xlu1 %v1853_v36, %s3613_s26  ;;  %v2446_v36 = vsel %vm2440_vm9, %v2413_v27, %v4342_v40  ;;  %v2144_v40 = vrot.slane %v2142_v20, 1 }
  0xe8   : > { %v2252_v50 = vpop.permute.xlu0 %2251  ;;  %v2212_v34 = vshrl.u32 %v4510_v3, 16 }
  0xe9   : > { %v2264_v8 = vpop.permute.xlu1 %2263 }
  0xea   : > { %1877 = vrot.lane.b32.xlu0 %v1838_v5, %s3613_s26  ;;  %v2479_v5 = vsel %vm2473_vm10, %v2446_v36, %v4372_v56  ;;  %v2149_v36 = vrot.slane %v2147_v49, 1  ;;  %v2345_v49 = vrot.slane %v3307_v7, 1 }
  0xeb   : > { %v2512_v44 = vsel %vm2506_vm11, %v2479_v5, %v4404_v12  ;;  %1889 = vrot.lane.b32.xlu1 %v1856_v41, %s3613_s26  ;;  %v2214_v12 = vshll.u32 %v4510_v3, 16  ;;  %v2133_v41 = vor.u32 %v2132_v62, %v2128_v26  ;;  %v2145_v26 = vor.u32 %v2144_v40, %v2140_v24  ;;  %v4565_v62 = vld [vmem:[#allocation2 + $0xb0] ss:$0 sps:$4 sm:$0x11]   ;;  %v738_v24 = vld [vmem:[#allocation2 + $0xb4] sm:$0xf] }
  0xec   : > { %v4526_v19 = vpop.permute.xlu0 %2253  ;;  %v2545_v56 = vsel %vm2539_vm12, %v2512_v44, %v4429_v32  ;;  %v2427_v32 = vsel %vm2407_vm8, %v3835_v23, %v4339_v13  ;;  %v2219_v13 = vshll.u32 %v4541_v14, 16  ;;  %v4579_v5 = vld [vmem:[#allocation2 + $0xb8] sm:$0xf] }
  0xed   : > { %v2578_v27 = vsel %vm2572_vm13, %v2545_v56, %v4456_v33  ;;  %v4548_v20 = vpop.permute.xlu1 %2265  ;;  %v2216_v54 = vrot.slane %v2214_v12, 1  ;;  %v1206_v56 = vshll.u32 %v4565_v62, 16 }
  0xee   : > { %1987 = vrot.lane.b32.xlu0 %v3275_v60, %s3612_s21  ;;  %v2524_v60 = vsel %vm2506_vm11, %v2491_v1, %v4413_v48  ;;  %v2611_v17 = vsel %vm2605_vm14, %v2578_v27, %v2252_v50  ;;  %v2448_v48 = vsel %vm2440_vm9, %v2415_v39, %v4358_v35  ;;  %v2138_v50 = vsel %vm1029_vm4, %v2133_v41, %v2137_v37 }
  0xef   : > { %v2557_v33 = vsel %vm2539_vm12, %v2524_v60, %v4438_v22  ;;  %1999 = vrot.lane.b32.xlu1 %v4459_v9, %s3612_s21  ;;  %v2346_v35 = vrot.slane %v4484_v31, 1  ;;  %v2217_v31 = vor.u32 %v2216_v54, %v2212_v34  ;;  %v4600_v37 = vcombine.low %v738_v24, %v4579_v5  ;;  %v4637_v34 = vld [vmem:[#allocation2 + $0xb8] sm:$0xf] }
  0xf0   : > { %v2380_v25 = vpop.permute.xlu0 %2379  ;;  %v2590_v23 = vsel %vm2572_vm13, %v2557_v33, %v4470_v4  ;;  %v1201_v4 = vshll.u32 %v4551_v46, 16  ;;  %v1199_v1 = vshrl.u32 %v4551_v46, 16  ;;  %v3308_v60 = vcombine.low %v892_v18, %v4468_v58  ;;  %v4628_v58 = vld [vmem:[#allocation2 + $0xbc] ss:$0 sps:$4 sm:$0x11]  }
  0xf1   : > { %v2644_v28 = vsel %vm2638_vm15, %v2611_v17, %v2380_v25  ;;  %v2623_v22 = vsel %vm2605_vm14, %v2590_v23, %v2264_v8  ;;  %v2392_v9 = vpop.permute.xlu1 %2391  ;;  %v2460_v8 = vsel %vm2440_vm9, %v2427_v32, %v4365_v59  ;;  %v2221_v59 = vrot.slane %v2219_v13, 1  ;;  %v898_v17 = vld [vmem:[#allocation2 + $0xb4] sm:$0xe] }
  0xf2   : > { %1989 = vrot.lane.b32.xlu0 %v4482_v53, %s3612_s21  ;;  %3392 = vmatprep.mubr.msk.bf16.mxu0 %vm2691_vm3, %v2644_v28  ;;  %v2481_v53 = vsel %vm2473_vm10, %v2448_v48, %v4386_v16  ;;  %v2656_v44 = vsel %vm2638_vm15, %v2623_v22, %v2392_v9  ;;  %v2150_v16 = vsel %vm1029_vm4, %v2145_v26, %v2149_v36  ;;  %v1203_v27 = vrot.slane %v1201_v4, 1  ;;  %v770_v28 = vld [vmem:[#allocation2 + $0xa8] sm:$0xe]  ;;  %v800_v23 = vld [vmem:[#allocation2 + $0xb4] sm:$0xf] }
  0xf3   : > { %v2514_v39 = vsel %vm2506_vm11, %v2481_v53, %v4417_v30  ;;  %2001 = vrot.lane.b32.xlu1 %v4510_v3, %s3612_s21  ;;  %3404 = vmatprep.mubr.msk.bf16.mxu1 %vm2691_vm3, %v2656_v44  ;;  %v2493_v30 = vsel %vm2473_vm10, %v2460_v8, %v4397_v6  ;;  %v2363_v25 = vrot.slane %v3313_v43, 1  ;;  %v2222_v33 = vsel %vm1029_vm4, %v2217_v31, %v2221_v59  ;;  %v771_v9 = vld [vmem:[#allocation2 + $0xb4] sm:$0xe] }
  0xf4   : > { %v4584_v40 = vpop.permute.xlu0 %1230  ;;  %v2547_v7 = vsel %vm2539_vm12, %v2514_v39, %v4441_v61  ;;  %v2526_v61 = vsel %vm2506_vm11, %v2493_v30, %v4424_v15  ;;  %v2364_v15 = vrot.slane %v4477_v0, 1  ;;  %v1204_v0 = vor.u32 %v1203_v27, %v1199_v1  ;;  %v3593_v30 = vld [vmem:[#allocation2 + $0xbc] ss:$0 sps:$4 sm:$0x11]  }
  0xf5   : > { %v2580_v3 = vsel %vm2572_vm13, %v2547_v7, %v4475_v10  ;;  %v4606_v12 = vpop.permute.xlu1 %1242  ;;  %v2559_v6 = vsel %vm2539_vm12, %v2526_v61, %v4452_v52  ;;  %v2347_v52 = vsel %vm1302_vm2, %v2345_v49, %v2346_v35  ;;  %v1208_v43 = vrot.slane %v1206_v56, 1  ;;  %v802_v49 = vld [vmem:[#allocation2 + $0xc0] sm:$0xf]  ;;  %v4651_v35 = vld [vmem:[#allocation2 + $0xc4] sm:$0xf] }
  0xf6   : > { %2259 = vrot.lane.b32.xlu0 %v2138_v50, %s3616_s29  ;;  %v2613_v41 = vsel %vm2605_vm14, %v2580_v3, %v4526_v19  ;;  %v2592_v19 = vsel %vm2572_vm13, %v2559_v6, %v4491_v47  ;;  %v3314_v47 = vcombine.low %v898_v17, %v4494_v42  ;;  %v2365_v54 = vsel %vm1302_vm2, %v2363_v25, %v2364_v15  ;;  %v834_v15 = vld [vmem:[#allocation2 + $0xb4] sm:$0xe] }
  0xf7   : > { %2271 = vrot.lane.b32.xlu1 %v2210_v29, %s3616_s29  ;;  %v1213_v29 = vshll.u32 %v4600_v37, 16  ;;  %v2625_v38 = vsel %vm2605_vm14, %v2592_v19, %v4548_v20  ;;  %v2348_v20 = vrot.slane %v3308_v60, 1  ;;  %v2349_v13 = vrot.slane %v4502_v55, 1  ;;  %v865_v19 = vld [vmem:[#allocation2 + $0xc0] sm:$0xf] }
  0xf8   : > { %v2382_v32 = vpop.permute.xlu0 %2381  ;;  %v1211_v42 = vshrl.u32 %v4600_v37, 16  ;;  %v1218_v22 = vshll.u32 %v4628_v58, 16  ;;  %v3219_v50 = vcombine.low %v770_v28, %v4528_v63  ;;  %v1209_v24 = vsel %vm1029_vm4, %v1204_v0, %v1208_v43  ;;  %v835_v28 = vld [vmem:[#allocation2 + $0xc0] sm:$0xe] }
  0xf9   : > { %v2646_v10 = vsel %vm2638_vm15, %v2613_v41, %v2382_v32  ;;  %v2394_v21 = vpop.permute.xlu1 %2393  ;;  %v1215_v48 = vrot.slane %v1213_v29, 1  ;;  %v2366_v53 = vrot.slane %v3314_v47, 1  ;;  %v2367_v44 = vrot.slane %v4541_v14, 1  ;;  %v3592_v41 = vld [vmem:[#allocation2 + $0xc8] ss:$0 sps:$4 sm:$0x11]  }
  0xfa   : > { %2261 = vrot.lane.b32.xlu0 %v2150_v16, %s3616_s29  ;;  %3393 = vmatmul.mubr.msk.bf16.gmra.mrb[4].mxu0 %vm2691_vm3, %v2646_v10  ;;  %v2658_v26 = vsel %vm2638_vm15, %v2625_v38, %v2394_v21  ;;  %v3235_v55 = vcombine.low %v800_v23, %v4637_v34  ;;  %v2350_v39 = vsel %vm1302_vm2, %v2348_v20, %v2349_v13  ;;  %v1220_v16 = vrot.slane %v1218_v22, 1  ;;  %v867_v21 = vld [vmem:[#allocation2 + $0xcc] sm:$0xf]  ;;  %v868_v23 = vld [vmem:[#allocation2 + $0xd0] sm:$0xf] }
  0xfb   : > { %2273 = vrot.lane.b32.xlu1 %v2222_v33, %s3616_s29  ;;  %3405 = vmatmul.mubr.msk.bf16.vlgmr.msra.gmra.mrb[0].mxu1 %vm2691_vm3, %v2658_v26  ;;  %v1216_v63 = vor.u32 %v1215_v48, %v1211_v42  ;;  %v3220_v18 = vcombine.low %v771_v9, %v4579_v5  ;;  %v3236_v56 = vcombine.low %v802_v49, %v4651_v35  ;;  %v1345_v31 = vrot.slane %v3219_v50, 1  ;;  %v4676_v33 = vld [vmem:[#allocation2 + $0xc4] sm:$0xf] }
  0xfc   : > { %v4635_v36 = vpop.permute.xlu0 %1232  ;;  %v2368_v7 = vsel %vm1302_vm2, %v2366_v53, %v2367_v44  ;;  %v1346_v59 = vrot.slane %v4565_v62, 1  ;;  %v1714_v3 = vshll.u32 %v3235_v55, 16  ;;  %v1349_v61 = vrot.slane %v4628_v58, 1  ;;  %v3597_v53 = vld [vmem:[#allocation2 + $0xc8] ss:$0 sps:$4 sm:$0x11]  }
  0xfd   : > { %v4647_v4 = vpop.permute.xlu1 %1244  ;;  %v1221_v27 = vsel %vm1029_vm4, %v1216_v63, %v1220_v16  ;;  %v1348_v5 = vrot.slane %v3220_v18, 1  ;;  %v1726_v32 = vshll.u32 %v3236_v56, 16  ;;  %v1712_v62 = vshrl.u32 %v3235_v55, 16  ;;  %v3596_v16 = vld [vmem:[#allocation2 + $0xd4] ss:$0 sps:$4 sm:$0x11]  }
  0xfe   : > { %2387 = vrot.lane.b32.xlu0 %v2347_v52, %s3614_s27  ;;  %v1347_v17 = vsel %vm1302_vm2, %v1345_v31, %v1346_v59  ;;  %v1716_v6 = vrot.slane %v1714_v3, 1  ;;  %v1719_v10 = vshll.u32 %v3593_v30, 16  ;;  %v1724_v58 = vshrl.u32 %v3236_v56, 16 }
  0xff   : > { %2399 = vrot.lane.b32.xlu1 %v2365_v54, %s3614_s27  ;;  %v1350_v52 = vsel %vm1302_vm2, %v1348_v5, %v1349_v61  ;;  %v1728_v29 = vrot.slane %v1726_v32, 1  ;;  %v1731_v38 = vshll.u32 %v3592_v41, 16  ;;  %v3267_v26 = vcombine.low %v834_v15, %v4637_v34 }
 0x100   : > { %v4654_v8 = vpop.permute.xlu0 %1359  ;;  %v1717_v43 = vor.u32 %v1716_v6, %v1712_v62  ;;  %v1721_v47 = vrot.slane %v1719_v10, 1  ;;  %v3283_v54 = vcombine.low %v865_v19, %v4676_v33  ;;  %v3268_v48 = vcombine.low %v835_v28, %v4651_v35  ;;  %v900_v6 = vld [vmem:[#allocation2 + $0xcc] sm:$0xe] }
 0x101   : > { %v4661_v14 = vpop.permute.xlu1 %1371  ;;  %v1729_v13 = vor.u32 %v1728_v29, %v1724_v58  ;;  %v1733_v42 = vrot.slane %v1731_v38, 1  ;;  %v3284_v22 = vcombine.low %v867_v21, %v868_v23  ;;  %v1858_v34 = vrot.slane %v3593_v30, 1 }
 0x102   : > { %1250 = vrot.lane.b32.xlu0 %v1209_v24, %s3610_s19  ;;  %v1722_v50 = vsel %vm1029_vm4, %v1717_v43, %v1721_v47  ;;  %v1857_v24 = vrot.slane %v3267_v26, 1  ;;  %v2226_v44 = vshll.u32 %v3283_v54, 16  ;;  %v1861_v63 = vrot.slane %v3592_v41, 1 }
 0x103   : > { %2389 = vrot.lane.b32.xlu1 %v2350_v39, %s3614_s27  ;;  %v1734_v39 = vsel %vm1029_vm4, %v1729_v13, %v1733_v42  ;;  %v2238_v35 = vshll.u32 %v3284_v22, 16  ;;  %v2224_v31 = vshrl.u32 %v3283_v54, 16  ;;  %v2231_v3 = vshll.u32 %v3597_v53, 16 }
 0x104   : > { %v4665_v1 = vpop.permute.xlu0 %1361  ;;  %v2228_v59 = vrot.slane %v2226_v44, 1  ;;  %v2236_v5 = vshrl.u32 %v3284_v22, 16  ;;  %v2243_v41 = vshll.u32 %v3596_v16, 16  ;;  %v3316_v58 = vcombine.low %v900_v6, %v868_v23 }
 0x105   : > { %v4671_v60 = vpop.permute.xlu1 %1373  ;;  %v2240_v61 = vrot.slane %v2238_v35, 1  ;;  %v2233_v62 = vrot.slane %v2231_v3, 1  ;;  %v2370_v43 = vrot.slane %v3597_v53, 1  ;;  %v2373_v26 = vrot.slane %v3596_v16, 1 }
 0x106   : > { %2401 = vrot.lane.b32.xlu0 %v2368_v7, %s3614_s27  ;;  %v1859_v7 = vsel %vm1302_vm2, %v1857_v24, %v1858_v34  ;;  %v2417_v34 = vsel %vm2407_vm8, %v3965_v57, %v4584_v40 }
 0x107   : > { %1252 = vrot.lane.b32.xlu1 %v1221_v27, %s3610_s19  ;;  %v899_v27 = vld [vmem:[#allocation2 + $0xc0] sm:$0xe]  ;;  %v2241_v19 = vor.u32 %v2240_v61, %v2236_v5  ;;  %v2450_v53 = vsel %vm2440_vm9, %v2417_v34, %v4654_v8 }
 0x108   : > { %v4674_v25 = vpop.permute.xlu0 %1471  ;;  %v3315_v10 = vcombine.low %v899_v27, %v4676_v33  ;;  %v2372_v33 = vrot.slane %v3316_v58, 1 }
 0x109   : > { %v4681_v0 = vpop.permute.xlu1 %1483 }
 0x10a   : > { %1379 = vrot.lane.b32.xlu0 %v1347_v17, %s3609_s18  ;;  %v2229_v17 = vor.u32 %v2228_v59, %v2224_v31  ;;  %v2369_v21 = vrot.slane %v3315_v10, 1  ;;  %v2374_v23 = vsel %vm1302_vm2, %v2372_v33, %v2373_v26 }
 0x10b   : > { %1381 = vrot.lane.b32.xlu1 %v1350_v52, %s3609_s18  ;;  %v2245_v52 = vrot.slane %v2243_v41, 1 }
 0x10c   : > { %v4685_v20 = vpop.permute.xlu0 %1473  ;;  %v2234_v38 = vsel %vm1029_vm4, %v2229_v17, %v2233_v62 }
 0x10d   : > { %v4690_v9 = vpop.permute.xlu1 %1485  ;;  %v2246_v28 = vsel %vm1029_vm4, %v2241_v19, %v2245_v52 }
 0x10e   : > { %1491 = vrot.lane.b32.xlu0 %v3235_v55, %s3611_s20  ;;  %v1860_v55 = vrot.slane %v3268_v48, 1 }
 0x10f   : > { %1493 = vrot.lane.b32.xlu1 %v3236_v56, %s3611_s20 }
 0x110   : > { %v1744_v49 = vpop.permute.xlu0 %1743  ;;  %v1862_v56 = vsel %vm1302_vm2, %v1860_v55, %v1861_v63  ;;  %v2429_v63 = vsel %vm2407_vm8, %v3974_v2, %v4606_v12 }
 0x111   : > { %v1756_v18 = vpop.permute.xlu1 %1755  ;;  %v2462_v35 = vsel %vm2440_vm9, %v2429_v63, %v4661_v14  ;;  %v2419_v14 = vsel %vm2407_vm8, %v4003_v45, %v4635_v36  ;;  %v2431_v45 = vsel %vm2407_vm8, %v4010_v51, %v4647_v4 }
 0x112   : > { %1763 = vrot.lane.b32.xlu0 %v1722_v50, %s3615_s28  ;;  %v2495_v57 = vsel %vm2473_vm10, %v2462_v35, %v4681_v0  ;;  %v2452_v0 = vsel %vm2440_vm9, %v2419_v14, %v4665_v1  ;;  %v2464_v1 = vsel %vm2440_vm9, %v2431_v45, %v4671_v60 }
 0x113   : > { %1765 = vrot.lane.b32.xlu1 %v1734_v39, %s3615_s28  ;;  %v2483_v39 = vsel %vm2473_vm10, %v2450_v53, %v4674_v25  ;;  %v2528_v25 = vsel %vm2506_vm11, %v2495_v57, %v1756_v18  ;;  %v2485_v27 = vsel %vm2473_vm10, %v2452_v0, %v4685_v20  ;;  %v2497_v20 = vsel %vm2473_vm10, %v2464_v1, %v4690_v9 }
 0x114   : > { %v4697_v30 = vpop.permute.xlu0 %1745  ;;  %v2516_v16 = vsel %vm2506_vm11, %v2483_v39, %v1744_v49 }
 0x115   : > { %v4702_v32 = vpop.permute.xlu1 %1757  ;;  %v2518_v36 = vsel %vm2506_vm11, %v2485_v27, %v4697_v30  ;;  %v4862_v27 = vld [vmem:[#allocation6_spill] sm:$0xff] }
 0x116   : > { %1891 = vrot.lane.b32.xlu0 %v1859_v7, %s3613_s26  ;;  %v2530_v62 = vsel %vm2506_vm11, %v2497_v20, %v4702_v32 }
 0x117   : > { %1893 = vrot.lane.b32.xlu1 %v1862_v56, %s3613_s26 }
 0x118   : > { %v1872_v15 = vpop.permute.xlu0 %1871 }
 0x119   : > { %v1884_v29 = vpop.permute.xlu1 %1883  ;;  %v2549_v7 = vsel %vm2539_vm12, %v2516_v16, %v1872_v15 }
 0x11a   : > { %2003 = vrot.lane.b32.xlu0 %v3283_v54, %s3612_s21  ;;  %v2371_v54 = vsel %vm1302_vm2, %v2369_v21, %v2370_v43  ;;  %v2561_v2 = vsel %vm2539_vm12, %v2528_v25, %v1884_v29 }
 0x11b   : > { %2005 = vrot.lane.b32.xlu1 %v3284_v22, %s3612_s21 }
 0x11c   : > { %v1874_v47 = vpop.permute.xlu0 %1873 }
 0x11d   : > { %v1886_v13 = vpop.permute.xlu1 %1885  ;;  %v2551_v61 = vsel %vm2539_vm12, %v2518_v36, %v1874_v47 }
 0x11e   : > { %2275 = vrot.lane.b32.xlu0 %v2234_v38, %s3616_s29  ;;  %v2563_v30 = vsel %vm2539_vm12, %v2530_v62, %v1886_v13 }
 0x11f   : > { %2277 = vrot.lane.b32.xlu1 %v2246_v28, %s3616_s29 }
 0x120   : > { %v1984_v42 = vpop.permute.xlu0 %1983 }
 0x121   : > { %v1996_v48 = vpop.permute.xlu1 %1995  ;;  %v2582_v40 = vsel %vm2572_vm13, %v2549_v7, %v1984_v42  ;;  %v4860_v7 = vld [vmem:[#allocation4_spill] sm:$0xff] }
 0x122   : > { %2403 = vrot.lane.b32.xlu0 %v2371_v54, %s3614_s27  ;;  %v2594_v49 = vsel %vm2572_vm13, %v2561_v2, %v1996_v48 }
 0x123   : > { %2405 = vrot.lane.b32.xlu1 %v2374_v23, %s3614_s27 }
 0x124   : > { %v1986_v50 = vpop.permute.xlu0 %1985 }
 0x125   : > { %v1998_v22 = vpop.permute.xlu1 %1997  ;;  %v2584_v41 = vsel %vm2572_vm13, %v2551_v61, %v1986_v50 }
 0x126   : > { %v2596_v60 = vsel %vm2572_vm13, %v2563_v30, %v1998_v22 }
 0x128   : > { %v2256_v24 = vpop.permute.xlu0 %2255 }
 0x129   : > { %v2268_v44 = vpop.permute.xlu1 %2267  ;;  %v2615_v31 = vsel %vm2605_vm14, %v2582_v40, %v2256_v24 }
 0x12a   : > { %v2627_v18 = vsel %vm2605_vm14, %v2594_v49, %v2268_v44  ;;  %v4861_v49 = vld [vmem:[#allocation5_spill] sm:$0xff] }
 0x12c   : > { %v2258_v55 = vpop.permute.xlu0 %2257 }
 0x12d   : > { %v2270_v8 = vpop.permute.xlu1 %2269  ;;  %v2617_v51 = vsel %vm2605_vm14, %v2584_v41, %v2258_v55 }
 0x12e   : > { %v2629_v10 = vsel %vm2605_vm14, %v2596_v60, %v2270_v8 }
 0x130   : > { %v2384_v59 = vpop.permute.xlu0 %2383 }
 0x131   : > { %v2648_v12 = vsel %vm2638_vm15, %v2615_v31, %v2384_v59  ;;  %v2396_v3 = vpop.permute.xlu1 %2395 }
 0x132   : > { %3396 = vmatprep.mubr.msk.bf16.mxu0 %vm2691_vm3, %v2648_v12  ;;  %v2660_v56 = vsel %vm2638_vm15, %v2627_v18, %v2396_v3 }
 0x133   : > { %3408 = vmatprep.mubr.msk.bf16.mxu1 %vm2691_vm3, %v2660_v56 }
 0x134   : > { %v1235_v5 = vpop.permute.xlu0 %1234 }
 0x135   : > { %v1247_v17 = vpop.permute.xlu1 %1246  ;;  %v2421_v39 = vsel %vm2407_vm8, %v4237_v11, %v1235_v5 }
 0x136   : > { %v2433_v57 = vsel %vm2407_vm8, %v4860_v7, %v1247_v17 }
 0x138   : > { %v2386_v4 = vpop.permute.xlu0 %2385 }
 0x139   : > { %v2650_v6 = vsel %vm2638_vm15, %v2617_v51, %v2386_v4  ;;  %v2398_v9 = vpop.permute.xlu1 %2397 }
 0x13a   : > { %3397 = vmatmul.mubr.msk.bf16.gmra.mrb[8].mxu0 %vm2691_vm3, %v2650_v6  ;;  %v2662_v15 = vsel %vm2638_vm15, %v2629_v10, %v2398_v9 }
 0x13b   : > { %3409 = vmatmul.mubr.msk.bf16.gmra.mrb[4].mxu1 %vm2691_vm3, %v2662_v15 }
 0x13c   : > { %v1237_v19 = vpop.permute.xlu0 %1236 }
 0x13d   : > { %v1249_v32 = vpop.permute.xlu1 %1248  ;;  %v2423_v0 = vsel %vm2407_vm8, %v4861_v49, %v1237_v19 }
 0x13e   : > { %v2435_v56 = vsel %vm2407_vm8, %v4862_v27, %v1249_v32 }
 0x140   : > { %v1364_v52 = vpop.permute.xlu0 %1363 }
 0x141   : > { %v1376_v58 = vpop.permute.xlu1 %1375  ;;  %v2454_v55 = vsel %vm2440_vm9, %v2421_v39, %v1364_v52 }
 0x142   : > { %v2466_v8 = vsel %vm2440_vm9, %v2433_v57, %v1376_v58 }
 0x144   : > { %v1366_v29 = vpop.permute.xlu0 %1365 }
 0x145   : > { %v1378_v38 = vpop.permute.xlu1 %1377  ;;  %v2456_v5 = vsel %vm2440_vm9, %v2423_v0, %v1366_v29 }
 0x146   : > { %v2468_v36 = vsel %vm2440_vm9, %v2435_v56, %v1378_v38 }
 0x148   : > { %v1476_v21 = vpop.permute.xlu0 %1475 }
 0x149   : > { %v1488_v43 = vpop.permute.xlu1 %1487  ;;  %v2487_v16 = vsel %vm2473_vm10, %v2454_v55, %v1476_v21 }
 0x14a   : > { %v2499_v31 = vsel %vm2473_vm10, %v2466_v8, %v1488_v43 }
 0x14c   : > { %v1478_v47 = vpop.permute.xlu0 %1477 }
 0x14d   : > { %v1490_v28 = vpop.permute.xlu1 %1489  ;;  %v2489_v1 = vsel %vm2473_vm10, %v2456_v5, %v1478_v47 }
 0x14e   : > { %v2501_v41 = vsel %vm2473_vm10, %v2468_v36, %v1490_v28 }
 0x150   : > { %v1748_v33 = vpop.permute.xlu0 %1747 }
 0x151   : > { %v1760_v26 = vpop.permute.xlu1 %1759  ;;  %v2520_v40 = vsel %vm2506_vm11, %v2487_v16, %v1748_v33 }
 0x152   : > { %v2532_v2 = vsel %vm2506_vm11, %v2499_v31, %v1760_v26 }
 0x154   : > { %v1750_v13 = vpop.permute.xlu0 %1749 }
 0x155   : > { %v1762_v54 = vpop.permute.xlu1 %1761  ;;  %v2522_v17 = vsel %vm2506_vm11, %v2489_v1, %v1750_v13 }
 0x156   : > { %v2534_v4 = vsel %vm2506_vm11, %v2501_v41, %v1762_v54 }
 0x158   : > { %v1876_v42 = vpop.permute.xlu0 %1875 }
 0x159   : > { %v1888_v23 = vpop.permute.xlu1 %1887  ;;  %v2553_v25 = vsel %vm2539_vm12, %v2520_v40, %v1876_v42 }
 0x15a   : > { %v2565_v18 = vsel %vm2539_vm12, %v2532_v2, %v1888_v23 }
 0x15c   : > { %v1878_v48 = vpop.permute.xlu0 %1877 }
 0x15d   : > { %v1890_v50 = vpop.permute.xlu1 %1889  ;;  %v2555_v30 = vsel %vm2539_vm12, %v2522_v17, %v1878_v48 }
 0x15e   : > { %v2567_v6 = vsel %vm2539_vm12, %v2534_v4, %v1890_v50 }
 0x160   : > { %v1988_v22 = vpop.permute.xlu0 %1987 }
 0x161   : > { %v2000_v24 = vpop.permute.xlu1 %1999  ;;  %v2586_v59 = vsel %vm2572_vm13, %v2553_v25, %v1988_v22 }
 0x162   : > { %v2598_v45 = vsel %vm2572_vm13, %v2565_v18, %v2000_v24 }
 0x164   : > { %v1990_v34 = vpop.permute.xlu0 %1989 }
 0x165   : > { %v2002_v53 = vpop.permute.xlu1 %2001  ;;  %v2588_v60 = vsel %vm2572_vm13, %v2555_v30, %v1990_v34 }
 0x166   : > { %v2600_v10 = vsel %vm2572_vm13, %v2567_v6, %v2002_v53 }
 0x168   : > { %v2260_v44 = vpop.permute.xlu0 %2259 }
 0x169   : > { %v2272_v63 = vpop.permute.xlu1 %2271  ;;  %v2619_v12 = vsel %vm2605_vm14, %v2586_v59, %v2260_v44 }
 0x16a   : > { %v2631_v61 = vsel %vm2605_vm14, %v2598_v45, %v2272_v63 }
 0x16c   : > { %v2262_v35 = vpop.permute.xlu0 %2261 }
 0x16d   : > { %v2274_v11 = vpop.permute.xlu1 %2273  ;;  %v2621_v9 = vsel %vm2605_vm14, %v2588_v60, %v2262_v35 }
 0x16e   : > { %v2633_v19 = vsel %vm2605_vm14, %v2600_v10, %v2274_v11 }
 0x170   : > { %v2388_v14 = vpop.permute.xlu0 %2387 }
 0x171   : > { %v2652_v3 = vsel %vm2638_vm15, %v2619_v12, %v2388_v14  ;;  %v2400_v20 = vpop.permute.xlu1 %2399 }
 0x172   : > { %3400 = vmatprep.mubr.msk.bf16.mxu0 %vm2691_vm3, %v2652_v3  ;;  %v2664_v62 = vsel %vm2638_vm15, %v2631_v61, %v2400_v20 }
 0x173   : > { %3412 = vmatprep.mubr.msk.bf16.mxu1 %vm2691_vm3, %v2664_v62 }
 0x174   : > { %v1251_v51 = vpop.permute.xlu0 %1250 }
 0x175   : > { %v2390_v15 = vpop.permute.xlu1 %2389  ;;  %v2437_v22 = vsel %vm2407_vm8, %v4551_v46, %v1251_v51 }
 0x176   : > { %v2654_v32 = vsel %vm2638_vm15, %v2621_v9, %v2390_v15 }
 0x177   : > { %3401 = vmatmul.mubr.msk.bf16.gmra.mrb[12].mxu0 %vm2691_vm3, %v2654_v32 }
 0x178   : > { %v2402_v52 = vpop.permute.xlu0 %2401 }
 0x179   : > { %v2666_v58 = vsel %vm2638_vm15, %v2633_v19, %v2402_v52  ;;  %v1253_v29 = vpop.permute.xlu1 %1252 }
 0x17a   : > { %3413 = vmatmul.mubr.msk.bf16.gmra.mrb[8].mxu1 %vm2691_vm3, %v2666_v58  ;;  %v2439_v63 = vsel %vm2407_vm8, %v4600_v37, %v1253_v29 }
 0x17c   : > { %v1380_v38 = vpop.permute.xlu0 %1379 }
 0x17d   : > { %v1382_v21 = vpop.permute.xlu1 %1381  ;;  %v2470_v34 = vsel %vm2440_vm9, %v2437_v22, %v1380_v38 }
 0x17e   : > { %v2472_v35 = vsel %vm2440_vm9, %v2439_v63, %v1382_v21 }
 0x180   : > { %v1492_v43 = vpop.permute.xlu0 %1491 }
 0x181   : > { %v1494_v47 = vpop.permute.xlu1 %1493  ;;  %v2503_v39 = vsel %vm2473_vm10, %v2470_v34, %v1492_v43 }
 0x182   : > { %v2505_v46 = vsel %vm2473_vm10, %v2472_v35, %v1494_v47 }
 0x184   : > { %v1764_v28 = vpop.permute.xlu0 %1763 }
 0x185   : > { %v1766_v33 = vpop.permute.xlu1 %1765  ;;  %v2536_v16 = vsel %vm2506_vm11, %v2503_v39, %v1764_v28 }
 0x186   : > { %v2538_v8 = vsel %vm2506_vm11, %v2505_v46, %v1766_v33 }
 0x188   : > { %v1892_v26 = vpop.permute.xlu0 %1891 }
 0x189   : > { %v1894_v13 = vpop.permute.xlu1 %1893  ;;  %v2569_v7 = vsel %vm2539_vm12, %v2536_v16, %v1892_v26 }
 0x18a   : > { %v2571_v59 = vsel %vm2539_vm12, %v2538_v8, %v1894_v13 }
 0x18b   : > { %v3390_v54 = vpop.f32.mrb[0].mxu0 }
 0x18c   : > { %v2762_v42 = vpop.f32.mrb[1].mxu0  ;;  %v2004_v23 = vpop.permute.xlu0 %2003 }
 0x18d   : > { %v2889_v48 = vmax.f32 %v2762_v42, %v3390_v54  ;;  %v3391_v50 = vpop.f32.mrb[2].mxu0  ;;  %v2006_v53 = vpop.permute.xlu1 %2005  ;;  %v2602_v57 = vsel %vm2572_vm13, %v2569_v7, %v2004_v23 }
 0x18e   : > { %v2765_v24 = vpop.f32.mrb[3].mxu0  ;;  %v2604_v11 = vsel %vm2572_vm13, %v2571_v59, %v2006_v53 }
 0x18f   : > { %2905 = vst [vmem:[#allocation3] sm:$0xff] %v2889_v48  ;;  %v2890_v44 = vmax.f32 %v2765_v24, %v3391_v50 }
 0x190   : > { %v2276_v55 = vpop.permute.xlu0 %2275 }
 0x191   : > { %2906 = vst [vmem:[#allocation3 + $0x8] sm:$0xff] %v2890_v44  ;;  %v2278_v40 = vpop.permute.xlu1 %2277  ;;  %v2635_v25 = vsel %vm2605_vm14, %v2602_v57, %v2276_v55 }
 0x192   : > { %v2637_v2 = vsel %vm2605_vm14, %v2604_v11, %v2278_v40 }
 0x194   : > { %v2404_v31 = vpop.permute.xlu0 %2403 }
 0x195   : > { %v2668_v37 = vsel %vm2638_vm15, %v2635_v25, %v2404_v31  ;;  %v2406_v12 = vpop.permute.xlu1 %2405 }
 0x196   : > { %3416 = vmatprep.mubr.msk.bf16.mxu1 %vm2691_vm3, %v2668_v37  ;;  %v2670_v14 = vsel %vm2638_vm15, %v2637_v2, %v2406_v12 }
 0x197   : > { %3417 = vmatmul.mubr.msk.bf16.gmra.mrb[12].mxu1 %vm2691_vm3, %v2670_v14 }
 0x198   : > { %v2921_v41 = vld [vmem:[#allocation3] ss:$2 sm:$0xff]  ;;  %v2937_v17 = vld [vmem:[#allocation3 + $0x1] ss:$2 sm:$0xff] }
 0x199   : > { %v2952_v4 = vmax.f32 %v2921_v41, %v2937_v17 }
 0x19b   : > { %v2989_v40 = vmul.f32 %v2952_v4, %v2952_v4 }
 0x1cd   : > { %v3394_v49 = vpop.f32.mrb[4].mxu0 }
 0x1ce   : > { %v2778_v0 = vpop.f32.mrb[5].mxu0  ;;  %v3406_v27 = vpop.f32.mrb[0].mxu1 }
 0x1cf   : > { %v2891_v18 = vmax.f32 %v2778_v0, %v3394_v49  ;;  %v3395_v3 = vpop.f32.mrb[6].mxu0  ;;  %v2826_v5 = vpop.f32.mrb[1].mxu1 }
 0x1d0   : > { %v2781_v56 = vpop.f32.mrb[7].mxu0  ;;  %v2897_v36 = vmax.f32 %v2826_v5, %v3406_v27  ;;  %v3407_v1 = vpop.f32.mrb[2].mxu1 }
 0x1d1   : > { %2907 = vst [vmem:[#allocation3 + $0x10] sm:$0xff] %v2891_v18  ;;  %v2892_v45 = vmax.f32 %v2781_v56, %v3395_v3  ;;  %v2829_v61 = vpop.f32.mrb[3].mxu1 }
 0x1d2   : > { %2913 = vst [vmem:[#allocation3 + $0x40] sm:$0xff] %v2897_v36  ;;  %v2898_v20 = vmax.f32 %v2829_v61, %v3407_v1 }
 0x1d3   : > { %2908 = vst [vmem:[#allocation3 + $0x18] sm:$0xff] %v2892_v45 }
 0x1d4   : > { %2914 = vst [vmem:[#allocation3 + $0x48] sm:$0xff] %v2898_v20 }
 0x1da   : > { %v2923_v62 = vld [vmem:[#allocation3 + $0x10] ss:$2 sm:$0xff]  ;;  %v2939_v51 = vld [vmem:[#allocation3 + $0x11] ss:$2 sm:$0xff] }
 0x1db   : > { %v2953_v30 = vmax.f32 %v2923_v62, %v2939_v51  ;;  %v2929_v47 = vld [vmem:[#allocation3 + $0x40] ss:$2 sm:$0xff]  ;;  %v2945_v28 = vld [vmem:[#allocation3 + $0x41] ss:$2 sm:$0xff] }
 0x1dc   : > { %v2956_v13 = vmax.f32 %v2929_v47, %v2945_v28 }
 0x1dd   : > { %v3343_v6 = vpack.c.bf16 %v2953_v30, %v2952_v4  ;;  %v2990_v57 = vmul.f32 %v2953_v30, %v2953_v30  ;;  %v2976_v8 = vadd.f32 %v2953_v30, %v2952_v4 }
 0x1de   : > { %v2993_v18 = vmul.f32 %v2956_v13, %v2956_v13 }
 0x1df   : > { %3344 = vst [vmem:[%s4834_s8] sm:$0xff] %v3343_v6   ;;  %v2997_v37 = vadd.f32 %v2990_v57, %v2989_v40 }
 0x20d   : > { %v3398_v60 = vpop.f32.mrb[8].mxu0 }
 0x20e   : > { %v2794_v10 = vpop.f32.mrb[9].mxu0  ;;  %v3410_v19 = vpop.f32.mrb[4].mxu1 }
 0x20f   : > { %v2893_v9 = vmax.f32 %v2794_v10, %v3398_v60  ;;  %v3399_v15 = vpop.f32.mrb[10].mxu0  ;;  %v2842_v52 = vpop.f32.mrb[5].mxu1 }
 0x210   : > { %v2797_v32 = vpop.f32.mrb[11].mxu0  ;;  %v2899_v29 = vmax.f32 %v2842_v52, %v3410_v19  ;;  %v3411_v38 = vpop.f32.mrb[6].mxu1 }
 0x211   : > { %2909 = vst [vmem:[#allocation3 + $0x20] sm:$0xff] %v2893_v9  ;;  %v2894_v58 = vmax.f32 %v2797_v32, %v3399_v15  ;;  %v2845_v21 = vpop.f32.mrb[7].mxu1 }
 0x212   : > { %2915 = vst [vmem:[#allocation3 + $0x50] sm:$0xff] %v2899_v29  ;;  %v2900_v43 = vmax.f32 %v2845_v21, %v3411_v38 }
 0x213   : > { %2910 = vst [vmem:[#allocation3 + $0x28] sm:$0xff] %v2894_v58 }
 0x214   : > { %2916 = vst [vmem:[#allocation3 + $0x58] sm:$0xff] %v2900_v43 }
 0x21a   : > { %v2925_v16 = vld [vmem:[#allocation3 + $0x20] ss:$2 sm:$0xff]  ;;  %v2941_v35 = vld [vmem:[#allocation3 + $0x21] ss:$2 sm:$0xff] }
 0x21b   : > { %v2931_v33 = vld [vmem:[#allocation3 + $0x50] ss:$2 sm:$0xff]  ;;  %v2947_v26 = vld [vmem:[#allocation3 + $0x51] ss:$2 sm:$0xff]  ;;  %v2954_v46 = vmax.f32 %v2925_v16, %v2941_v35 }
 0x21c   : > { %v2957_v54 = vmax.f32 %v2931_v33, %v2947_v26 }
 0x21d   : > { %v2991_v25 = vmul.f32 %v2954_v46, %v2954_v46  ;;  %v2977_v11 = vadd.f32 %v2976_v8, %v2954_v46 }
 0x21e   : > { %v3353_v42 = vpack.c.bf16 %v2957_v54, %v2956_v13  ;;  %v2994_v56 = vmul.f32 %v2957_v54, %v2957_v54 }
 0x21f   : > { %v2998_v12 = vadd.f32 %v2997_v37, %v2991_v25 }
 0x220   : > { %3361 = vst [vmem:[%s4834_s8 + $0x10] sm:$0xff] %v3353_v42  }
 0x24a   : > { %v3402_v23 = vpop.f32.mrb[12].mxu0 }
 0x24b   : > { %v2810_v48 = vpop.f32.mrb[13].mxu0 }
 0x24c   : > { %v2895_v22 = vmax.f32 %v2810_v48, %v3402_v23  ;;  %v3403_v24 = vpop.f32.mrb[14].mxu0 }
 0x24d   : > { %v3414_v50 = vpop.f32.mrb[8].mxu1  ;;  %v2813_v53 = vpop.f32.mrb[15].mxu0 }
 0x24e   : > { %v2858_v34 = vpop.f32.mrb[9].mxu1  ;;  %2911 = vst [vmem:[#allocation3 + $0x30] sm:$0xff] %v2895_v22  ;;  %v2896_v55 = vmax.f32 %v2813_v53, %v3403_v24 }
 0x24f   : > { %v2901_v44 = vmax.f32 %v2858_v34, %v3414_v50  ;;  %v3415_v39 = vpop.f32.mrb[10].mxu1 }
 0x250   : > { %v2861_v63 = vpop.f32.mrb[11].mxu1  ;;  %2912 = vst [vmem:[#allocation3 + $0x38] sm:$0xff] %v2896_v55 }
 0x251   : > { %2917 = vst [vmem:[#allocation3 + $0x60] sm:$0xff] %v2901_v44  ;;  %v2902_v7 = vmax.f32 %v2861_v63, %v3415_v39 }
 0x253   : > { %2918 = vst [vmem:[#allocation3 + $0x68] sm:$0xff] %v2902_v7 }
 0x257   : > { %v2927_v31 = vld [vmem:[#allocation3 + $0x30] ss:$2 sm:$0xff]  ;;  %v2943_v59 = vld [vmem:[#allocation3 + $0x31] ss:$2 sm:$0xff] }
 0x258   : > { %v2955_v2 = vmax.f32 %v2927_v31, %v2943_v59 }
 0x25a   : > { %v3348_v14 = vpack.c.bf16 %v2955_v2, %v2954_v46  ;;  %v2978_v49 = vadd.f32 %v2977_v11, %v2955_v2  ;;  %v2992_v0 = vmul.f32 %v2955_v2, %v2955_v2  ;;  %v2933_v51 = vld [vmem:[#allocation3 + $0x60] ss:$2 sm:$0xff]  ;;  %v2949_v4 = vld [vmem:[#allocation3 + $0x61] ss:$2 sm:$0xff] }
 0x25b   : > { %v2958_v30 = vmax.f32 %v2933_v51, %v2949_v4 }
 0x25c   : > { %3360 = vst [vmem:[%s4834_s8 + $0x8] sm:$0xff] %v3348_v14   ;;  %v2979_v3 = vadd.f32 %v2978_v49, %v2956_v13  ;;  %v2999_v27 = vadd.f32 %v2998_v12, %v2992_v0 }
 0x25d   : > { %v2995_v9 = vmul.f32 %v2958_v30, %v2958_v30 }
 0x25e   : > { %v3000_v5 = vadd.f32 %v2999_v27, %v2993_v18  ;;  %v2980_v45 = vadd.f32 %v2979_v3, %v2957_v54 }
 0x260   : > { %v3001_v36 = vadd.f32 %v3000_v5, %v2994_v56  ;;  %v2981_v10 = vadd.f32 %v2980_v45, %v2958_v30 }
 0x262   : > { %v3002_v19 = vadd.f32 %v3001_v36, %v2995_v9 }
 0x26a   : > { %v3418_v1 = vpop.f32.mrb[12].mxu1 }
 0x26b   : > { %v2874_v61 = vpop.f32.mrb[13].mxu1 }
 0x26c   : > { %v2903_v20 = vmax.f32 %v2874_v61, %v3418_v1  ;;  %v3419_v41 = vpop.f32.mrb[14].mxu1 }
 0x26d   : > { %v2877_v17 = vpop.f32.mrb[15].mxu1 }
 0x26e   : > { %2919 = vst [vmem:[#allocation3 + $0x70] sm:$0xff] %v2903_v20  ;;  %v2904_v62 = vmax.f32 %v2877_v17, %v3419_v41 }
 0x270   : > { %2920 = vst [vmem:[#allocation3 + $0x78] sm:$0xff] %v2904_v62 }
 0x277   : > { %v2935_v6 = vld [vmem:[#allocation3 + $0x70] ss:$2 sm:$0xff]  ;;  %v2951_v60 = vld [vmem:[#allocation3 + $0x71] ss:$2 sm:$0xff] }
 0x278   : > { %v2959_v15 = vmax.f32 %v2935_v6, %v2951_v60 }
 0x27a   : > { %v3358_v32 = vpack.c.bf16 %v2959_v15, %v2958_v30  ;;  %v2982_v52 = vadd.f32 %v2981_v10, %v2959_v15  ;;  %v2996_v58 = vmul.f32 %v2959_v15, %v2959_v15 }
 0x27c   : > { %3362 = vst [vmem:[%s4834_s8 + $0x18] sm:$0xff] %v3358_v32   ;;  %v2983_v29 = vrot.slane %v2982_v52, 4  ;;  %v3003_v38 = vadd.f32 %v3002_v19, %v2996_v58 }
 0x27e   : > { %v2984_v21 = vadd.f32 %v2983_v29, %v2982_v52  ;;  %v3004_v43 = vrot.slane %v3003_v38, 4 }
 0x280   : > { %v2985_v47 = vrot.slane %v2984_v21, 2  ;;  %v3005_v28 = vadd.f32 %v3004_v43, %v3003_v38 }
 0x282   : > { %v2986_v33 = vadd.f32 %v2985_v47, %v2984_v21  ;;  %v3006_v26 = vrot.slane %v3005_v28, 2 }
 0x284   : > { %v2987_v13 = vrot.slane %v2986_v33, 1  ;;  %v3007_v54 = vadd.f32 %v3006_v26, %v3005_v28 }
 0x286   : > { %v3008_v42 = vrot.slane %v3007_v54, 1  ;;  %v2988_v23 = vadd.f32 %v2987_v13, %v2986_v33 }
 0x288   : > { %v3009_v48 = vadd.f32 %v3008_v42, %v3007_v54 }
 0x28a   : > { %v3011_v50 = vsel %vm439_vm5, %v2988_v23, %v3009_v48 }
 0x28b   : > { %3012 = vst [vmem:[%s181_s14] sm:$0x3] %v3011_v50 }
 0x28c PF: > { %s14_s12 = sadd.s32 1, %s3606_s12  }
 0x28d   : > { %p11_p4 = scmp.ge.s32.totalorder %s14_s12, 4  }
 0x28f   :  { %13 = sbr.rel (!%p11_p4) target bundleno = 1 (0x1), region = 88 }

</bundles_post_ra>
